<compile_context>
chip_gen: v6e
topology: v6e:2x2x1
jax: 0.10.0
libtpu: 0.0.40
codegen_flags: <defaults>
</compile_context>

<pallas_src>
import numpy as np
import jax
import jax.numpy as jnp
from jax import lax
from jax.experimental import pallas as pl
from jax.experimental.pallas import tpu as pltpu

C1_IN, C1_OUT, K1 = 4, 8, 3
C2_OUT, K2 = 4, 5
H_IN, W_IN = 9, 7
H1, W1 = 9, 7                      # conv1 output spatial (k=3, pad=1)
H2, W2 = 7, 5                      # conv2 output spatial (k=5, pad=1)
F_IN = C1_IN * H_IN * W_IN         # 252
F_MID = C1_OUT * H1 * W1           # 504
FC1_IN = C2_OUT * H2 * W2          # 140
FC1_OUT = 128


def dqn_kernel(x_ref, w1_ref, b1_ref, w2_ref, b2_ref,
               wf1_ref, bf1_ref, wf2_ref, bf2_ref, out_ref):
    # conv1 (densified) + ReLU: (TB, 252) @ (252, 504)
    h = jnp.dot(x_ref[...], w1_ref[...], preferred_element_type=jnp.float32)
    h = jnp.maximum(h + b1_ref[...], 0.0)
    # conv2 (densified) + ReLU, output already in torch.flatten order: (TB, 140)
    h = jnp.dot(h, w2_ref[...], preferred_element_type=jnp.float32)
    h = jnp.maximum(h + b2_ref[...], 0.0)
    # fc1 + ReLU: (TB, 140) @ (140, 128)
    h = jnp.dot(h, wf1_ref[...], preferred_element_type=jnp.float32)
    h = jnp.maximum(h + bf1_ref[...], 0.0)
    # fc2, output lanes padded to a multiple of 128 (lane-dense store)
    out_ref[...] = (jnp.dot(h, wf2_ref[...], preferred_element_type=jnp.float32)
                    + bf2_ref[...])


def _conv_as_matrix(w, in_shape, padding):
    """Densify a conv into an (in_features, out_features) matrix.

    Weights-only preprocessing: pushes the identity basis of the flattened
    NCHW input space through the convolution.  The data-path convolution is
    then a single MXU matmul inside the Pallas kernel.
    """
    cin, h, wd = in_shape
    n = cin * h * wd
    eye = jnp.eye(n, dtype=jnp.float32).reshape(n, cin, h, wd)
    out = lax.conv_general_dilated(
        eye, w, (1, 1), ((padding, padding), (padding, padding)),
        dimension_numbers=("NCHW", "OIHW", "NCHW"))
    return out.reshape(n, -1)          # output flatten order = (cout, h, w)


def dqn_forward(x, params, *, tb=256):
    (w1, b1, w2, b2, wf1, bf1, wf2, bf2) = params
    B = x.shape[0]
    out_dim = wf2.shape[0]
    n_pad = pl.cdiv(out_dim, 128) * 128            # lane-dense output width

    # ---- parameter preprocessing (plain JAX, weights only) ----
    w1m = _conv_as_matrix(w1, (C1_IN, H_IN, W_IN), 1)          # (252, 504)
    b1m = jnp.broadcast_to(b1[:, None], (C1_OUT, H1 * W1)).reshape(1, F_MID)
    w2m = _conv_as_matrix(w2, (C1_OUT, H1, W1), 1)             # (504, 140)
    b2m = jnp.broadcast_to(b2[:, None], (C2_OUT, H2 * W2)).reshape(1, FC1_IN)
    wf1m = wf1.T                                               # (140, 128)
    bf1m = bf1.reshape(1, FC1_OUT)
    wf2m = jnp.pad(wf2.T, ((0, 0), (0, n_pad - out_dim)))      # (128, n_pad)
    bf2m = jnp.pad(bf2.reshape(1, out_dim), ((0, 0), (0, n_pad - out_dim)))

    # ---- input: NCHW flatten (c, h, w) -> (B, 252); pad batch to tile ----
    bp = pl.cdiv(B, tb) * tb
    x_flat = jnp.pad(x.reshape(B, F_IN), ((0, bp - B), (0, 0)))

    def full_spec(a):
        nd = a.ndim
        return pl.BlockSpec(a.shape, lambda i, _nd=nd: (0,) * _nd)

    out = pl.pallas_call(
        dqn_kernel,
        out_shape=jax.ShapeDtypeStruct((bp, n_pad), jnp.float32),
        grid=(bp // tb,),
        in_specs=[
            pl.BlockSpec((tb, F_IN), lambda i: (i, 0)),
            full_spec(w1m), full_spec(b1m),
            full_spec(w2m), full_spec(b2m),
            full_spec(wf1m), full_spec(bf1m),
            full_spec(wf2m), full_spec(bf2m),
        ],
        out_specs=pl.BlockSpec((tb, n_pad), lambda i: (i, 0)),
        compiler_params=pltpu.CompilerParams(
            dimension_semantics=("parallel",)),
    )(x_flat, w1m, b1m, w2m, b2m, wf1m, bf1m, wf2m, bf2m)
    return out[:B, :out_dim]


def dqn_reference(x, params):
    (w1, b1, w2, b2, wf1, bf1, wf2, bf2) = params
    dn = ("NCHW", "OIHW", "NCHW")
    y = lax.conv_general_dilated(x, w1, (1, 1), ((1, 1), (1, 1)),
                                 dimension_numbers=dn)
    y = jnp.maximum(y + b1[None, :, None, None], 0.0)
    y = lax.conv_general_dilated(y, w2, (1, 1), ((1, 1), (1, 1)),
                                 dimension_numbers=dn)
    y = jnp.maximum(y + b2[None, :, None, None], 0.0)
    y = y.reshape(x.shape[0], -1)
    y = jnp.maximum(y @ wf1.T + bf1, 0.0)
    return y @ wf2.T + bf2


if __name__ == "__main__":
    OUT = 16
    key = jax.random.PRNGKey(0)
    kx, kx2, kp = jax.random.split(key, 3)

    ks = jax.random.split(kp, 8)

    def uinit(k, shape, fan_in):
        bound = 1.0 / np.sqrt(fan_in)
        return jax.random.uniform(k, shape, jnp.float32, -bound, bound)

    params = (
        uinit(ks[0], (C1_OUT, C1_IN, K1, K1), C1_IN * K1 * K1),
        uinit(ks[1], (C1_OUT,), C1_IN * K1 * K1),
        uinit(ks[2], (C2_OUT, C1_OUT, K2, K2), C1_OUT * K2 * K2),
        uinit(ks[3], (C2_OUT,), C1_OUT * K2 * K2),
        uinit(ks[4], (FC1_OUT, FC1_IN), FC1_IN),
        uinit(ks[5], (FC1_OUT,), FC1_IN),
        uinit(ks[6], (OUT, FC1_OUT), FC1_OUT),
        uinit(ks[7], (OUT,), FC1_OUT),
    )

    def check(x):
        out = jax.block_until_ready(dqn_forward(x, params))
        ref = np.asarray(dqn_reference(x, params))
        assert out.shape == ref.shape, (out.shape, ref.shape)
        if not np.allclose(np.asarray(out), ref, rtol=2e-3, atol=2e-3):
            raise AssertionError(
                f"kernel/reference mismatch, max abs diff "
                f"{np.max(np.abs(np.asarray(out) - ref))}")

    # small batch (single grid step, padded up to the batch tile)
    check(jax.random.normal(kx, (2, C1_IN, H_IN, W_IN), jnp.float32))
    # larger batch exercising multiple grid steps + remainder padding
    check(jax.random.normal(kx2, (300, C1_IN, H_IN, W_IN), jnp.float32))
    print("KERNEL_OK")
</pallas_src>

<mosaic_0001>
module attributes {stable_mosaic.version = 11 : i64} {
  func.func @dqn_kernel(%arg0: i32, %arg1: memref<256x252xf32, #tpu.memory_space<vmem>>, %arg2: memref<252x504xf32, #tpu.memory_space<vmem>>, %arg3: memref<1x504xf32, #tpu.memory_space<vmem>>, %arg4: memref<504x140xf32, #tpu.memory_space<vmem>>, %arg5: memref<1x140xf32, #tpu.memory_space<vmem>>, %arg6: memref<140x128xf32, #tpu.memory_space<vmem>>, %arg7: memref<1x128xf32, #tpu.memory_space<vmem>>, %arg8: memref<128x128xf32, #tpu.memory_space<vmem>>, %arg9: memref<1x128xf32, #tpu.memory_space<vmem>>, %arg10: memref<256x128xf32, #tpu.memory_space<vmem>>) attributes {dimension_semantics = [#tpu.dimension_semantics<parallel>], iteration_bounds = array<i64: 1>, scalar_prefetch = 0 : i64, scratch_operands = 0 : i64, tpu.core_type = #tpu.core_type<tc>, window_params = [{transform_indices = @transform_0, window_bounds = array<i64: 256, 252>}, {pipeline_mode = #tpu.pipeline_mode<synchronous>, transform_indices = @transform_1, window_bounds = array<i64: 252, 504>}, {pipeline_mode = #tpu.pipeline_mode<synchronous>, transform_indices = @transform_2, window_bounds = array<i64: 1, 504>}, {pipeline_mode = #tpu.pipeline_mode<synchronous>, transform_indices = @transform_3, window_bounds = array<i64: 504, 140>}, {pipeline_mode = #tpu.pipeline_mode<synchronous>, transform_indices = @transform_4, window_bounds = array<i64: 1, 140>}, {pipeline_mode = #tpu.pipeline_mode<synchronous>, transform_indices = @transform_5, window_bounds = array<i64: 140, 128>}, {pipeline_mode = #tpu.pipeline_mode<synchronous>, transform_indices = @transform_6, window_bounds = array<i64: 1, 128>}, {pipeline_mode = #tpu.pipeline_mode<synchronous>, transform_indices = @transform_7, window_bounds = array<i64: 128, 128>}, {pipeline_mode = #tpu.pipeline_mode<synchronous>, transform_indices = @transform_8, window_bounds = array<i64: 1, 128>}, {transform_indices = @transform_9, window_bounds = array<i64: 256, 128>}]} {
    %c0 = arith.constant 0 : index
    %c0_0 = arith.constant 0 : index
    %0 = vector.load %arg1[%c0, %c0_0] : memref<256x252xf32, #tpu.memory_space<vmem>>, vector<256x252xf32>
    %c0_1 = arith.constant 0 : index
    %c0_2 = arith.constant 0 : index
    %1 = vector.load %arg2[%c0_1, %c0_2] : memref<252x504xf32, #tpu.memory_space<vmem>>, vector<252x504xf32>
    %cst = arith.constant dense<0.000000e+00> : vector<256x504xf32>
    %2 = tpu.matmul %0, %1, %cst {dimension_numbers = #tpu.dot_dimension_numbers<[1], [0], [0], [1], [0, 0, 1, 1], [], []>} : vector<256x252xf32>, vector<252x504xf32>, vector<256x504xf32> -> vector<256x504xf32>
    %c0_3 = arith.constant 0 : index
    %c0_4 = arith.constant 0 : index
    %3 = vector.load %arg3[%c0_3, %c0_4] : memref<1x504xf32, #tpu.memory_space<vmem>>, vector<1x504xf32>
    %4 = vector.broadcast %3 : vector<1x504xf32> to vector<256x504xf32>
    %5 = arith.addf %2, %4 : vector<256x504xf32>
    %cst_5 = arith.constant 0.000000e+00 : f32
    %6 = vector.broadcast %cst_5 : f32 to vector<256x504xf32>
    %7 = arith.maximumf %5, %6 : vector<256x504xf32>
    %c0_6 = arith.constant 0 : index
    %c0_7 = arith.constant 0 : index
    %8 = vector.load %arg4[%c0_6, %c0_7] : memref<504x140xf32, #tpu.memory_space<vmem>>, vector<504x140xf32>
    %cst_8 = arith.constant dense<0.000000e+00> : vector<256x140xf32>
    %9 = tpu.matmul %7, %8, %cst_8 {dimension_numbers = #tpu.dot_dimension_numbers<[1], [0], [0], [1], [0, 0, 1, 1], [], []>} : vector<256x504xf32>, vector<504x140xf32>, vector<256x140xf32> -> vector<256x140xf32>
    %c0_9 = arith.constant 0 : index
    %c0_10 = arith.constant 0 : index
    %10 = vector.load %arg5[%c0_9, %c0_10] : memref<1x140xf32, #tpu.memory_space<vmem>>, vector<1x140xf32>
    %11 = vector.broadcast %10 : vector<1x140xf32> to vector<256x140xf32>
    %12 = arith.addf %9, %11 : vector<256x140xf32>
    %cst_11 = arith.constant 0.000000e+00 : f32
    %13 = vector.broadcast %cst_11 : f32 to vector<256x140xf32>
    %14 = arith.maximumf %12, %13 : vector<256x140xf32>
    %c0_12 = arith.constant 0 : index
    %c0_13 = arith.constant 0 : index
    %15 = vector.load %arg6[%c0_12, %c0_13] : memref<140x128xf32, #tpu.memory_space<vmem>>, vector<140x128xf32>
    %cst_14 = arith.constant dense<0.000000e+00> : vector<256x128xf32>
    %16 = tpu.matmul %14, %15, %cst_14 {dimension_numbers = #tpu.dot_dimension_numbers<[1], [0], [0], [1], [0, 0, 1, 1], [], []>} : vector<256x140xf32>, vector<140x128xf32>, vector<256x128xf32> -> vector<256x128xf32>
    %c0_15 = arith.constant 0 : index
    %c0_16 = arith.constant 0 : index
    %17 = vector.load %arg7[%c0_15, %c0_16] : memref<1x128xf32, #tpu.memory_space<vmem>>, vector<1x128xf32>
    %18 = vector.broadcast %17 : vector<1x128xf32> to vector<256x128xf32>
    %19 = arith.addf %16, %18 : vector<256x128xf32>
    %cst_17 = arith.constant 0.000000e+00 : f32
    %20 = vector.broadcast %cst_17 : f32 to vector<256x128xf32>
    %21 = arith.maximumf %19, %20 : vector<256x128xf32>
    %c0_18 = arith.constant 0 : index
    %c0_19 = arith.constant 0 : index
    %22 = vector.load %arg8[%c0_18, %c0_19] : memref<128x128xf32, #tpu.memory_space<vmem>>, vector<128x128xf32>
    %cst_20 = arith.constant dense<0.000000e+00> : vector<256x128xf32>
    %23 = tpu.matmul %21, %22, %cst_20 {dimension_numbers = #tpu.dot_dimension_numbers<[1], [0], [0], [1], [0, 0, 1, 1], [], []>} : vector<256x128xf32>, vector<128x128xf32>, vector<256x128xf32> -> vector<256x128xf32>
    %c0_21 = arith.constant 0 : index
    %c0_22 = arith.constant 0 : index
    %24 = vector.load %arg9[%c0_21, %c0_22] : memref<1x128xf32, #tpu.memory_space<vmem>>, vector<1x128xf32>
    %25 = vector.broadcast %24 : vector<1x128xf32> to vector<256x128xf32>
    %26 = arith.addf %23, %25 : vector<256x128xf32>
    %c0_23 = arith.constant 0 : index
    %c0_24 = arith.constant 0 : index
    %27 = vector.load %arg10[%c0_23, %c0_24] : memref<256x128xf32, #tpu.memory_space<vmem>>, vector<256x128xf32>
    tpu.vector_store %arg10[%c0_23, %c0_24], %26 {strides = array<i32>} : memref<256x128xf32, #tpu.memory_space<vmem>>, vector<256x128xf32>,
    return
  }
  func.func @transform_0(%arg0: i32) -> (i32, i32) {
    %c0_i32 = arith.constant 0 : i32
    %c0_i32_0 = arith.constant 0 : i32
    return %arg0, %c0_i32 : i32, i32
  }
  func.func @transform_1(%arg0: i32) -> (i32, i32) {
    %c0_i32 = arith.constant 0 : i32
    %c0_i32_0 = arith.constant 0 : i32
    %c0_i32_1 = arith.constant 0 : i32
    return %c0_i32, %c0_i32_0 : i32, i32
  }
  func.func @transform_2(%arg0: i32) -> (i32, i32) {
    %c0_i32 = arith.constant 0 : i32
    %c0_i32_0 = arith.constant 0 : i32
    %c0_i32_1 = arith.constant 0 : i32
    return %c0_i32, %c0_i32_0 : i32, i32
  }
  func.func @transform_3(%arg0: i32) -> (i32, i32) {
    %c0_i32 = arith.constant 0 : i32
    %c0_i32_0 = arith.constant 0 : i32
    %c0_i32_1 = arith.constant 0 : i32
    return %c0_i32, %c0_i32_0 : i32, i32
  }
  func.func @transform_4(%arg0: i32) -> (i32, i32) {
    %c0_i32 = arith.constant 0 : i32
    %c0_i32_0 = arith.constant 0 : i32
    %c0_i32_1 = arith.constant 0 : i32
    return %c0_i32, %c0_i32_0 : i32, i32
  }
  func.func @transform_5(%arg0: i32) -> (i32, i32) {
    %c0_i32 = arith.constant 0 : i32
    %c0_i32_0 = arith.constant 0 : i32
    %c0_i32_1 = arith.constant 0 : i32
    return %c0_i32, %c0_i32_0 : i32, i32
  }
  func.func @transform_6(%arg0: i32) -> (i32, i32) {
    %c0_i32 = arith.constant 0 : i32
    %c0_i32_0 = arith.constant 0 : i32
    %c0_i32_1 = arith.constant 0 : i32
    return %c0_i32, %c0_i32_0 : i32, i32
  }
  func.func @transform_7(%arg0: i32) -> (i32, i32) {
    %c0_i32 = arith.constant 0 : i32
    %c0_i32_0 = arith.constant 0 : i32
    %c0_i32_1 = arith.constant 0 : i32
    return %c0_i32, %c0_i32_0 : i32, i32
  }
  func.func @transform_8(%arg0: i32) -> (i32, i32) {
    %c0_i32 = arith.constant 0 : i32
    %c0_i32_0 = arith.constant 0 : i32
    %c0_i32_1 = arith.constant 0 : i32
    return %c0_i32, %c0_i32_0 : i32, i32
  }
  func.func @transform_9(%arg0: i32) -> (i32, i32) {
    %c0_i32 = arith.constant 0 : i32
    %c0_i32_0 = arith.constant 0 : i32
    return %arg0, %c0_i32 : i32, i32
  }
}

</mosaic_0001>

<bundles_post_ra>
// kernel: tpu_custom_call.1
= control target key start
LH: loop header
LB: loop body
LE: loop exit
PB: predicated region body
PF: predicated region fallthrough
CT: control target
= control target key end

     0   :  { %vm344_vm0 = vcmask 1043456   ;;  %vm247_vm1 = vcmask 1014784   ;;  %s4400_s0 = inlined_call_operand.vmem [shape: f32[256,252], index: 0, kind: input, shape index: {}]   ;;  %s4401_s1 = inlined_call_operand.vmem [shape: f32[252,504], index: 1, kind: input, shape index: {}]   ;;  %s4402_s2 = inlined_call_operand.vmem [shape: f32[1,504], index: 2, kind: input, shape index: {}]   ;;  %s4403_s3 = inlined_call_operand.vmem [shape: f32[504,140], index: 3, kind: input, shape index: {}]   ;;  %s4404_s4 = inlined_call_operand.vmem [shape: f32[1,140], index: 4, kind: input, shape index: {}]   ;;  %s4405_s5 = inlined_call_operand.vmem [shape: f32[140,128], index: 5, kind: input, shape index: {}]   ;;  %s4406_s6 = inlined_call_operand.vmem [shape: f32[1,128], index: 6, kind: input, shape index: {}]   ;;  %s4407_s7 = inlined_call_operand.vmem [shape: f32[128,128], index: 7, kind: input, shape index: {}]   ;;  %s4408_s8 = inlined_call_operand.vmem [shape: f32[1,128], index: 8, kind: input, shape index: {}]   ;;  %s4409_s9 = inlined_call_operand.hbm [shape: f32[256,128], index: 9, kind: output, shape index: {}]  }
   0x1   :  { %v158_v0 = vld [vmem:[%s4401_s1 + $0x1e8] sm:$0xff]  ;;  %v160_v1 = vld [vmem:[%s4401_s1 + $0x1f8] sm:$0xff]  ;;  %v157_v2 = vld [vmem:[%s4401_s1 + $0x1e0] sm:$0xff] }
   0x2   :  { %357 = vmatprep.subr.mxu0 %v158_v0  ;;  %614 = vmatprep.subr.mxu1 %v160_v1  ;;  %v159_v3 = vld [vmem:[%s4401_s1 + $0x1f0] sm:$0xff]  ;;  %v154_v4 = vld [vmem:[%s4401_s1 + $0x1c8] sm:$0xff]  ;;  %v156_v5 = vld [vmem:[%s4401_s1 + $0x1d8] sm:$0xff] }
   0x3   :  { %358 = vmatpush1.msra.mxu0 %v157_v2  ;;  %615 = vmatpush1.msra.mxu1 %v159_v3  ;;  %v153_v6 = vld [vmem:[%s4401_s1 + $0x1c0] sm:$0xff]  ;;  %v155_v7 = vld [vmem:[%s4401_s1 + $0x1d0] sm:$0xff]  ;;  %v150_v8 = vld [vmem:[%s4401_s1 + $0x1a8] sm:$0xff] }
   0x4   :  { %359 = vmatprep.subr.mxu0 %v154_v4  ;;  %616 = vmatprep.subr.mxu1 %v156_v5  ;;  %v152_v9 = vld [vmem:[%s4401_s1 + $0x1b8] sm:$0xff]  ;;  %v149_v10 = vld [vmem:[%s4401_s1 + $0x1a0] sm:$0xff]  ;;  %v151_v11 = vld [vmem:[%s4401_s1 + $0x1b0] sm:$0xff] }
   0x5   :  { %360 = vmatpush1.msra.mxu0 %v153_v6  ;;  %617 = vmatpush1.msra.mxu1 %v155_v7  ;;  %v146_v12 = vld [vmem:[%s4401_s1 + $0x188] sm:$0xff]  ;;  %v148_v13 = vld [vmem:[%s4401_s1 + $0x198] sm:$0xff]  ;;  %v145_v14 = vld [vmem:[%s4401_s1 + $0x180] sm:$0xff] }
   0x6   :  { %361 = vmatprep.subr.mxu0 %v150_v8  ;;  %618 = vmatprep.subr.mxu1 %v152_v9  ;;  %v147_v15 = vld [vmem:[%s4401_s1 + $0x190] sm:$0xff]  ;;  %v142_v16 = vld [vmem:[%s4401_s1 + $0x168] sm:$0xff]  ;;  %v144_v17 = vld [vmem:[%s4401_s1 + $0x178] sm:$0xff] }
   0x7   :  { %362 = vmatpush1.msra.mxu0 %v149_v10  ;;  %619 = vmatpush1.msra.mxu1 %v151_v11  ;;  %v141_v18 = vld [vmem:[%s4401_s1 + $0x160] sm:$0xff]  ;;  %v143_v19 = vld [vmem:[%s4401_s1 + $0x170] sm:$0xff]  ;;  %v138_v20 = vld [vmem:[%s4401_s1 + $0x148] sm:$0xff] }
   0x8   :  { %363 = vmatprep.subr.mxu0 %v146_v12  ;;  %620 = vmatprep.subr.mxu1 %v148_v13  ;;  %v140_v21 = vld [vmem:[%s4401_s1 + $0x158] sm:$0xff]  ;;  %v137_v22 = vld [vmem:[%s4401_s1 + $0x140] sm:$0xff]  ;;  %v139_v23 = vld [vmem:[%s4401_s1 + $0x150] sm:$0xff] }
   0x9   :  { %364 = vmatpush1.msra.mxu0 %v145_v14  ;;  %621 = vmatpush1.msra.mxu1 %v147_v15  ;;  %v134_v24 = vld [vmem:[%s4401_s1 + $0x128] sm:$0xff]  ;;  %v136_v25 = vld [vmem:[%s4401_s1 + $0x138] sm:$0xff]  ;;  %v133_v26 = vld [vmem:[%s4401_s1 + $0x120] sm:$0xff] }
   0xa   :  { %365 = vmatprep.subr.mxu0 %v142_v16  ;;  %622 = vmatprep.subr.mxu1 %v144_v17  ;;  %v135_v27 = vld [vmem:[%s4401_s1 + $0x130] sm:$0xff]  ;;  %v130_v28 = vld [vmem:[%s4401_s1 + $0x108] sm:$0xff]  ;;  %v132_v29 = vld [vmem:[%s4401_s1 + $0x118] sm:$0xff] }
   0xb   :  { %366 = vmatpush1.msra.mxu0 %v141_v18  ;;  %623 = vmatpush1.msra.mxu1 %v143_v19  ;;  %v129_v30 = vld [vmem:[%s4401_s1 + $0x100] sm:$0xff]  ;;  %v131_v31 = vld [vmem:[%s4401_s1 + $0x110] sm:$0xff]  ;;  %v126_v32 = vld [vmem:[%s4401_s1 + $0xe8] sm:$0xff] }
   0xc   :  { %367 = vmatprep.subr.mxu0 %v138_v20  ;;  %624 = vmatprep.subr.mxu1 %v140_v21  ;;  %v128_v33 = vld [vmem:[%s4401_s1 + $0xf8] sm:$0xff]  ;;  %v125_v34 = vld [vmem:[%s4401_s1 + $0xe0] sm:$0xff]  ;;  %v127_v35 = vld [vmem:[%s4401_s1 + $0xf0] sm:$0xff] }
   0xd   :  { %368 = vmatpush1.msra.mxu0 %v137_v22  ;;  %625 = vmatpush1.msra.mxu1 %v139_v23  ;;  %v122_v36 = vld [vmem:[%s4401_s1 + $0xc8] sm:$0xff]  ;;  %v124_v37 = vld [vmem:[%s4401_s1 + $0xd8] sm:$0xff]  ;;  %v121_v38 = vld [vmem:[%s4401_s1 + $0xc0] sm:$0xff] }
   0xe   :  { %369 = vmatprep.subr.mxu0 %v134_v24  ;;  %626 = vmatprep.subr.mxu1 %v136_v25  ;;  %v123_v39 = vld [vmem:[%s4401_s1 + $0xd0] sm:$0xff]  ;;  %v118_v40 = vld [vmem:[%s4401_s1 + $0xa8] sm:$0xff]  ;;  %v120_v41 = vld [vmem:[%s4401_s1 + $0xb8] sm:$0xff] }
   0xf   :  { %370 = vmatpush1.msra.mxu0 %v133_v26  ;;  %627 = vmatpush1.msra.mxu1 %v135_v27  ;;  %v117_v42 = vld [vmem:[%s4401_s1 + $0xa0] sm:$0xff]  ;;  %v119_v43 = vld [vmem:[%s4401_s1 + $0xb0] sm:$0xff]  ;;  %v114_v44 = vld [vmem:[%s4401_s1 + $0x88] sm:$0xff] }
  0x10   :  { %371 = vmatprep.subr.mxu0 %v130_v28  ;;  %628 = vmatprep.subr.mxu1 %v132_v29  ;;  %v116_v45 = vld [vmem:[%s4401_s1 + $0x98] sm:$0xff]  ;;  %v113_v46 = vld [vmem:[%s4401_s1 + $0x80] sm:$0xff]  ;;  %v115_v47 = vld [vmem:[%s4401_s1 + $0x90] sm:$0xff] }
  0x11   :  { %372 = vmatpush1.msra.mxu0 %v129_v30  ;;  %629 = vmatpush1.msra.mxu1 %v131_v31  ;;  %v110_v48 = vld [vmem:[%s4401_s1 + $0x68] sm:$0xff]  ;;  %v112_v49 = vld [vmem:[%s4401_s1 + $0x78] sm:$0xff]  ;;  %v109_v50 = vld [vmem:[%s4401_s1 + $0x60] sm:$0xff] }
  0x12   :  { %373 = vmatprep.subr.mxu0 %v126_v32  ;;  %630 = vmatprep.subr.mxu1 %v128_v33  ;;  %v111_v51 = vld [vmem:[%s4401_s1 + $0x70] sm:$0xff]  ;;  %v106_v52 = vld [vmem:[%s4401_s1 + $0x48] sm:$0xff]  ;;  %v108_v53 = vld [vmem:[%s4401_s1 + $0x58] sm:$0xff] }
  0x13   :  { %374 = vmatpush1.msra.mxu0 %v125_v34  ;;  %631 = vmatpush1.msra.mxu1 %v127_v35  ;;  %v105_v54 = vld [vmem:[%s4401_s1 + $0x40] sm:$0xff]  ;;  %v107_v55 = vld [vmem:[%s4401_s1 + $0x50] sm:$0xff]  ;;  %v102_v56 = vld [vmem:[%s4401_s1 + $0x28] sm:$0xff] }
  0x14   :  { %375 = vmatprep.subr.mxu0 %v122_v36  ;;  %632 = vmatprep.subr.mxu1 %v124_v37  ;;  %v104_v57 = vld [vmem:[%s4401_s1 + $0x38] sm:$0xff]  ;;  %v101_v58 = vld [vmem:[%s4401_s1 + $0x20] sm:$0xff]  ;;  %v103_v59 = vld [vmem:[%s4401_s1 + $0x30] sm:$0xff] }
  0x15   :  { %376 = vmatpush1.msra.mxu0 %v121_v38  ;;  %633 = vmatpush1.msra.mxu1 %v123_v39  ;;  %v98_v60 = vld [vmem:[%s4401_s1 + $0x8] sm:$0xff]  ;;  %v100_v61 = vld [vmem:[%s4401_s1 + $0x18] sm:$0xff]  ;;  %v97_v62 = vld [vmem:[%s4401_s1] sm:$0xff] }
  0x16   :  { %377 = vmatprep.subr.mxu0 %v118_v40  ;;  %634 = vmatprep.subr.mxu1 %v120_v41  ;;  %v99_v63 = vld [vmem:[%s4401_s1 + $0x10] sm:$0xff]  ;;  %v222_v0 = vld [vmem:[%s4401_s1 + $0x3e8] sm:$0xf]  ;;  %v224_v1 = vld [vmem:[%s4401_s1 + $0x3f8] sm:$0xf] }
  0x17   :  { %378 = vmatpush1.msra.mxu0 %v117_v42  ;;  %635 = vmatpush1.msra.mxu1 %v119_v43  ;;  %v221_v2 = vld [vmem:[%s4401_s1 + $0x3e0] sm:$0xf]  ;;  %v223_v3 = vld [vmem:[%s4401_s1 + $0x3f0] sm:$0xf]  ;;  %v218_v4 = vld [vmem:[%s4401_s1 + $0x3c8] sm:$0xff] }
  0x18   :  { %379 = vmatprep.subr.mxu0 %v114_v44  ;;  %636 = vmatprep.subr.mxu1 %v116_v45  ;;  %v220_v5 = vld [vmem:[%s4401_s1 + $0x3d8] sm:$0xff]  ;;  %v217_v6 = vld [vmem:[%s4401_s1 + $0x3c0] sm:$0xff]  ;;  %v219_v7 = vld [vmem:[%s4401_s1 + $0x3d0] sm:$0xff] }
  0x19   :  { %380 = vmatpush1.msra.mxu0 %v113_v46  ;;  %637 = vmatpush1.msra.mxu1 %v115_v47  ;;  %v214_v8 = vld [vmem:[%s4401_s1 + $0x3a8] sm:$0xff]  ;;  %v216_v9 = vld [vmem:[%s4401_s1 + $0x3b8] sm:$0xff]  ;;  %v213_v10 = vld [vmem:[%s4401_s1 + $0x3a0] sm:$0xff] }
  0x1a   :  { %381 = vmatprep.subr.mxu0 %v110_v48  ;;  %638 = vmatprep.subr.mxu1 %v112_v49  ;;  %v215_v11 = vld [vmem:[%s4401_s1 + $0x3b0] sm:$0xff]  ;;  %v210_v12 = vld [vmem:[%s4401_s1 + $0x388] sm:$0xff]  ;;  %v212_v13 = vld [vmem:[%s4401_s1 + $0x398] sm:$0xff] }
  0x1b   :  { %382 = vmatpush1.msra.mxu0 %v109_v50  ;;  %639 = vmatpush1.msra.mxu1 %v111_v51  ;;  %v209_v14 = vld [vmem:[%s4401_s1 + $0x380] sm:$0xff]  ;;  %v211_v15 = vld [vmem:[%s4401_s1 + $0x390] sm:$0xff]  ;;  %v206_v16 = vld [vmem:[%s4401_s1 + $0x368] sm:$0xff] }
  0x1c   :  { %383 = vmatprep.subr.mxu0 %v106_v52  ;;  %640 = vmatprep.subr.mxu1 %v108_v53  ;;  %v208_v17 = vld [vmem:[%s4401_s1 + $0x378] sm:$0xff]  ;;  %v205_v18 = vld [vmem:[%s4401_s1 + $0x360] sm:$0xff]  ;;  %v207_v19 = vld [vmem:[%s4401_s1 + $0x370] sm:$0xff] }
  0x1d   :  { %384 = vmatpush1.msra.mxu0 %v105_v54  ;;  %641 = vmatpush1.msra.mxu1 %v107_v55  ;;  %v202_v20 = vld [vmem:[%s4401_s1 + $0x348] sm:$0xff]  ;;  %v204_v21 = vld [vmem:[%s4401_s1 + $0x358] sm:$0xff]  ;;  %v201_v22 = vld [vmem:[%s4401_s1 + $0x340] sm:$0xff] }
  0x1e   :  { %385 = vmatprep.subr.mxu0 %v102_v56  ;;  %642 = vmatprep.subr.mxu1 %v104_v57  ;;  %v203_v23 = vld [vmem:[%s4401_s1 + $0x350] sm:$0xff]  ;;  %v198_v24 = vld [vmem:[%s4401_s1 + $0x328] sm:$0xff]  ;;  %v200_v25 = vld [vmem:[%s4401_s1 + $0x338] sm:$0xff] }
  0x1f   :  { %386 = vmatpush1.msra.mxu0 %v101_v58  ;;  %643 = vmatpush1.msra.mxu1 %v103_v59  ;;  %v197_v26 = vld [vmem:[%s4401_s1 + $0x320] sm:$0xff]  ;;  %v199_v27 = vld [vmem:[%s4401_s1 + $0x330] sm:$0xff]  ;;  %v194_v28 = vld [vmem:[%s4401_s1 + $0x308] sm:$0xff] }
  0x20   :  { %387 = vmatprep.subr.mxu0 %v98_v60  ;;  %644 = vmatprep.subr.mxu1 %v100_v61  ;;  %v196_v29 = vld [vmem:[%s4401_s1 + $0x318] sm:$0xff]  ;;  %v193_v30 = vld [vmem:[%s4401_s1 + $0x300] sm:$0xff]  ;;  %v195_v31 = vld [vmem:[%s4401_s1 + $0x310] sm:$0xff] }
  0x21   :  { %388 = vmatpush1.msra.mxu0 %v97_v62  ;;  %645 = vmatpush1.msra.mxu1 %v99_v63  ;;  %v190_v32 = vld [vmem:[%s4401_s1 + $0x2e8] sm:$0xff]  ;;  %v192_v33 = vld [vmem:[%s4401_s1 + $0x2f8] sm:$0xff]  ;;  %v189_v34 = vld [vmem:[%s4401_s1 + $0x2e0] sm:$0xff] }
  0x22   :  { %2490 = vmatprep.subr.msk.mxu0 %vm344_vm0, %v222_v0  ;;  %2524 = vmatprep.subr.msk.mxu1 %vm344_vm0, %v224_v1  ;;  %v191_v35 = vld [vmem:[%s4401_s1 + $0x2f0] sm:$0xff]  ;;  %v186_v36 = vld [vmem:[%s4401_s1 + $0x2c8] sm:$0xff]  ;;  %v188_v37 = vld [vmem:[%s4401_s1 + $0x2d8] sm:$0xff] }
  0x23   :  { %2491 = vmatpush2.msk.msra.mxu0 %vm344_vm0, %v221_v2  ;;  %2525 = vmatpush2.msk.msra.mxu1 %vm344_vm0, %v223_v3  ;;  %v185_v38 = vld [vmem:[%s4401_s1 + $0x2c0] sm:$0xff]  ;;  %v187_v39 = vld [vmem:[%s4401_s1 + $0x2d0] sm:$0xff]  ;;  %v182_v40 = vld [vmem:[%s4401_s1 + $0x2a8] sm:$0xff] }
  0x24   :  { %391 = vmatprep.subr.mxu0 %v218_v4  ;;  %648 = vmatprep.subr.mxu1 %v220_v5  ;;  %v184_v41 = vld [vmem:[%s4401_s1 + $0x2b8] sm:$0xff]  ;;  %v181_v42 = vld [vmem:[%s4401_s1 + $0x2a0] sm:$0xff]  ;;  %v183_v43 = vld [vmem:[%s4401_s1 + $0x2b0] sm:$0xff] }
  0x25   :  { %392 = vmatpush2.msra.mxu0 %v217_v6  ;;  %649 = vmatpush2.msra.mxu1 %v219_v7  ;;  %v178_v44 = vld [vmem:[%s4401_s1 + $0x288] sm:$0xff]  ;;  %v180_v45 = vld [vmem:[%s4401_s1 + $0x298] sm:$0xff]  ;;  %v177_v46 = vld [vmem:[%s4401_s1 + $0x280] sm:$0xff] }
  0x26   :  { %393 = vmatprep.subr.mxu0 %v214_v8  ;;  %650 = vmatprep.subr.mxu1 %v216_v9  ;;  %v179_v47 = vld [vmem:[%s4401_s1 + $0x290] sm:$0xff]  ;;  %v174_v48 = vld [vmem:[%s4401_s1 + $0x268] sm:$0xff]  ;;  %v176_v49 = vld [vmem:[%s4401_s1 + $0x278] sm:$0xff] }
  0x27   :  { %394 = vmatpush2.msra.mxu0 %v213_v10  ;;  %651 = vmatpush2.msra.mxu1 %v215_v11  ;;  %v173_v50 = vld [vmem:[%s4401_s1 + $0x260] sm:$0xff]  ;;  %v175_v51 = vld [vmem:[%s4401_s1 + $0x270] sm:$0xff]  ;;  %v170_v52 = vld [vmem:[%s4401_s1 + $0x248] sm:$0xff] }
  0x28   :  { %395 = vmatprep.subr.mxu0 %v210_v12  ;;  %652 = vmatprep.subr.mxu1 %v212_v13  ;;  %v172_v53 = vld [vmem:[%s4401_s1 + $0x258] sm:$0xff]  ;;  %v169_v54 = vld [vmem:[%s4401_s1 + $0x240] sm:$0xff]  ;;  %v171_v55 = vld [vmem:[%s4401_s1 + $0x250] sm:$0xff] }
  0x29   :  { %396 = vmatpush2.msra.mxu0 %v209_v14  ;;  %653 = vmatpush2.msra.mxu1 %v211_v15  ;;  %v166_v56 = vld [vmem:[%s4401_s1 + $0x228] sm:$0xff]  ;;  %v168_v57 = vld [vmem:[%s4401_s1 + $0x238] sm:$0xff]  ;;  %v165_v58 = vld [vmem:[%s4401_s1 + $0x220] sm:$0xff] }
  0x2a   :  { %397 = vmatprep.subr.mxu0 %v206_v16  ;;  %654 = vmatprep.subr.mxu1 %v208_v17  ;;  %v167_v59 = vld [vmem:[%s4401_s1 + $0x230] sm:$0xff]  ;;  %v162_v60 = vld [vmem:[%s4401_s1 + $0x208] sm:$0xff]  ;;  %v164_v61 = vld [vmem:[%s4401_s1 + $0x218] sm:$0xff] }
  0x2b   :  { %398 = vmatpush2.msra.mxu0 %v205_v18  ;;  %655 = vmatpush2.msra.mxu1 %v207_v19  ;;  %v161_v62 = vld [vmem:[%s4401_s1 + $0x200] sm:$0xff]  ;;  %v34_v63 = vld [vmem:[%s4400_s0 + $0x8] sm:$0xff]  ;;  %v163_v0 = vld [vmem:[%s4401_s1 + $0x210] sm:$0xff] }
  0x2c   :  { %399 = vmatprep.subr.mxu0 %v202_v20  ;;  %656 = vmatprep.subr.mxu1 %v204_v21  ;;  %v33_v1 = vld [vmem:[%s4400_s0] sm:$0xff]  ;;  %v36_v2 = vld [vmem:[%s4400_s0 + $0x18] sm:$0xff]  ;;  %v1029_v5 = vld [vmem:[%s4403_s3 + $0xf0] sm:$0xff] }
  0x2d   :  { %400 = vmatpush2.msra.mxu0 %v201_v22  ;;  %657 = vmatpush2.msra.mxu1 %v203_v23  ;;  %v1030_v3 = vld [vmem:[%s4403_s3 + $0xf8] sm:$0xff]  ;;  %v1093_v6 = vld [vmem:[%s4403_s3 + $0x2f0] sm:$0xff]  ;;  %v38_v8 = vld [vmem:[%s4400_s0 + $0x28] sm:$0xff] }
  0x2e   :  { %401 = vmatprep.subr.mxu0 %v198_v24  ;;  %658 = vmatprep.subr.mxu1 %v200_v25  ;;  %v1094_v4 = vld [vmem:[%s4403_s3 + $0x2f8] sm:$0xff]  ;;  %v35_v7 = vld [vmem:[%s4400_s0 + $0x10] sm:$0xff]  ;;  %v1028_v9 = vld [vmem:[%s4403_s3 + $0xe8] sm:$0xff] }
  0x2f   :  { %402 = vmatpush2.msra.mxu0 %v197_v26  ;;  %659 = vmatpush2.msra.mxu1 %v199_v27  ;;  %v1092_v10 = vld [vmem:[%s4403_s3 + $0x2e8] sm:$0xff]  ;;  %v1027_v11 = vld [vmem:[%s4403_s3 + $0xe0] sm:$0xff]  ;;  %v40_v14 = vld [vmem:[%s4400_s0 + $0x38] sm:$0xff] }
  0x30   :  { %403 = vmatprep.subr.mxu0 %v194_v28  ;;  %660 = vmatprep.subr.mxu1 %v196_v29  ;;  %v1091_v12 = vld [vmem:[%s4403_s3 + $0x2e0] sm:$0xff]  ;;  %v1026_v15 = vld [vmem:[%s4403_s3 + $0xd8] sm:$0xff]  ;;  %v1025_v17 = vld [vmem:[%s4403_s3 + $0xd0] sm:$0xff] }
  0x31   :  { %404 = vmatpush2.msra.mxu0 %v193_v30  ;;  %661 = vmatpush2.msra.mxu1 %v195_v31  ;;  %v37_v13 = vld [vmem:[%s4400_s0 + $0x20] sm:$0xff]  ;;  %v1090_v16 = vld [vmem:[%s4403_s3 + $0x2d8] sm:$0xff]  ;;  %v1089_v18 = vld [vmem:[%s4403_s3 + $0x2d0] sm:$0xff] }
  0x32   :  { %405 = vmatprep.subr.mxu0 %v190_v32  ;;  %662 = vmatprep.subr.mxu1 %v192_v33  ;;  %v39_v19 = vld [vmem:[%s4400_s0 + $0x30] sm:$0xff]  ;;  %v42_v20 = vld [vmem:[%s4400_s0 + $0x48] sm:$0xff]  ;;  %v1023_v23 = vld [vmem:[%s4403_s3 + $0xc0] sm:$0xff] }
  0x33   :  { %406 = vmatpush2.msra.mxu0 %v189_v34  ;;  %663 = vmatpush2.msra.mxu1 %v191_v35  ;;  %v1024_v21 = vld [vmem:[%s4403_s3 + $0xc8] sm:$0xff]  ;;  %v1087_v24 = vld [vmem:[%s4403_s3 + $0x2c0] sm:$0xff]  ;;  %v44_v26 = vld [vmem:[%s4400_s0 + $0x58] sm:$0xff] }
  0x34   :  { %407 = vmatprep.subr.mxu0 %v186_v36  ;;  %664 = vmatprep.subr.mxu1 %v188_v37  ;;  %v1088_v22 = vld [vmem:[%s4403_s3 + $0x2c8] sm:$0xff]  ;;  %v41_v25 = vld [vmem:[%s4400_s0 + $0x40] sm:$0xff]  ;;  %v1022_v27 = vld [vmem:[%s4403_s3 + $0xb8] sm:$0xff] }
  0x35   :  { %408 = vmatpush2.msra.mxu0 %v185_v38  ;;  %665 = vmatpush2.msra.mxu1 %v187_v39  ;;  %v1086_v28 = vld [vmem:[%s4403_s3 + $0x2b8] sm:$0xff]  ;;  %v1021_v29 = vld [vmem:[%s4403_s3 + $0xb0] sm:$0xff]  ;;  %v46_v32 = vld [vmem:[%s4400_s0 + $0x68] sm:$0xff] }
  0x36   :  { %409 = vmatprep.subr.mxu0 %v182_v40  ;;  %666 = vmatprep.subr.mxu1 %v184_v41  ;;  %v1085_v30 = vld [vmem:[%s4403_s3 + $0x2b0] sm:$0xff]  ;;  %v1020_v33 = vld [vmem:[%s4403_s3 + $0xa8] sm:$0xff]  ;;  %v1019_v35 = vld [vmem:[%s4403_s3 + $0xa0] sm:$0xff] }
  0x37   :  { %410 = vmatpush2.msra.mxu0 %v181_v42  ;;  %667 = vmatpush2.msra.mxu1 %v183_v43  ;;  %v43_v31 = vld [vmem:[%s4400_s0 + $0x50] sm:$0xff]  ;;  %v1084_v34 = vld [vmem:[%s4403_s3 + $0x2a8] sm:$0xff]  ;;  %v1083_v36 = vld [vmem:[%s4403_s3 + $0x2a0] sm:$0xff] }
  0x38   :  { %411 = vmatprep.subr.mxu0 %v178_v44  ;;  %668 = vmatprep.subr.mxu1 %v180_v45  ;;  %v45_v37 = vld [vmem:[%s4400_s0 + $0x60] sm:$0xff]  ;;  %v48_v38 = vld [vmem:[%s4400_s0 + $0x78] sm:$0xff]  ;;  %v1017_v41 = vld [vmem:[%s4403_s3 + $0x90] sm:$0xff] }
  0x39   :  { %412 = vmatpush2.msra.mxu0 %v177_v46  ;;  %669 = vmatpush2.msra.mxu1 %v179_v47  ;;  %v1018_v39 = vld [vmem:[%s4403_s3 + $0x98] sm:$0xff]  ;;  %v1081_v42 = vld [vmem:[%s4403_s3 + $0x290] sm:$0xff]  ;;  %v50_v44 = vld [vmem:[%s4400_s0 + $0x88] sm:$0xff] }
  0x3a   :  { %413 = vmatprep.subr.mxu0 %v174_v48  ;;  %670 = vmatprep.subr.mxu1 %v176_v49  ;;  %v1082_v40 = vld [vmem:[%s4403_s3 + $0x298] sm:$0xff]  ;;  %v47_v43 = vld [vmem:[%s4400_s0 + $0x70] sm:$0xff]  ;;  %v1016_v45 = vld [vmem:[%s4403_s3 + $0x88] sm:$0xff] }
  0x3b   :  { %414 = vmatpush2.msra.mxu0 %v173_v50  ;;  %671 = vmatpush2.msra.mxu1 %v175_v51  ;;  %v1080_v46 = vld [vmem:[%s4403_s3 + $0x288] sm:$0xff]  ;;  %v1015_v47 = vld [vmem:[%s4403_s3 + $0x80] sm:$0xff]  ;;  %v52_v50 = vld [vmem:[%s4400_s0 + $0x98] sm:$0xff] }
  0x3c   :  { %415 = vmatprep.subr.mxu0 %v170_v52  ;;  %672 = vmatprep.subr.mxu1 %v172_v53  ;;  %v1079_v48 = vld [vmem:[%s4403_s3 + $0x280] sm:$0xff]  ;;  %v1014_v51 = vld [vmem:[%s4403_s3 + $0x78] sm:$0xff]  ;;  %v1013_v53 = vld [vmem:[%s4403_s3 + $0x70] sm:$0xff] }
  0x3d   :  { %416 = vmatpush2.msra.mxu0 %v169_v54  ;;  %673 = vmatpush2.msra.mxu1 %v171_v55  ;;  %v49_v49 = vld [vmem:[%s4400_s0 + $0x80] sm:$0xff]  ;;  %v1078_v52 = vld [vmem:[%s4403_s3 + $0x278] sm:$0xff]  ;;  %v1077_v54 = vld [vmem:[%s4403_s3 + $0x270] sm:$0xff] }
  0x3e   :  { %417 = vmatprep.subr.mxu0 %v166_v56  ;;  %674 = vmatprep.subr.mxu1 %v168_v57  ;;  %v51_v55 = vld [vmem:[%s4400_s0 + $0x90] sm:$0xff]  ;;  %v54_v56 = vld [vmem:[%s4400_s0 + $0xa8] sm:$0xff] }
  0x3f   :  { %418 = vmatpush2.msra.mxu0 %v165_v58  ;;  %675 = vmatpush2.msra.mxu1 %v167_v59  ;;  %v1012_v57 = vld [vmem:[%s4403_s3 + $0x68] sm:$0xff]  ;;  %v1011_v59 = vld [vmem:[%s4403_s3 + $0x60] sm:$0xff] }
  0x40   :  { %419 = vmatprep.subr.mxu0 %v162_v60  ;;  %676 = vmatprep.subr.mxu1 %v164_v61  ;;  %v1076_v58 = vld [vmem:[%s4403_s3 + $0x268] sm:$0xff]  ;;  %v1075_v60 = vld [vmem:[%s4403_s3 + $0x260] sm:$0xff] }
  0x41   :  { %420 = vmatpush2.msra.mxu0 %v161_v62  ;;  %2492 = vmatprep.mubr.msk.f32.mxu0 %vm247_vm1, %v34_v63  ;;  %v53_v61 = vld [vmem:[%s4400_s0 + $0xa0] sm:$0xff]  ;;  %v56_v62 = vld [vmem:[%s4400_s0 + $0xb8] sm:$0xff] }
  0x42   :  { %677 = vmatpush2.msra.mxu1 %v163_v0  ;;  %2526 = vmatprep.mubr.msk.f32.mxu1 %vm247_vm1, %v34_v63 }
  0x43   :  { %422 = vmatmul.mubr.f32.vlgmr.msra.gmra.mxu0 %v33_v1  ;;  %679 = vmatmul.mubr.f32.vlgmr.msra.gmra.mxu1 %v33_v1 }
  0x44   :  { %2493 = vmatprep.mubr.msk.f32.mxu0 %vm247_vm1, %v36_v2  ;;  %2527 = vmatprep.mubr.msk.f32.mxu1 %vm247_vm1, %v36_v2 }
  0x45   :  { %1234 = vmatprep.subr.mxu0 %v1030_v3  ;;  %1491 = vmatprep.subr.mxu1 %v1094_v4 }
  0x46   :  { %1235 = vmatpush1.msra.mxu0 %v1029_v5  ;;  %1492 = vmatpush1.msra.mxu1 %v1093_v6 }
  0x47   :  { %428 = vmatmul.mubr.f32.gmra.mxu0 %v35_v7  ;;  %685 = vmatmul.mubr.f32.gmra.mxu1 %v35_v7 }
  0x48   :  { %2494 = vmatprep.mubr.msk.f32.mxu0 %vm247_vm1, %v38_v8  ;;  %2528 = vmatprep.mubr.msk.f32.mxu1 %vm247_vm1, %v38_v8 }
  0x49   :  { %1236 = vmatprep.subr.mxu0 %v1028_v9  ;;  %1493 = vmatprep.subr.mxu1 %v1092_v10 }
  0x4a   :  { %1237 = vmatpush1.msra.mxu0 %v1027_v11  ;;  %1494 = vmatpush1.msra.mxu1 %v1091_v12 }
  0x4b   :  { %434 = vmatmul.mubr.f32.gmra.mxu0 %v37_v13  ;;  %691 = vmatmul.mubr.f32.gmra.mxu1 %v37_v13 }
  0x4c   :  { %2495 = vmatprep.mubr.msk.f32.mxu0 %vm247_vm1, %v40_v14  ;;  %2529 = vmatprep.mubr.msk.f32.mxu1 %vm247_vm1, %v40_v14 }
  0x4d   :  { %1238 = vmatprep.subr.mxu0 %v1026_v15  ;;  %1495 = vmatprep.subr.mxu1 %v1090_v16 }
  0x4e   :  { %1239 = vmatpush1.msra.mxu0 %v1025_v17  ;;  %1496 = vmatpush1.msra.mxu1 %v1089_v18 }
  0x4f   :  { %440 = vmatmul.mubr.f32.gmra.mxu0 %v39_v19  ;;  %697 = vmatmul.mubr.f32.gmra.mxu1 %v39_v19 }
  0x50   :  { %2496 = vmatprep.mubr.msk.f32.mxu0 %vm247_vm1, %v42_v20  ;;  %2530 = vmatprep.mubr.msk.f32.mxu1 %vm247_vm1, %v42_v20 }
  0x51   :  { %1240 = vmatprep.subr.mxu0 %v1024_v21  ;;  %1497 = vmatprep.subr.mxu1 %v1088_v22 }
  0x52   :  { %1241 = vmatpush1.msra.mxu0 %v1023_v23  ;;  %1498 = vmatpush1.msra.mxu1 %v1087_v24 }
  0x53   :  { %446 = vmatmul.mubr.f32.gmra.mxu0 %v41_v25  ;;  %703 = vmatmul.mubr.f32.gmra.mxu1 %v41_v25 }
  0x54   :  { %2497 = vmatprep.mubr.msk.f32.mxu0 %vm247_vm1, %v44_v26  ;;  %2531 = vmatprep.mubr.msk.f32.mxu1 %vm247_vm1, %v44_v26 }
  0x55   :  { %1242 = vmatprep.subr.mxu0 %v1022_v27  ;;  %1499 = vmatprep.subr.mxu1 %v1086_v28 }
  0x56   :  { %1243 = vmatpush1.msra.mxu0 %v1021_v29  ;;  %1500 = vmatpush1.msra.mxu1 %v1085_v30 }
  0x57   :  { %452 = vmatmul.mubr.f32.gmra.mxu0 %v43_v31  ;;  %709 = vmatmul.mubr.f32.gmra.mxu1 %v43_v31 }
  0x58   :  { %2498 = vmatprep.mubr.msk.f32.mxu0 %vm247_vm1, %v46_v32  ;;  %2532 = vmatprep.mubr.msk.f32.mxu1 %vm247_vm1, %v46_v32 }
  0x59   :  { %1244 = vmatprep.subr.mxu0 %v1020_v33  ;;  %1501 = vmatprep.subr.mxu1 %v1084_v34 }
  0x5a   :  { %1245 = vmatpush1.msra.mxu0 %v1019_v35  ;;  %1502 = vmatpush1.msra.mxu1 %v1083_v36 }
  0x5b   :  { %458 = vmatmul.mubr.f32.gmra.mxu0 %v45_v37  ;;  %715 = vmatmul.mubr.f32.gmra.mxu1 %v45_v37 }
  0x5c   :  { %2499 = vmatprep.mubr.msk.f32.mxu0 %vm247_vm1, %v48_v38  ;;  %2533 = vmatprep.mubr.msk.f32.mxu1 %vm247_vm1, %v48_v38 }
  0x5d   :  { %1246 = vmatprep.subr.mxu0 %v1018_v39  ;;  %1503 = vmatprep.subr.mxu1 %v1082_v40 }
  0x5e   :  { %1247 = vmatpush1.msra.mxu0 %v1017_v41  ;;  %1504 = vmatpush1.msra.mxu1 %v1081_v42 }
  0x5f   :  { %464 = vmatmul.mubr.f32.gmra.mxu0 %v47_v43  ;;  %721 = vmatmul.mubr.f32.gmra.mxu1 %v47_v43 }
  0x60   :  { %2500 = vmatprep.mubr.msk.f32.mxu0 %vm247_vm1, %v50_v44  ;;  %2534 = vmatprep.mubr.msk.f32.mxu1 %vm247_vm1, %v50_v44 }
  0x61   :  { %1248 = vmatprep.subr.mxu0 %v1016_v45  ;;  %1505 = vmatprep.subr.mxu1 %v1080_v46 }
  0x62   :  { %1249 = vmatpush1.msra.mxu0 %v1015_v47  ;;  %1506 = vmatpush1.msra.mxu1 %v1079_v48 }
  0x63   :  { %470 = vmatmul.mubr.f32.gmra.mxu0 %v49_v49  ;;  %727 = vmatmul.mubr.f32.gmra.mxu1 %v49_v49 }
  0x64   :  { %2501 = vmatprep.mubr.msk.f32.mxu0 %vm247_vm1, %v52_v50  ;;  %2535 = vmatprep.mubr.msk.f32.mxu1 %vm247_vm1, %v52_v50 }
  0x65   :  { %1250 = vmatprep.subr.mxu0 %v1014_v51  ;;  %1507 = vmatprep.subr.mxu1 %v1078_v52 }
  0x66   :  { %1251 = vmatpush1.msra.mxu0 %v1013_v53  ;;  %1508 = vmatpush1.msra.mxu1 %v1077_v54 }
  0x67   :  { %476 = vmatmul.mubr.f32.gmra.mxu0 %v51_v55  ;;  %733 = vmatmul.mubr.f32.gmra.mxu1 %v51_v55 }
  0x68   :  { %2502 = vmatprep.mubr.msk.f32.mxu0 %vm247_vm1, %v54_v56  ;;  %2536 = vmatprep.mubr.msk.f32.mxu1 %vm247_vm1, %v54_v56 }
  0x69   :  { %1252 = vmatprep.subr.mxu0 %v1012_v57  ;;  %1509 = vmatprep.subr.mxu1 %v1076_v58 }
  0x6a   :  { %14 = vsyncpa [#allocation3], 0  ;;  %1253 = vmatpush1.msra.mxu0 %v1011_v59  ;;  %v1010_v63 = vld [vmem:[%s4403_s3 + $0x58] sm:$0xff]  ;;  %1510 = vmatpush1.msra.mxu1 %v1075_v60  ;;  %v1009_v1 = vld [vmem:[%s4403_s3 + $0x50] sm:$0xff]  ;;  %vm1137_vm2 = vcmask 982016   ;;  %vm1837_vm3 = vcmask 97280  }
  0x6b   :  { %v1074_v0 = vld [vmem:[%s4403_s3 + $0x258] sm:$0xff]  ;;  %482 = vmatmul.mubr.f32.gmra.mxu0 %v53_v61  ;;  %739 = vmatmul.mubr.f32.gmra.mxu1 %v53_v61  ;;  %v1073_v2 = vld [vmem:[%s4403_s3 + $0x250] sm:$0xff]  ;;  %v58_v4 = vld [vmem:[%s4400_s0 + $0xc8] sm:$0xff] }
  0x6c   :  { %2503 = vmatprep.mubr.msk.f32.mxu0 %vm247_vm1, %v56_v62  ;;  %2537 = vmatprep.mubr.msk.f32.mxu1 %vm247_vm1, %v56_v62  ;;  %v55_v3 = vld [vmem:[%s4400_s0 + $0xb0] sm:$0xff]  ;;  %v1008_v5 = vld [vmem:[%s4403_s3 + $0x48] sm:$0xff]  ;;  %v1007_v7 = vld [vmem:[%s4403_s3 + $0x40] sm:$0xff] }
  0x6d   :  { %1254 = vmatprep.subr.mxu0 %v1010_v63  ;;  %1511 = vmatprep.subr.mxu1 %v1074_v0  ;;  %v1072_v6 = vld [vmem:[%s4403_s3 + $0x248] sm:$0xff]  ;;  %v1071_v8 = vld [vmem:[%s4403_s3 + $0x240] sm:$0xff]  ;;  %v60_v10 = vld [vmem:[%s4400_s0 + $0xd8] sm:$0xff] }
  0x6e   :  { %1255 = vmatpush1.msra.mxu0 %v1009_v1  ;;  %1512 = vmatpush1.msra.mxu1 %v1073_v2  ;;  %v57_v9 = vld [vmem:[%s4400_s0 + $0xc0] sm:$0xff]  ;;  %v1006_v11 = vld [vmem:[%s4403_s3 + $0x38] sm:$0xff]  ;;  %v1005_v13 = vld [vmem:[%s4403_s3 + $0x30] sm:$0xff] }
  0x6f   :  { %488 = vmatmul.mubr.f32.gmra.mxu0 %v55_v3  ;;  %745 = vmatmul.mubr.f32.gmra.mxu1 %v55_v3  ;;  %v1070_v12 = vld [vmem:[%s4403_s3 + $0x238] sm:$0xff]  ;;  %v1069_v14 = vld [vmem:[%s4403_s3 + $0x230] sm:$0xff]  ;;  %v62_v16 = vld [vmem:[%s4400_s0 + $0xe8] sm:$0xff] }
  0x70   :  { %2504 = vmatprep.mubr.msk.f32.mxu0 %vm247_vm1, %v58_v4  ;;  %2538 = vmatprep.mubr.msk.f32.mxu1 %vm247_vm1, %v58_v4  ;;  %v59_v15 = vld [vmem:[%s4400_s0 + $0xd0] sm:$0xff]  ;;  %v1004_v17 = vld [vmem:[%s4403_s3 + $0x28] sm:$0xff]  ;;  %v1003_v19 = vld [vmem:[%s4403_s3 + $0x20] sm:$0xff] }
  0x71   :  { %1256 = vmatprep.subr.mxu0 %v1008_v5  ;;  %1513 = vmatprep.subr.mxu1 %v1072_v6  ;;  %v1068_v18 = vld [vmem:[%s4403_s3 + $0x228] sm:$0xff]  ;;  %v1067_v20 = vld [vmem:[%s4403_s3 + $0x220] sm:$0xff]  ;;  %v64_v22 = vld [vmem:[%s4400_s0 + $0xf8] sm:$0xff] }
  0x72   :  { %1257 = vmatpush1.msra.mxu0 %v1007_v7  ;;  %1514 = vmatpush1.msra.mxu1 %v1071_v8  ;;  %v61_v21 = vld [vmem:[%s4400_s0 + $0xe0] sm:$0xff]  ;;  %v1002_v23 = vld [vmem:[%s4403_s3 + $0x18] sm:$0xff]  ;;  %v1001_v25 = vld [vmem:[%s4403_s3 + $0x10] sm:$0xff] }
  0x73   :  { %494 = vmatmul.mubr.f32.gmra.mxu0 %v57_v9  ;;  %751 = vmatmul.mubr.f32.gmra.mxu1 %v57_v9  ;;  %v1066_v24 = vld [vmem:[%s4403_s3 + $0x218] sm:$0xff]  ;;  %v1065_v26 = vld [vmem:[%s4403_s3 + $0x210] sm:$0xff]  ;;  %v66_v28 = vld [vmem:[%s4400_s0 + $0x108] sm:$0xff] }
  0x74   :  { %2505 = vmatprep.mubr.msk.f32.mxu0 %vm247_vm1, %v60_v10  ;;  %2539 = vmatprep.mubr.msk.f32.mxu1 %vm247_vm1, %v60_v10  ;;  %v63_v27 = vld [vmem:[%s4400_s0 + $0xf0] sm:$0xff]  ;;  %v1000_v29 = vld [vmem:[%s4403_s3 + $0x8] sm:$0xff]  ;;  %v999_v31 = vld [vmem:[%s4403_s3] sm:$0xff] }
  0x75   :  { %1258 = vmatprep.subr.mxu0 %v1006_v11  ;;  %1515 = vmatprep.subr.mxu1 %v1070_v12  ;;  %v1064_v30 = vld [vmem:[%s4403_s3 + $0x208] sm:$0xff]  ;;  %v1063_v32 = vld [vmem:[%s4403_s3 + $0x200] sm:$0xff]  ;;  %v68_v34 = vld [vmem:[%s4400_s0 + $0x118] sm:$0xff] }
  0x76   :  { %1259 = vmatpush1.msra.mxu0 %v1005_v13  ;;  %1516 = vmatpush1.msra.mxu1 %v1069_v14  ;;  %v65_v33 = vld [vmem:[%s4400_s0 + $0x100] sm:$0xff]  ;;  %v1062_v35 = vld [vmem:[%s4403_s3 + $0x1f8] sm:$0xff]  ;;  %v1124_v36 = vld [vmem:[%s4403_s3 + $0x3e8] sm:$0xff] }
  0x77   :  { %500 = vmatmul.mubr.f32.gmra.mxu0 %v59_v15  ;;  %757 = vmatmul.mubr.f32.gmra.mxu1 %v59_v15  ;;  %v1061_v37 = vld [vmem:[%s4403_s3 + $0x1f0] sm:$0xff]  ;;  %v1123_v38 = vld [vmem:[%s4403_s3 + $0x3e0] sm:$0xff]  ;;  %v70_v40 = vld [vmem:[%s4400_s0 + $0x128] sm:$0xff] }
  0x78   :  { %2506 = vmatprep.mubr.msk.f32.mxu0 %vm247_vm1, %v62_v16  ;;  %2540 = vmatprep.mubr.msk.f32.mxu1 %vm247_vm1, %v62_v16  ;;  %v67_v39 = vld [vmem:[%s4400_s0 + $0x110] sm:$0xff]  ;;  %v1060_v41 = vld [vmem:[%s4403_s3 + $0x1e8] sm:$0xff]  ;;  %v1122_v42 = vld [vmem:[%s4403_s3 + $0x3d8] sm:$0xff] }
  0x79   :  { %1260 = vmatprep.subr.mxu0 %v1004_v17  ;;  %1517 = vmatprep.subr.mxu1 %v1068_v18  ;;  %v1059_v43 = vld [vmem:[%s4403_s3 + $0x1e0] sm:$0xff]  ;;  %v1121_v44 = vld [vmem:[%s4403_s3 + $0x3d0] sm:$0xff]  ;;  %v72_v46 = vld [vmem:[%s4400_s0 + $0x138] sm:$0xff] }
  0x7a   :  { %1261 = vmatpush1.msra.mxu0 %v1003_v19  ;;  %1518 = vmatpush1.msra.mxu1 %v1067_v20  ;;  %v69_v45 = vld [vmem:[%s4400_s0 + $0x120] sm:$0xff]  ;;  %v1058_v47 = vld [vmem:[%s4403_s3 + $0x1d8] sm:$0xff]  ;;  %v1120_v48 = vld [vmem:[%s4403_s3 + $0x3c8] sm:$0xff] }
  0x7b   :  { %506 = vmatmul.mubr.f32.gmra.mxu0 %v61_v21  ;;  %763 = vmatmul.mubr.f32.gmra.mxu1 %v61_v21  ;;  %v1057_v49 = vld [vmem:[%s4403_s3 + $0x1d0] sm:$0xff]  ;;  %v1119_v50 = vld [vmem:[%s4403_s3 + $0x3c0] sm:$0xff]  ;;  %v74_v52 = vld [vmem:[%s4400_s0 + $0x148] sm:$0xff] }
  0x7c   :  { %2507 = vmatprep.mubr.msk.f32.mxu0 %vm247_vm1, %v64_v22  ;;  %2541 = vmatprep.mubr.msk.f32.mxu1 %vm247_vm1, %v64_v22  ;;  %v71_v51 = vld [vmem:[%s4400_s0 + $0x130] sm:$0xff]  ;;  %v1056_v53 = vld [vmem:[%s4403_s3 + $0x1c8] sm:$0xff]  ;;  %v1118_v54 = vld [vmem:[%s4403_s3 + $0x3b8] sm:$0xff] }
  0x7d   :  { %1262 = vmatprep.subr.mxu0 %v1002_v23  ;;  %1519 = vmatprep.subr.mxu1 %v1066_v24  ;;  %v1055_v55 = vld [vmem:[%s4403_s3 + $0x1c0] sm:$0xff]  ;;  %v1117_v56 = vld [vmem:[%s4403_s3 + $0x3b0] sm:$0xff]  ;;  %v76_v58 = vld [vmem:[%s4400_s0 + $0x158] sm:$0xff] }
  0x7e   :  { %1263 = vmatpush1.msra.mxu0 %v1001_v25  ;;  %1520 = vmatpush1.msra.mxu1 %v1065_v26  ;;  %v73_v57 = vld [vmem:[%s4400_s0 + $0x140] sm:$0xff]  ;;  %v1054_v59 = vld [vmem:[%s4403_s3 + $0x1b8] sm:$0xff]  ;;  %v1116_v60 = vld [vmem:[%s4403_s3 + $0x3a8] sm:$0xff] }
  0x7f   :  { %512 = vmatmul.mubr.f32.gmra.mxu0 %v63_v27  ;;  %769 = vmatmul.mubr.f32.gmra.mxu1 %v63_v27  ;;  %v1053_v61 = vld [vmem:[%s4403_s3 + $0x1b0] sm:$0xff]  ;;  %v1115_v62 = vld [vmem:[%s4403_s3 + $0x3a0] sm:$0xff]  ;;  %v78_v0 = vld [vmem:[%s4400_s0 + $0x168] sm:$0xff] }
  0x80   :  { %2508 = vmatprep.mubr.msk.f32.mxu0 %vm247_vm1, %v66_v28  ;;  %2542 = vmatprep.mubr.msk.f32.mxu1 %vm247_vm1, %v66_v28  ;;  %v75_v63 = vld [vmem:[%s4400_s0 + $0x150] sm:$0xff]  ;;  %v1052_v1 = vld [vmem:[%s4403_s3 + $0x1a8] sm:$0xff]  ;;  %v1114_v2 = vld [vmem:[%s4403_s3 + $0x398] sm:$0xff] }
  0x81   :  { %1264 = vmatprep.subr.mxu0 %v1000_v29  ;;  %1521 = vmatprep.subr.mxu1 %v1064_v30  ;;  %v1051_v3 = vld [vmem:[%s4403_s3 + $0x1a0] sm:$0xff]  ;;  %v1113_v4 = vld [vmem:[%s4403_s3 + $0x390] sm:$0xff]  ;;  %v80_v6 = vld [vmem:[%s4400_s0 + $0x178] sm:$0xff] }
  0x82   :  { %1265 = vmatpush1.msra.mxu0 %v999_v31  ;;  %1522 = vmatpush1.msra.mxu1 %v1063_v32  ;;  %v77_v5 = vld [vmem:[%s4400_s0 + $0x160] sm:$0xff]  ;;  %v1050_v7 = vld [vmem:[%s4403_s3 + $0x198] sm:$0xff]  ;;  %v1112_v8 = vld [vmem:[%s4403_s3 + $0x388] sm:$0xff] }
  0x83   :  { %518 = vmatmul.mubr.f32.gmra.mxu0 %v65_v33  ;;  %775 = vmatmul.mubr.f32.gmra.mxu1 %v65_v33  ;;  %v1049_v9 = vld [vmem:[%s4403_s3 + $0x190] sm:$0xff]  ;;  %v1111_v10 = vld [vmem:[%s4403_s3 + $0x380] sm:$0xff]  ;;  %v82_v12 = vld [vmem:[%s4400_s0 + $0x188] sm:$0xff] }
  0x84   :  { %2509 = vmatprep.mubr.msk.f32.mxu0 %vm247_vm1, %v68_v34  ;;  %2543 = vmatprep.mubr.msk.f32.mxu1 %vm247_vm1, %v68_v34  ;;  %v79_v11 = vld [vmem:[%s4400_s0 + $0x170] sm:$0xff]  ;;  %v1048_v13 = vld [vmem:[%s4403_s3 + $0x188] sm:$0xff]  ;;  %v1110_v14 = vld [vmem:[%s4403_s3 + $0x378] sm:$0xff] }
  0x85   :  { %1266 = vmatprep.subr.mxu0 %v1062_v35  ;;  %1525 = vmatprep.subr.mxu1 %v1124_v36  ;;  %v1047_v15 = vld [vmem:[%s4403_s3 + $0x180] sm:$0xff]  ;;  %v1109_v16 = vld [vmem:[%s4403_s3 + $0x370] sm:$0xff]  ;;  %v84_v18 = vld [vmem:[%s4400_s0 + $0x198] sm:$0xff] }
  0x86   :  { %1267 = vmatpush2.msra.mxu0 %v1061_v37  ;;  %1526 = vmatpush2.msra.mxu1 %v1123_v38  ;;  %v81_v17 = vld [vmem:[%s4400_s0 + $0x180] sm:$0xff]  ;;  %v1046_v19 = vld [vmem:[%s4403_s3 + $0x178] sm:$0xff]  ;;  %v1108_v20 = vld [vmem:[%s4403_s3 + $0x368] sm:$0xff] }
  0x87   :  { %524 = vmatmul.mubr.f32.gmra.mxu0 %v67_v39  ;;  %781 = vmatmul.mubr.f32.gmra.mxu1 %v67_v39  ;;  %v1045_v21 = vld [vmem:[%s4403_s3 + $0x170] sm:$0xff]  ;;  %v1107_v22 = vld [vmem:[%s4403_s3 + $0x360] sm:$0xff]  ;;  %v86_v24 = vld [vmem:[%s4400_s0 + $0x1a8] sm:$0xff] }
  0x88   :  { %2510 = vmatprep.mubr.msk.f32.mxu0 %vm247_vm1, %v70_v40  ;;  %2544 = vmatprep.mubr.msk.f32.mxu1 %vm247_vm1, %v70_v40  ;;  %v83_v23 = vld [vmem:[%s4400_s0 + $0x190] sm:$0xff]  ;;  %v1044_v25 = vld [vmem:[%s4403_s3 + $0x168] sm:$0xff]  ;;  %v1106_v26 = vld [vmem:[%s4403_s3 + $0x358] sm:$0xff] }
  0x89   :  { %1268 = vmatprep.subr.mxu0 %v1060_v41  ;;  %1527 = vmatprep.subr.mxu1 %v1122_v42  ;;  %v1043_v27 = vld [vmem:[%s4403_s3 + $0x160] sm:$0xff]  ;;  %v1105_v28 = vld [vmem:[%s4403_s3 + $0x350] sm:$0xff]  ;;  %v88_v30 = vld [vmem:[%s4400_s0 + $0x1b8] sm:$0xff] }
  0x8a   :  { %1269 = vmatpush2.msra.mxu0 %v1059_v43  ;;  %1528 = vmatpush2.msra.mxu1 %v1121_v44  ;;  %v85_v29 = vld [vmem:[%s4400_s0 + $0x1a0] sm:$0xff]  ;;  %v1042_v31 = vld [vmem:[%s4403_s3 + $0x158] sm:$0xff]  ;;  %v1104_v32 = vld [vmem:[%s4403_s3 + $0x348] sm:$0xff] }
  0x8b   :  { %530 = vmatmul.mubr.f32.gmra.mxu0 %v69_v45  ;;  %787 = vmatmul.mubr.f32.gmra.mxu1 %v69_v45  ;;  %v1041_v33 = vld [vmem:[%s4403_s3 + $0x150] sm:$0xff]  ;;  %v1103_v34 = vld [vmem:[%s4403_s3 + $0x340] sm:$0xff]  ;;  %v90_v36 = vld [vmem:[%s4400_s0 + $0x1c8] sm:$0xff] }
  0x8c   :  { %2511 = vmatprep.mubr.msk.f32.mxu0 %vm247_vm1, %v72_v46  ;;  %2545 = vmatprep.mubr.msk.f32.mxu1 %vm247_vm1, %v72_v46  ;;  %v87_v35 = vld [vmem:[%s4400_s0 + $0x1b0] sm:$0xff]  ;;  %v1040_v37 = vld [vmem:[%s4403_s3 + $0x148] sm:$0xff]  ;;  %v1102_v38 = vld [vmem:[%s4403_s3 + $0x338] sm:$0xff] }
  0x8d   :  { %1270 = vmatprep.subr.mxu0 %v1058_v47  ;;  %1529 = vmatprep.subr.mxu1 %v1120_v48  ;;  %v1039_v39 = vld [vmem:[%s4403_s3 + $0x140] sm:$0xff]  ;;  %v1101_v40 = vld [vmem:[%s4403_s3 + $0x330] sm:$0xff]  ;;  %v92_v42 = vld [vmem:[%s4400_s0 + $0x1d8] sm:$0xff] }
  0x8e   :  { %1271 = vmatpush2.msra.mxu0 %v1057_v49  ;;  %1530 = vmatpush2.msra.mxu1 %v1119_v50  ;;  %v89_v41 = vld [vmem:[%s4400_s0 + $0x1c0] sm:$0xff]  ;;  %v1038_v43 = vld [vmem:[%s4403_s3 + $0x138] sm:$0xff]  ;;  %v1100_v44 = vld [vmem:[%s4403_s3 + $0x328] sm:$0xff] }
  0x8f   :  { %536 = vmatmul.mubr.f32.gmra.mxu0 %v71_v51  ;;  %793 = vmatmul.mubr.f32.gmra.mxu1 %v71_v51  ;;  %v1037_v45 = vld [vmem:[%s4403_s3 + $0x130] sm:$0xff]  ;;  %v1099_v46 = vld [vmem:[%s4403_s3 + $0x320] sm:$0xff]  ;;  %v94_v48 = vld [vmem:[%s4400_s0 + $0x1e8] sm:$0xff] }
  0x90   :  { %2512 = vmatprep.mubr.msk.f32.mxu0 %vm247_vm1, %v74_v52  ;;  %2546 = vmatprep.mubr.msk.f32.mxu1 %vm247_vm1, %v74_v52  ;;  %v91_v47 = vld [vmem:[%s4400_s0 + $0x1d0] sm:$0xff]  ;;  %v1036_v49 = vld [vmem:[%s4403_s3 + $0x128] sm:$0xff]  ;;  %v1098_v50 = vld [vmem:[%s4403_s3 + $0x318] sm:$0xff] }
  0x91   :  { %1272 = vmatprep.subr.mxu0 %v1056_v53  ;;  %1531 = vmatprep.subr.mxu1 %v1118_v54  ;;  %v1035_v51 = vld [vmem:[%s4403_s3 + $0x120] sm:$0xff]  ;;  %v1097_v52 = vld [vmem:[%s4403_s3 + $0x310] sm:$0xff]  ;;  %v96_v54 = vld [vmem:[%s4400_s0 + $0x1f8] sm:$0xff] }
  0x92   :  { %1273 = vmatpush2.msra.mxu0 %v1055_v55  ;;  %1532 = vmatpush2.msra.mxu1 %v1117_v56  ;;  %v93_v53 = vld [vmem:[%s4400_s0 + $0x1e0] sm:$0xff]  ;;  %v1034_v55 = vld [vmem:[%s4403_s3 + $0x118] sm:$0xff]  ;;  %v1096_v56 = vld [vmem:[%s4403_s3 + $0x308] sm:$0xff] }
  0x93   :  { %542 = vmatmul.mubr.f32.gmra.mxu0 %v73_v57  ;;  %799 = vmatmul.mubr.f32.gmra.mxu1 %v73_v57  ;;  %v1033_v57 = vld [vmem:[%s4403_s3 + $0x110] sm:$0xff] }
  0x94   :  { %2513 = vmatprep.mubr.msk.f32.mxu0 %vm247_vm1, %v76_v58  ;;  %2547 = vmatprep.mubr.msk.f32.mxu1 %vm247_vm1, %v76_v58  ;;  %v1095_v58 = vld [vmem:[%s4403_s3 + $0x300] sm:$0xff] }
  0x95   :  { %1274 = vmatprep.subr.mxu0 %v1054_v59  ;;  %1533 = vmatprep.subr.mxu1 %v1116_v60  ;;  %v95_v59 = vld [vmem:[%s4400_s0 + $0x1f0] sm:$0xff]  ;;  %v1032_v60 = vld [vmem:[%s4403_s3 + $0x108] sm:$0xff] }
  0x96   :  { %1275 = vmatpush2.msra.mxu0 %v1053_v61  ;;  %1534 = vmatpush2.msra.mxu1 %v1115_v62  ;;  %v1031_v61 = vld [vmem:[%s4403_s3 + $0x100] sm:$0xff]  ;;  %v2815_v62 = vmov 0.0  }
  0x97   :  { %548 = vmatmul.mubr.f32.gmra.mxu0 %v75_v63  ;;  %805 = vmatmul.mubr.f32.gmra.mxu1 %v75_v63  ;;  %v227_v63 = vlaneseq }
  0x98   :  { %2514 = vmatprep.mubr.msk.f32.mxu0 %vm247_vm1, %v78_v0  ;;  %2548 = vmatprep.mubr.msk.f32.mxu1 %vm247_vm1, %v78_v0 }
  0x99   :  { %1276 = vmatprep.subr.mxu0 %v1052_v1  ;;  %1535 = vmatprep.subr.mxu1 %v1114_v2  ;;  %v3893_v0 = vshrl.u32 %v227_v63, 7 }
  0x9a   :  { %1277 = vmatpush2.msra.mxu0 %v1051_v3  ;;  %1536 = vmatpush2.msra.mxu1 %v1113_v4  ;;  %v225_v3 = vld [vmem:[%s4402_s2] sm:$0xf] }
  0x9b   :  { %554 = vmatmul.mubr.f32.gmra.mxu0 %v77_v5  ;;  %811 = vmatmul.mubr.f32.gmra.mxu1 %v77_v5  ;;  %v237_v1 = vsub.s32 2, %v3893_v0  ;;  %v229_v2 = vsub.s32 0, %v3893_v0  ;;  %v233_v4 = vsub.s32 1, %v3893_v0  ;;  %v241_v5 = vsub.s32 3, %v3893_v0  ;;  %v4181_v0 = vld [vmem:[%s4407_s7 + $0x78] sm:$0xff] }
  0x9c   :  { %2515 = vmatprep.mubr.msk.f32.mxu0 %vm247_vm1, %v80_v6  ;;  %2549 = vmatprep.mubr.msk.f32.mxu1 %vm247_vm1, %v80_v6 }
  0x9d   :  { %1278 = vmatprep.subr.mxu0 %v1050_v7  ;;  %1537 = vmatprep.subr.mxu1 %v1112_v8  ;;  %v3902_v6 = vrot.slane %v225_v3, %v237_v1  ;;  %v3906_v7 = vrot.slane %v225_v3, %v229_v2  ;;  %v3910_v8 = vrot.slane %v225_v3, %v233_v4 }
  0x9e   :  { %1279 = vmatpush2.msra.mxu0 %v1049_v9  ;;  %1538 = vmatpush2.msra.mxu1 %v1111_v10  ;;  %v3912_v9 = vrot.slane %v225_v3, %v241_v5 }
  0x9f   :  { %560 = vmatmul.mubr.f32.gmra.mxu0 %v79_v11  ;;  %817 = vmatmul.mubr.f32.gmra.mxu1 %v79_v11 }
  0xa0   :  { %2516 = vmatprep.mubr.msk.f32.mxu0 %vm247_vm1, %v82_v12  ;;  %2550 = vmatprep.mubr.msk.f32.mxu1 %vm247_vm1, %v82_v12 }
  0xa1   :  { %1280 = vmatprep.subr.mxu0 %v1048_v13  ;;  %1539 = vmatprep.subr.mxu1 %v1110_v14 }
  0xa2   :  { %1281 = vmatpush2.msra.mxu0 %v1047_v15  ;;  %1540 = vmatpush2.msra.mxu1 %v1109_v16 }
  0xa3   :  { %566 = vmatmul.mubr.f32.gmra.mxu0 %v81_v17  ;;  %823 = vmatmul.mubr.f32.gmra.mxu1 %v81_v17 }
  0xa4   :  { %2517 = vmatprep.mubr.msk.f32.mxu0 %vm247_vm1, %v84_v18  ;;  %2551 = vmatprep.mubr.msk.f32.mxu1 %vm247_vm1, %v84_v18 }
  0xa5   :  { %1282 = vmatprep.subr.mxu0 %v1046_v19  ;;  %1541 = vmatprep.subr.mxu1 %v1108_v20 }
  0xa6   :  { %1283 = vmatpush2.msra.mxu0 %v1045_v21  ;;  %1542 = vmatpush2.msra.mxu1 %v1107_v22 }
  0xa7   :  { %572 = vmatmul.mubr.f32.gmra.mxu0 %v83_v23  ;;  %829 = vmatmul.mubr.f32.gmra.mxu1 %v83_v23 }
  0xa8   :  { %2518 = vmatprep.mubr.msk.f32.mxu0 %vm247_vm1, %v86_v24  ;;  %2552 = vmatprep.mubr.msk.f32.mxu1 %vm247_vm1, %v86_v24 }
  0xa9   :  { %1284 = vmatprep.subr.mxu0 %v1044_v25  ;;  %1543 = vmatprep.subr.mxu1 %v1106_v26 }
  0xaa   :  { %1285 = vmatpush2.msra.mxu0 %v1043_v27  ;;  %1544 = vmatpush2.msra.mxu1 %v1105_v28  ;;  %v1827_v28 = vld [vmem:[%s4405_s5 + $0x78] sm:$0xff] }
  0xab   :  { %578 = vmatmul.mubr.f32.gmra.mxu0 %v85_v29  ;;  %835 = vmatmul.mubr.f32.gmra.mxu1 %v85_v29 }
  0xac   :  { %2519 = vmatprep.mubr.msk.f32.mxu0 %vm247_vm1, %v88_v30  ;;  %2553 = vmatprep.mubr.msk.f32.mxu1 %vm247_vm1, %v88_v30 }
  0xad   :  { %1286 = vmatprep.subr.mxu0 %v1042_v31  ;;  %1545 = vmatprep.subr.mxu1 %v1104_v32 }
  0xae   :  { %1287 = vmatpush2.msra.mxu0 %v1041_v33  ;;  %1546 = vmatpush2.msra.mxu1 %v1103_v34 }
  0xaf   :  { %584 = vmatmul.mubr.f32.gmra.mxu0 %v87_v35  ;;  %841 = vmatmul.mubr.f32.gmra.mxu1 %v87_v35 }
  0xb0   :  { %2520 = vmatprep.mubr.msk.f32.mxu0 %vm247_vm1, %v90_v36  ;;  %2554 = vmatprep.mubr.msk.f32.mxu1 %vm247_vm1, %v90_v36 }
  0xb1   :  { %1288 = vmatprep.subr.mxu0 %v1040_v37  ;;  %1547 = vmatprep.subr.mxu1 %v1102_v38 }
  0xb2   :  { %1289 = vmatpush2.msra.mxu0 %v1039_v39  ;;  %1548 = vmatpush2.msra.mxu1 %v1101_v40 }
  0xb3   :  { %590 = vmatmul.mubr.f32.gmra.mxu0 %v89_v41  ;;  %847 = vmatmul.mubr.f32.gmra.mxu1 %v89_v41  ;;  %v1826_v41 = vld [vmem:[%s4405_s5 + $0x70] sm:$0xff] }
  0xb4   :  { %2521 = vmatprep.mubr.msk.f32.mxu0 %vm247_vm1, %v92_v42  ;;  %2555 = vmatprep.mubr.msk.f32.mxu1 %vm247_vm1, %v92_v42 }
  0xb5   :  { %1290 = vmatprep.subr.mxu0 %v1038_v43  ;;  %1549 = vmatprep.subr.mxu1 %v1100_v44 }
  0xb6   :  { %1291 = vmatpush2.msra.mxu0 %v1037_v45  ;;  %1550 = vmatpush2.msra.mxu1 %v1099_v46 }
  0xb7   :  { %596 = vmatmul.mubr.f32.gmra.mxu0 %v91_v47  ;;  %853 = vmatmul.mubr.f32.gmra.mxu1 %v91_v47 }
  0xb8   :  { %2522 = vmatprep.mubr.msk.f32.mxu0 %vm247_vm1, %v94_v48  ;;  %2556 = vmatprep.mubr.msk.f32.mxu1 %vm247_vm1, %v94_v48 }
  0xb9   :  { %1292 = vmatprep.subr.mxu0 %v1036_v49  ;;  %1551 = vmatprep.subr.mxu1 %v1098_v50 }
  0xba   :  { %1293 = vmatpush2.msra.mxu0 %v1035_v51  ;;  %1552 = vmatpush2.msra.mxu1 %v1097_v52 }
  0xbb   :  { %602 = vmatmul.mubr.f32.gmra.mxu0 %v93_v53  ;;  %859 = vmatmul.mubr.f32.gmra.mxu1 %v93_v53 }
  0xbc   :  { %2523 = vmatprep.mubr.msk.f32.mxu0 %vm247_vm1, %v96_v54  ;;  %2557 = vmatprep.mubr.msk.f32.mxu1 %vm247_vm1, %v96_v54  ;;  %v1825_v54 = vld [vmem:[%s4405_s5 + $0x68] sm:$0xff] }
  0xbd   :  { %1294 = vmatprep.subr.mxu0 %v1034_v55  ;;  %1553 = vmatprep.subr.mxu1 %v1096_v56 }
  0xbe   :  { %1295 = vmatpush2.msra.mxu0 %v1033_v57  ;;  %1554 = vmatpush2.msra.mxu1 %v1095_v58 }
  0xbf   :  { %608 = vmatmul.mubr.f32.gmra.mxu0 %v95_v59  ;;  %865 = vmatmul.mubr.f32.gmra.mxu1 %v95_v59 }
  0xc0   :  { %1296 = vmatprep.subr.mxu0 %v1032_v60  ;;  %2753 = vmatprep.subr.mxu1 %v2815_v62 }
  0xc1   :  { %1297 = vmatpush2.msra.mxu0 %v1031_v61 }
  0xc2   :  { %1937 = vmatprep.subr.mxu0 %v2815_v62 }
 0x103   :  { %v423_v10 = vpop.f32.mrf.mxu0  ;;  %v680_v11 = vpop.f32.mrf.mxu1 }
 0x104   :  { %v681_v12 = vadd.f32 %v680_v11, %v3902_v6  ;;  %v424_v13 = vadd.f32 %v423_v10, %v3906_v7  ;;  %v1824_v11 = vld [vmem:[%s4405_s5 + $0x60] sm:$0xff] }
 0x105   :  { %v425_v14 = vpop.f32.mrf.mxu0  ;;  %v682_v15 = vpop.f32.mrf.mxu1 }
 0x106   :  { %v426_v16 = vadd.f32 %v425_v14, %v3910_v8  ;;  %v683_v17 = vadd.f32 %v682_v15, %v3912_v9  ;;  %v873_v18 = vmax.f32 %v681_v12, 0.0  ;;  %v871_v24 = vmax.f32 %v424_v13, 0.0 }
 0x107   :  { %v429_v19 = vpop.f32.mrf.mxu0  ;;  %v686_v20 = vpop.f32.mrf.mxu1 }
 0x108   :  { %v872_v21 = vmax.f32 %v426_v16, 0.0  ;;  %v874_v22 = vmax.f32 %v683_v17, 0.0  ;;  %v687_v23 = vadd.f32 %v686_v20, %v3902_v6  ;;  %v430_v25 = vadd.f32 %v429_v19, %v3906_v7 }
 0x109   :  { %v431_v26 = vpop.f32.mrf.mxu0  ;;  %v688_v27 = vpop.f32.mrf.mxu1 }
 0x10a   :  { %v432_v29 = vadd.f32 %v431_v26, %v3910_v8  ;;  %v689_v30 = vadd.f32 %v688_v27, %v3912_v9  ;;  %1298 = vmatprep.mubr.f32.mxu0 %v872_v21  ;;  %2558 = vmatprep.mubr.msk.f32.mxu1 %vm1137_vm2, %v874_v22  ;;  %v877_v31 = vmax.f32 %v687_v23, 0.0  ;;  %v875_v37 = vmax.f32 %v430_v25, 0.0 }
 0x10b   :  { %v435_v32 = vpop.f32.mrf.mxu0  ;;  %v692_v33 = vpop.f32.mrf.mxu1  ;;  %1299 = vmatmul.mubr.f32.vlgmr.msra.gmra.mxu0 %v871_v24  ;;  %1556 = vmatmul.mubr.f32.vlgmr.msra.gmra.mxu1 %v873_v18  ;;  %v1823_v24 = vld [vmem:[%s4405_s5 + $0x58] sm:$0xff] }
 0x10c   :  { %v876_v34 = vmax.f32 %v432_v29, 0.0  ;;  %v878_v35 = vmax.f32 %v689_v30, 0.0  ;;  %v693_v36 = vadd.f32 %v692_v33, %v3902_v6  ;;  %1938 = vmatpush1.msra.mxu0 %v1827_v28  ;;  %2771 = vmatpush1.msra.mxu1 %v1827_v28  ;;  %v436_v38 = vadd.f32 %v435_v32, %v3906_v7 }
 0x10d   :  { %v437_v39 = vpop.f32.mrf.mxu0  ;;  %v694_v40 = vpop.f32.mrf.mxu1  ;;  %1939 = vmatprep.subr.mxu0 %v2815_v62  ;;  %2754 = vmatprep.subr.mxu1 %v2815_v62 }
 0x10e   :  { %v438_v42 = vadd.f32 %v437_v39, %v3910_v8  ;;  %v695_v43 = vadd.f32 %v694_v40, %v3912_v9  ;;  %1304 = vmatprep.mubr.f32.mxu0 %v876_v34  ;;  %2559 = vmatprep.mubr.msk.f32.mxu1 %vm1137_vm2, %v878_v35  ;;  %v881_v44 = vmax.f32 %v693_v36, 0.0  ;;  %v879_v50 = vmax.f32 %v436_v38, 0.0 }
 0x10f   :  { %v441_v45 = vpop.f32.mrf.mxu0  ;;  %v698_v46 = vpop.f32.mrf.mxu1  ;;  %1305 = vmatmul.mubr.f32.gmra.mxu0 %v875_v37  ;;  %1562 = vmatmul.mubr.f32.gmra.mxu1 %v877_v31  ;;  %v1822_v37 = vld [vmem:[%s4405_s5 + $0x50] sm:$0xff] }
 0x110   :  { %v880_v47 = vmax.f32 %v438_v42, 0.0  ;;  %v882_v48 = vmax.f32 %v695_v43, 0.0  ;;  %v699_v49 = vadd.f32 %v698_v46, %v3902_v6  ;;  %1940 = vmatpush1.msra.mxu0 %v1826_v41  ;;  %2772 = vmatpush1.msra.mxu1 %v1826_v41  ;;  %v442_v51 = vadd.f32 %v441_v45, %v3906_v7 }
 0x111   :  { %v443_v52 = vpop.f32.mrf.mxu0  ;;  %v700_v53 = vpop.f32.mrf.mxu1  ;;  %1941 = vmatprep.subr.mxu0 %v2815_v62  ;;  %2755 = vmatprep.subr.mxu1 %v2815_v62 }
 0x112   :  { %v444_v55 = vadd.f32 %v443_v52, %v3910_v8  ;;  %v701_v56 = vadd.f32 %v700_v53, %v3912_v9  ;;  %1310 = vmatprep.mubr.f32.mxu0 %v880_v47  ;;  %2560 = vmatprep.mubr.msk.f32.mxu1 %vm1137_vm2, %v882_v48  ;;  %v885_v57 = vmax.f32 %v699_v49, 0.0  ;;  %v883_v1 = vmax.f32 %v442_v51, 0.0 }
 0x113   :  { %v447_v58 = vpop.f32.mrf.mxu0  ;;  %v704_v59 = vpop.f32.mrf.mxu1  ;;  %1311 = vmatmul.mubr.f32.gmra.mxu0 %v879_v50  ;;  %1568 = vmatmul.mubr.f32.gmra.mxu1 %v881_v44  ;;  %v1821_v50 = vld [vmem:[%s4405_s5 + $0x48] sm:$0xff] }
 0x114   :  { %v884_v60 = vmax.f32 %v444_v55, 0.0  ;;  %v886_v61 = vmax.f32 %v701_v56, 0.0  ;;  %v705_v63 = vadd.f32 %v704_v59, %v3902_v6  ;;  %1942 = vmatpush1.msra.mxu0 %v1825_v54  ;;  %2773 = vmatpush1.msra.mxu1 %v1825_v54  ;;  %v448_v3 = vadd.f32 %v447_v58, %v3906_v7 }
 0x115   :  { %v449_v5 = vpop.f32.mrf.mxu0  ;;  %v706_v10 = vpop.f32.mrf.mxu1  ;;  %1943 = vmatprep.subr.mxu0 %v2815_v62  ;;  %2756 = vmatprep.subr.mxu1 %v2815_v62 }
 0x116   :  { %v450_v12 = vadd.f32 %v449_v5, %v3910_v8  ;;  %v707_v13 = vadd.f32 %v706_v10, %v3912_v9  ;;  %1316 = vmatprep.mubr.f32.mxu0 %v884_v60  ;;  %2561 = vmatprep.mubr.msk.f32.mxu1 %vm1137_vm2, %v886_v61  ;;  %v889_v14 = vmax.f32 %v705_v63, 0.0  ;;  %v887_v20 = vmax.f32 %v448_v3, 0.0 }
 0x117   :  { %v453_v15 = vpop.f32.mrf.mxu0  ;;  %v710_v16 = vpop.f32.mrf.mxu1  ;;  %1317 = vmatmul.mubr.f32.gmra.mxu0 %v883_v1  ;;  %1574 = vmatmul.mubr.f32.gmra.mxu1 %v885_v57  ;;  %v1820_v1 = vld [vmem:[%s4405_s5 + $0x40] sm:$0xff] }
 0x118   :  { %v888_v17 = vmax.f32 %v450_v12, 0.0  ;;  %v890_v18 = vmax.f32 %v707_v13, 0.0  ;;  %v711_v19 = vadd.f32 %v710_v16, %v3902_v6  ;;  %1944 = vmatpush1.msra.mxu0 %v1824_v11  ;;  %2774 = vmatpush1.msra.mxu1 %v1824_v11  ;;  %v454_v21 = vadd.f32 %v453_v15, %v3906_v7 }
 0x119   :  { %v455_v22 = vpop.f32.mrf.mxu0  ;;  %v712_v23 = vpop.f32.mrf.mxu1  ;;  %1945 = vmatprep.subr.mxu0 %v2815_v62  ;;  %2757 = vmatprep.subr.mxu1 %v2815_v62 }
 0x11a   :  { %v456_v25 = vadd.f32 %v455_v22, %v3910_v8  ;;  %v713_v26 = vadd.f32 %v712_v23, %v3912_v9  ;;  %1322 = vmatprep.mubr.f32.mxu0 %v888_v17  ;;  %2562 = vmatprep.mubr.msk.f32.mxu1 %vm1137_vm2, %v890_v18  ;;  %v893_v27 = vmax.f32 %v711_v19, 0.0  ;;  %v891_v33 = vmax.f32 %v454_v21, 0.0 }
 0x11b   :  { %v459_v28 = vpop.f32.mrf.mxu0  ;;  %v716_v29 = vpop.f32.mrf.mxu1  ;;  %1323 = vmatmul.mubr.f32.gmra.mxu0 %v887_v20  ;;  %1580 = vmatmul.mubr.f32.gmra.mxu1 %v889_v14  ;;  %v1819_v20 = vld [vmem:[%s4405_s5 + $0x38] sm:$0xff] }
 0x11c   :  { %v892_v30 = vmax.f32 %v456_v25, 0.0  ;;  %v894_v31 = vmax.f32 %v713_v26, 0.0  ;;  %v717_v32 = vadd.f32 %v716_v29, %v3902_v6  ;;  %1946 = vmatpush1.msra.mxu0 %v1823_v24  ;;  %2775 = vmatpush1.msra.mxu1 %v1823_v24  ;;  %v460_v34 = vadd.f32 %v459_v28, %v3906_v7 }
 0x11d   :  { %v461_v35 = vpop.f32.mrf.mxu0  ;;  %v718_v36 = vpop.f32.mrf.mxu1  ;;  %1947 = vmatprep.subr.mxu0 %v2815_v62  ;;  %2758 = vmatprep.subr.mxu1 %v2815_v62 }
 0x11e   :  { %v462_v38 = vadd.f32 %v461_v35, %v3910_v8  ;;  %v719_v39 = vadd.f32 %v718_v36, %v3912_v9  ;;  %1328 = vmatprep.mubr.f32.mxu0 %v892_v30  ;;  %2563 = vmatprep.mubr.msk.f32.mxu1 %vm1137_vm2, %v894_v31  ;;  %v897_v40 = vmax.f32 %v717_v32, 0.0  ;;  %v895_v46 = vmax.f32 %v460_v34, 0.0 }
 0x11f   :  { %v465_v41 = vpop.f32.mrf.mxu0  ;;  %v722_v42 = vpop.f32.mrf.mxu1  ;;  %1329 = vmatmul.mubr.f32.gmra.mxu0 %v891_v33  ;;  %1586 = vmatmul.mubr.f32.gmra.mxu1 %v893_v27  ;;  %v1818_v33 = vld [vmem:[%s4405_s5 + $0x30] sm:$0xff] }
 0x120   :  { %v896_v43 = vmax.f32 %v462_v38, 0.0  ;;  %v898_v44 = vmax.f32 %v719_v39, 0.0  ;;  %v723_v45 = vadd.f32 %v722_v42, %v3902_v6  ;;  %1948 = vmatpush1.msra.mxu0 %v1822_v37  ;;  %2776 = vmatpush1.msra.mxu1 %v1822_v37  ;;  %v466_v47 = vadd.f32 %v465_v41, %v3906_v7 }
 0x121   :  { %v467_v48 = vpop.f32.mrf.mxu0  ;;  %v724_v49 = vpop.f32.mrf.mxu1  ;;  %1949 = vmatprep.subr.mxu0 %v2815_v62  ;;  %2759 = vmatprep.subr.mxu1 %v2815_v62 }
 0x122   :  { %v468_v51 = vadd.f32 %v467_v48, %v3910_v8  ;;  %v725_v52 = vadd.f32 %v724_v49, %v3912_v9  ;;  %1334 = vmatprep.mubr.f32.mxu0 %v896_v43  ;;  %2564 = vmatprep.mubr.msk.f32.mxu1 %vm1137_vm2, %v898_v44  ;;  %v901_v53 = vmax.f32 %v723_v45, 0.0  ;;  %v899_v59 = vmax.f32 %v466_v47, 0.0 }
 0x123   :  { %v471_v54 = vpop.f32.mrf.mxu0  ;;  %v728_v55 = vpop.f32.mrf.mxu1  ;;  %1335 = vmatmul.mubr.f32.gmra.mxu0 %v895_v46  ;;  %1592 = vmatmul.mubr.f32.gmra.mxu1 %v897_v40  ;;  %v1817_v46 = vld [vmem:[%s4405_s5 + $0x28] sm:$0xff] }
 0x124   :  { %v900_v56 = vmax.f32 %v468_v51, 0.0  ;;  %v902_v57 = vmax.f32 %v725_v52, 0.0  ;;  %v729_v58 = vadd.f32 %v728_v55, %v3902_v6  ;;  %1950 = vmatpush1.msra.mxu0 %v1821_v50  ;;  %2777 = vmatpush1.msra.mxu1 %v1821_v50  ;;  %v472_v60 = vadd.f32 %v471_v54, %v3906_v7 }
 0x125   :  { %v473_v61 = vpop.f32.mrf.mxu0  ;;  %v730_v63 = vpop.f32.mrf.mxu1  ;;  %1951 = vmatprep.subr.mxu0 %v2815_v62  ;;  %2760 = vmatprep.subr.mxu1 %v2815_v62 }
 0x126   :  { %v474_v3 = vadd.f32 %v473_v61, %v3910_v8  ;;  %v731_v5 = vadd.f32 %v730_v63, %v3912_v9  ;;  %1340 = vmatprep.mubr.f32.mxu0 %v900_v56  ;;  %2565 = vmatprep.mubr.msk.f32.mxu1 %vm1137_vm2, %v902_v57  ;;  %v905_v10 = vmax.f32 %v729_v58, 0.0  ;;  %v903_v16 = vmax.f32 %v472_v60, 0.0 }
 0x127   :  { %v477_v11 = vpop.f32.mrf.mxu0  ;;  %v734_v12 = vpop.f32.mrf.mxu1  ;;  %1341 = vmatmul.mubr.f32.gmra.mxu0 %v899_v59  ;;  %1598 = vmatmul.mubr.f32.gmra.mxu1 %v901_v53  ;;  %v1816_v59 = vld [vmem:[%s4405_s5 + $0x20] sm:$0xff] }
 0x128   :  { %v904_v13 = vmax.f32 %v474_v3, 0.0  ;;  %v906_v14 = vmax.f32 %v731_v5, 0.0  ;;  %v735_v15 = vadd.f32 %v734_v12, %v3902_v6  ;;  %1952 = vmatpush1.msra.mxu0 %v1820_v1  ;;  %2778 = vmatpush1.msra.mxu1 %v1820_v1  ;;  %v478_v17 = vadd.f32 %v477_v11, %v3906_v7 }
 0x129   :  { %v479_v18 = vpop.f32.mrf.mxu0  ;;  %v736_v19 = vpop.f32.mrf.mxu1  ;;  %1953 = vmatprep.subr.mxu0 %v2815_v62  ;;  %2761 = vmatprep.subr.mxu1 %v2815_v62 }
 0x12a   :  { %v480_v21 = vadd.f32 %v479_v18, %v3910_v8  ;;  %v737_v22 = vadd.f32 %v736_v19, %v3912_v9  ;;  %1346 = vmatprep.mubr.f32.mxu0 %v904_v13  ;;  %2566 = vmatprep.mubr.msk.f32.mxu1 %vm1137_vm2, %v906_v14  ;;  %v909_v23 = vmax.f32 %v735_v15, 0.0  ;;  %v907_v29 = vmax.f32 %v478_v17, 0.0 }
 0x12b   :  { %v483_v24 = vpop.f32.mrf.mxu0  ;;  %v740_v25 = vpop.f32.mrf.mxu1  ;;  %1347 = vmatmul.mubr.f32.gmra.mxu0 %v903_v16  ;;  %1604 = vmatmul.mubr.f32.gmra.mxu1 %v905_v10  ;;  %v1815_v16 = vld [vmem:[%s4405_s5 + $0x18] sm:$0xff] }
 0x12c   :  { %v908_v26 = vmax.f32 %v480_v21, 0.0  ;;  %v910_v27 = vmax.f32 %v737_v22, 0.0  ;;  %v741_v28 = vadd.f32 %v740_v25, %v3902_v6  ;;  %1954 = vmatpush1.msra.mxu0 %v1819_v20  ;;  %2779 = vmatpush1.msra.mxu1 %v1819_v20  ;;  %v484_v30 = vadd.f32 %v483_v24, %v3906_v7 }
 0x12d   :  { %v485_v31 = vpop.f32.mrf.mxu0  ;;  %v742_v32 = vpop.f32.mrf.mxu1  ;;  %1955 = vmatprep.subr.mxu0 %v2815_v62  ;;  %2762 = vmatprep.subr.mxu1 %v2815_v62 }
 0x12e   :  { %v486_v34 = vadd.f32 %v485_v31, %v3910_v8  ;;  %v743_v35 = vadd.f32 %v742_v32, %v3912_v9  ;;  %1352 = vmatprep.mubr.f32.mxu0 %v908_v26  ;;  %2567 = vmatprep.mubr.msk.f32.mxu1 %vm1137_vm2, %v910_v27  ;;  %v913_v36 = vmax.f32 %v741_v28, 0.0  ;;  %v911_v42 = vmax.f32 %v484_v30, 0.0 }
 0x12f   :  { %v489_v37 = vpop.f32.mrf.mxu0  ;;  %v746_v38 = vpop.f32.mrf.mxu1  ;;  %1353 = vmatmul.mubr.f32.gmra.mxu0 %v907_v29  ;;  %1610 = vmatmul.mubr.f32.gmra.mxu1 %v909_v23  ;;  %v1814_v29 = vld [vmem:[%s4405_s5 + $0x10] sm:$0xff] }
 0x130   :  { %v912_v39 = vmax.f32 %v486_v34, 0.0  ;;  %v914_v40 = vmax.f32 %v743_v35, 0.0  ;;  %v747_v41 = vadd.f32 %v746_v38, %v3902_v6  ;;  %1956 = vmatpush1.msra.mxu0 %v1818_v33  ;;  %2780 = vmatpush1.msra.mxu1 %v1818_v33  ;;  %v490_v43 = vadd.f32 %v489_v37, %v3906_v7 }
 0x131   :  { %v491_v44 = vpop.f32.mrf.mxu0  ;;  %v748_v45 = vpop.f32.mrf.mxu1  ;;  %1957 = vmatprep.subr.mxu0 %v2815_v62  ;;  %2763 = vmatprep.subr.mxu1 %v2815_v62 }
 0x132   :  { %v492_v47 = vadd.f32 %v491_v44, %v3910_v8  ;;  %v749_v48 = vadd.f32 %v748_v45, %v3912_v9  ;;  %1358 = vmatprep.mubr.f32.mxu0 %v912_v39  ;;  %2568 = vmatprep.mubr.msk.f32.mxu1 %vm1137_vm2, %v914_v40  ;;  %v917_v49 = vmax.f32 %v747_v41, 0.0  ;;  %v915_v55 = vmax.f32 %v490_v43, 0.0 }
 0x133   :  { %v495_v50 = vpop.f32.mrf.mxu0  ;;  %v752_v51 = vpop.f32.mrf.mxu1  ;;  %1359 = vmatmul.mubr.f32.gmra.mxu0 %v911_v42  ;;  %1616 = vmatmul.mubr.f32.gmra.mxu1 %v913_v36  ;;  %v1813_v42 = vld [vmem:[%s4405_s5 + $0x8] sm:$0xff] }
 0x134   :  { %v916_v52 = vmax.f32 %v492_v47, 0.0  ;;  %v918_v53 = vmax.f32 %v749_v48, 0.0  ;;  %v753_v54 = vadd.f32 %v752_v51, %v3902_v6  ;;  %1958 = vmatpush1.msra.mxu0 %v1817_v46  ;;  %2781 = vmatpush1.msra.mxu1 %v1817_v46  ;;  %v496_v56 = vadd.f32 %v495_v50, %v3906_v7 }
 0x135   :  { %v497_v57 = vpop.f32.mrf.mxu0  ;;  %v754_v58 = vpop.f32.mrf.mxu1  ;;  %1959 = vmatprep.subr.mxu0 %v2815_v62  ;;  %2764 = vmatprep.subr.mxu1 %v2815_v62 }
 0x136   :  { %v498_v60 = vadd.f32 %v497_v57, %v3910_v8  ;;  %v755_v61 = vadd.f32 %v754_v58, %v3912_v9  ;;  %1364 = vmatprep.mubr.f32.mxu0 %v916_v52  ;;  %2569 = vmatprep.mubr.msk.f32.mxu1 %vm1137_vm2, %v918_v53  ;;  %v921_v63 = vmax.f32 %v753_v54, 0.0  ;;  %v919_v12 = vmax.f32 %v496_v56, 0.0 }
 0x137   :  { %v501_v1 = vpop.f32.mrf.mxu0  ;;  %v758_v3 = vpop.f32.mrf.mxu1  ;;  %1365 = vmatmul.mubr.f32.gmra.mxu0 %v915_v55  ;;  %1622 = vmatmul.mubr.f32.gmra.mxu1 %v917_v49 }
 0x138   :  { %v920_v5 = vmax.f32 %v498_v60, 0.0  ;;  %v922_v10 = vmax.f32 %v755_v61, 0.0  ;;  %v759_v11 = vadd.f32 %v758_v3, %v3902_v6  ;;  %1960 = vmatpush1.msra.mxu0 %v1816_v59  ;;  %2782 = vmatpush1.msra.mxu1 %v1816_v59  ;;  %v502_v13 = vadd.f32 %v501_v1, %v3906_v7 }
 0x139   :  { %v503_v14 = vpop.f32.mrf.mxu0  ;;  %v760_v15 = vpop.f32.mrf.mxu1  ;;  %1961 = vmatprep.subr.mxu0 %v2815_v62  ;;  %2765 = vmatprep.subr.mxu1 %v2815_v62 }
 0x13a   :  { %v504_v17 = vadd.f32 %v503_v14, %v3910_v8  ;;  %v761_v18 = vadd.f32 %v760_v15, %v3912_v9  ;;  %1370 = vmatprep.mubr.f32.mxu0 %v920_v5  ;;  %2570 = vmatprep.mubr.msk.f32.mxu1 %vm1137_vm2, %v922_v10  ;;  %v925_v19 = vmax.f32 %v759_v11, 0.0  ;;  %v923_v25 = vmax.f32 %v502_v13, 0.0 }
 0x13b   :  { %v507_v20 = vpop.f32.mrf.mxu0  ;;  %v764_v21 = vpop.f32.mrf.mxu1  ;;  %1371 = vmatmul.mubr.f32.gmra.mxu0 %v919_v12  ;;  %1628 = vmatmul.mubr.f32.gmra.mxu1 %v921_v63 }
 0x13c   :  { %v924_v22 = vmax.f32 %v504_v17, 0.0  ;;  %v926_v23 = vmax.f32 %v761_v18, 0.0  ;;  %v765_v24 = vadd.f32 %v764_v21, %v3902_v6  ;;  %1962 = vmatpush1.msra.mxu0 %v1815_v16  ;;  %2783 = vmatpush1.msra.mxu1 %v1815_v16  ;;  %v508_v26 = vadd.f32 %v507_v20, %v3906_v7 }
 0x13d   :  { %v509_v27 = vpop.f32.mrf.mxu0  ;;  %v766_v28 = vpop.f32.mrf.mxu1  ;;  %1963 = vmatprep.subr.mxu0 %v2815_v62  ;;  %2766 = vmatprep.subr.mxu1 %v2815_v62 }
 0x13e   :  { %v510_v30 = vadd.f32 %v509_v27, %v3910_v8  ;;  %v767_v31 = vadd.f32 %v766_v28, %v3912_v9  ;;  %1376 = vmatprep.mubr.f32.mxu0 %v924_v22  ;;  %2571 = vmatprep.mubr.msk.f32.mxu1 %vm1137_vm2, %v926_v23  ;;  %v929_v32 = vmax.f32 %v765_v24, 0.0  ;;  %v927_v38 = vmax.f32 %v508_v26, 0.0  ;;  %v1812_v28 = vld [vmem:[%s4405_s5] sm:$0xff] }
 0x13f   :  { %v513_v33 = vpop.f32.mrf.mxu0  ;;  %v770_v34 = vpop.f32.mrf.mxu1  ;;  %1377 = vmatmul.mubr.f32.gmra.mxu0 %v923_v25  ;;  %1634 = vmatmul.mubr.f32.gmra.mxu1 %v925_v19 }
 0x140   :  { %v928_v35 = vmax.f32 %v510_v30, 0.0  ;;  %v930_v36 = vmax.f32 %v767_v31, 0.0  ;;  %v771_v37 = vadd.f32 %v770_v34, %v3902_v6  ;;  %1964 = vmatpush1.msra.mxu0 %v1814_v29  ;;  %2784 = vmatpush1.msra.mxu1 %v1814_v29  ;;  %v514_v39 = vadd.f32 %v513_v33, %v3906_v7 }
 0x141   :  { %v515_v40 = vpop.f32.mrf.mxu0  ;;  %v772_v41 = vpop.f32.mrf.mxu1  ;;  %1965 = vmatprep.subr.mxu0 %v2815_v62  ;;  %2767 = vmatprep.subr.mxu1 %v2815_v62 }
 0x142   :  { %v516_v43 = vadd.f32 %v515_v40, %v3910_v8  ;;  %v773_v44 = vadd.f32 %v772_v41, %v3912_v9  ;;  %1382 = vmatprep.mubr.f32.mxu0 %v928_v35  ;;  %2572 = vmatprep.mubr.msk.f32.mxu1 %vm1137_vm2, %v930_v36  ;;  %v933_v45 = vmax.f32 %v771_v37, 0.0  ;;  %v931_v51 = vmax.f32 %v514_v39, 0.0  ;;  %v1829_v36 = vld [vmem:[%s4405_s5 + $0x88] sm:$0xf] }
 0x143   :  { %v519_v46 = vpop.f32.mrf.mxu0  ;;  %v776_v47 = vpop.f32.mrf.mxu1  ;;  %1383 = vmatmul.mubr.f32.gmra.mxu0 %v927_v38  ;;  %1640 = vmatmul.mubr.f32.gmra.mxu1 %v929_v32 }
 0x144   :  { %v932_v48 = vmax.f32 %v516_v43, 0.0  ;;  %v934_v49 = vmax.f32 %v773_v44, 0.0  ;;  %v777_v50 = vadd.f32 %v776_v47, %v3902_v6  ;;  %1966 = vmatpush1.msra.mxu0 %v1813_v42  ;;  %2785 = vmatpush1.msra.mxu1 %v1813_v42  ;;  %v520_v52 = vadd.f32 %v519_v46, %v3906_v7 }
 0x145   :  { %v521_v53 = vpop.f32.mrf.mxu0  ;;  %v778_v54 = vpop.f32.mrf.mxu1  ;;  %1967 = vmatprep.subr.mxu0 %v2815_v62  ;;  %2768 = vmatprep.subr.mxu1 %v2815_v62 }
 0x146   :  { %v522_v55 = vadd.f32 %v521_v53, %v3910_v8  ;;  %v779_v56 = vadd.f32 %v778_v54, %v3912_v9  ;;  %1388 = vmatprep.mubr.f32.mxu0 %v932_v48  ;;  %2573 = vmatprep.mubr.msk.f32.mxu1 %vm1137_vm2, %v934_v49  ;;  %v937_v57 = vmax.f32 %v777_v50, 0.0  ;;  %v935_v1 = vmax.f32 %v520_v52, 0.0  ;;  %v1828_v49 = vld [vmem:[%s4405_s5 + $0x80] sm:$0xff] }
 0x147   :  { %v525_v58 = vpop.f32.mrf.mxu0  ;;  %v782_v59 = vpop.f32.mrf.mxu1  ;;  %1389 = vmatmul.mubr.f32.gmra.mxu0 %v931_v51  ;;  %1646 = vmatmul.mubr.f32.gmra.mxu1 %v933_v45 }
 0x148   :  { %v936_v60 = vmax.f32 %v522_v55, 0.0  ;;  %v938_v61 = vmax.f32 %v779_v56, 0.0  ;;  %v783_v63 = vadd.f32 %v782_v59, %v3902_v6  ;;  %v526_v3 = vadd.f32 %v525_v58, %v3906_v7  ;;  %1968 = vmatpush1.msra.mxu0 %v1812_v28  ;;  %2786 = vmatpush1.msra.mxu1 %v1812_v28 }
 0x149   :  { %v527_v5 = vpop.f32.mrf.mxu0  ;;  %v784_v10 = vpop.f32.mrf.mxu1  ;;  %1997 = vmatprep.subr.mxu0 %v2815_v62  ;;  %2769 = vmatprep.subr.mxu1 %v2815_v62 }
 0x14a   :  { %v528_v11 = vadd.f32 %v527_v5, %v3910_v8  ;;  %v785_v12 = vadd.f32 %v784_v10, %v3912_v9  ;;  %1394 = vmatprep.mubr.f32.mxu0 %v936_v60  ;;  %2574 = vmatprep.mubr.msk.f32.mxu1 %vm1137_vm2, %v938_v61  ;;  %v941_v13 = vmax.f32 %v783_v63, 0.0  ;;  %v939_v19 = vmax.f32 %v526_v3, 0.0 }
 0x14b   :  { %v531_v14 = vpop.f32.mrf.mxu0  ;;  %v788_v15 = vpop.f32.mrf.mxu1  ;;  %1395 = vmatmul.mubr.f32.gmra.mxu0 %v935_v1  ;;  %1652 = vmatmul.mubr.f32.gmra.mxu1 %v937_v57 }
 0x14c   :  { %v940_v16 = vmax.f32 %v528_v11, 0.0  ;;  %v942_v17 = vmax.f32 %v785_v12, 0.0  ;;  %v789_v18 = vadd.f32 %v788_v15, %v3902_v6  ;;  %v532_v20 = vadd.f32 %v531_v14, %v3906_v7  ;;  %2591 = vmatpush2.msk.msra.mxu0 %vm344_vm0, %v1829_v36  ;;  %2787 = vmatpush2.msk.msra.mxu1 %vm344_vm0, %v1829_v36 }
 0x14d   :  { %v533_v21 = vpop.f32.mrf.mxu0  ;;  %v790_v22 = vpop.f32.mrf.mxu1  ;;  %1999 = vmatprep.subr.mxu0 %v2815_v62  ;;  %2770 = vmatprep.subr.mxu1 %v2815_v62 }
 0x14e   :  { %v534_v23 = vadd.f32 %v533_v21, %v3910_v8  ;;  %v791_v24 = vadd.f32 %v790_v22, %v3912_v9  ;;  %1400 = vmatprep.mubr.f32.mxu0 %v940_v16  ;;  %2575 = vmatprep.mubr.msk.f32.mxu1 %vm1137_vm2, %v942_v17  ;;  %v945_v25 = vmax.f32 %v789_v18, 0.0  ;;  %v943_v32 = vmax.f32 %v532_v20, 0.0 }
 0x14f   :  { %v537_v26 = vpop.f32.mrf.mxu0  ;;  %v794_v27 = vpop.f32.mrf.mxu1  ;;  %1401 = vmatmul.mubr.f32.gmra.mxu0 %v939_v19  ;;  %1658 = vmatmul.mubr.f32.gmra.mxu1 %v941_v13 }
 0x150   :  { %v944_v29 = vmax.f32 %v534_v23, 0.0  ;;  %v946_v30 = vmax.f32 %v791_v24, 0.0  ;;  %v795_v31 = vadd.f32 %v794_v27, %v3902_v6  ;;  %v538_v33 = vadd.f32 %v537_v26, %v3906_v7  ;;  %2000 = vmatpush2.msra.mxu0 %v1828_v49  ;;  %2788 = vmatpush2.msra.mxu1 %v1828_v49 }
 0x151   :  { %v539_v34 = vpop.f32.mrf.mxu0  ;;  %v796_v35 = vpop.f32.mrf.mxu1  ;;  %2673 = vmatprep.subr.mxu1 %v4181_v0 }
 0x152   :  { %v540_v37 = vadd.f32 %v539_v34, %v3910_v8  ;;  %v797_v38 = vadd.f32 %v796_v35, %v3912_v9  ;;  %1406 = vmatprep.mubr.f32.mxu0 %v944_v29  ;;  %2576 = vmatprep.mubr.msk.f32.mxu1 %vm1137_vm2, %v946_v30  ;;  %v949_v39 = vmax.f32 %v795_v31, 0.0  ;;  %v947_v45 = vmax.f32 %v538_v33, 0.0 }
 0x153   :  { %v543_v40 = vpop.f32.mrf.mxu0  ;;  %v800_v41 = vpop.f32.mrf.mxu1  ;;  %1407 = vmatmul.mubr.f32.gmra.mxu0 %v943_v32  ;;  %1664 = vmatmul.mubr.f32.gmra.mxu1 %v945_v25 }
 0x154   :  { %v948_v42 = vmax.f32 %v540_v37, 0.0  ;;  %v950_v43 = vmax.f32 %v797_v38, 0.0  ;;  %v801_v44 = vadd.f32 %v800_v41, %v3902_v6  ;;  %v544_v46 = vadd.f32 %v543_v40, %v3906_v7 }
 0x155   :  { %v545_v47 = vpop.f32.mrf.mxu0  ;;  %v802_v48 = vpop.f32.mrf.mxu1 }
 0x156   :  { %v546_v50 = vadd.f32 %v545_v47, %v3910_v8  ;;  %v803_v51 = vadd.f32 %v802_v48, %v3912_v9  ;;  %1412 = vmatprep.mubr.f32.mxu0 %v948_v42  ;;  %2577 = vmatprep.mubr.msk.f32.mxu1 %vm1137_vm2, %v950_v43  ;;  %v953_v52 = vmax.f32 %v801_v44, 0.0  ;;  %v951_v58 = vmax.f32 %v544_v46, 0.0 }
 0x157   :  { %v549_v53 = vpop.f32.mrf.mxu0  ;;  %v806_v54 = vpop.f32.mrf.mxu1  ;;  %1413 = vmatmul.mubr.f32.gmra.mxu0 %v947_v45  ;;  %1670 = vmatmul.mubr.f32.gmra.mxu1 %v949_v39 }
 0x158   :  { %v952_v55 = vmax.f32 %v546_v50, 0.0  ;;  %v954_v56 = vmax.f32 %v803_v51, 0.0  ;;  %v807_v57 = vadd.f32 %v806_v54, %v3902_v6  ;;  %v550_v62 = vadd.f32 %v549_v53, %v3906_v7 }
 0x159   :  { %v551_v59 = vpop.f32.mrf.mxu0  ;;  %v808_v60 = vpop.f32.mrf.mxu1 }
 0x15a   :  { %v552_v61 = vadd.f32 %v551_v59, %v3910_v8  ;;  %v809_v63 = vadd.f32 %v808_v60, %v3912_v9  ;;  %1418 = vmatprep.mubr.f32.mxu0 %v952_v55  ;;  %2578 = vmatprep.mubr.msk.f32.mxu1 %vm1137_vm2, %v954_v56  ;;  %v957_v1 = vmax.f32 %v807_v57, 0.0  ;;  %v955_v13 = vmax.f32 %v550_v62, 0.0 }
 0x15b   :  { %v555_v3 = vpop.f32.mrf.mxu0  ;;  %v812_v5 = vpop.f32.mrf.mxu1  ;;  %1419 = vmatmul.mubr.f32.gmra.mxu0 %v951_v58  ;;  %1676 = vmatmul.mubr.f32.gmra.mxu1 %v953_v52 }
 0x15c   :  { %v956_v10 = vmax.f32 %v552_v61, 0.0  ;;  %v958_v11 = vmax.f32 %v809_v63, 0.0  ;;  %v813_v12 = vadd.f32 %v812_v5, %v3902_v6  ;;  %v556_v14 = vadd.f32 %v555_v3, %v3906_v7 }
 0x15d   :  { %v557_v15 = vpop.f32.mrf.mxu0  ;;  %v814_v16 = vpop.f32.mrf.mxu1 }
 0x15e   :  { %v558_v17 = vadd.f32 %v557_v15, %v3910_v8  ;;  %v815_v18 = vadd.f32 %v814_v16, %v3912_v9  ;;  %1424 = vmatprep.mubr.f32.mxu0 %v956_v10  ;;  %2579 = vmatprep.mubr.msk.f32.mxu1 %vm1137_vm2, %v958_v11  ;;  %v961_v19 = vmax.f32 %v813_v12, 0.0  ;;  %v959_v25 = vmax.f32 %v556_v14, 0.0 }
 0x15f   :  { %v561_v20 = vpop.f32.mrf.mxu0  ;;  %v818_v21 = vpop.f32.mrf.mxu1  ;;  %1425 = vmatmul.mubr.f32.gmra.mxu0 %v955_v13  ;;  %1682 = vmatmul.mubr.f32.gmra.mxu1 %v957_v1 }
 0x160   :  { %v960_v22 = vmax.f32 %v558_v17, 0.0  ;;  %v962_v23 = vmax.f32 %v815_v18, 0.0  ;;  %v819_v24 = vadd.f32 %v818_v21, %v3902_v6  ;;  %v562_v26 = vadd.f32 %v561_v20, %v3906_v7 }
 0x161   :  { %v563_v27 = vpop.f32.mrf.mxu0  ;;  %v820_v28 = vpop.f32.mrf.mxu1 }
 0x162   :  { %v564_v29 = vadd.f32 %v563_v27, %v3910_v8  ;;  %v821_v30 = vadd.f32 %v820_v28, %v3912_v9  ;;  %1430 = vmatprep.mubr.f32.mxu0 %v960_v22  ;;  %2580 = vmatprep.mubr.msk.f32.mxu1 %vm1137_vm2, %v962_v23  ;;  %v965_v31 = vmax.f32 %v819_v24, 0.0  ;;  %v963_v37 = vmax.f32 %v562_v26, 0.0 }
 0x163   :  { %v567_v32 = vpop.f32.mrf.mxu0  ;;  %v824_v33 = vpop.f32.mrf.mxu1  ;;  %1431 = vmatmul.mubr.f32.gmra.mxu0 %v959_v25  ;;  %1688 = vmatmul.mubr.f32.gmra.mxu1 %v961_v19 }
 0x164   :  { %v964_v34 = vmax.f32 %v564_v29, 0.0  ;;  %v966_v35 = vmax.f32 %v821_v30, 0.0  ;;  %v825_v36 = vadd.f32 %v824_v33, %v3902_v6  ;;  %v568_v38 = vadd.f32 %v567_v32, %v3906_v7 }
 0x165   :  { %v569_v39 = vpop.f32.mrf.mxu0  ;;  %v826_v40 = vpop.f32.mrf.mxu1 }
 0x166   :  { %v570_v41 = vadd.f32 %v569_v39, %v3910_v8  ;;  %v827_v42 = vadd.f32 %v826_v40, %v3912_v9  ;;  %1436 = vmatprep.mubr.f32.mxu0 %v964_v34  ;;  %2581 = vmatprep.mubr.msk.f32.mxu1 %vm1137_vm2, %v966_v35  ;;  %v969_v43 = vmax.f32 %v825_v36, 0.0  ;;  %v967_v49 = vmax.f32 %v568_v38, 0.0 }
 0x167   :  { %v573_v44 = vpop.f32.mrf.mxu0  ;;  %v830_v45 = vpop.f32.mrf.mxu1  ;;  %1437 = vmatmul.mubr.f32.gmra.mxu0 %v963_v37  ;;  %1694 = vmatmul.mubr.f32.gmra.mxu1 %v965_v31 }
 0x168   :  { %v968_v46 = vmax.f32 %v570_v41, 0.0  ;;  %v970_v47 = vmax.f32 %v827_v42, 0.0  ;;  %v831_v48 = vadd.f32 %v830_v45, %v3902_v6  ;;  %v574_v50 = vadd.f32 %v573_v44, %v3906_v7 }
 0x169   :  { %v575_v51 = vpop.f32.mrf.mxu0  ;;  %v832_v52 = vpop.f32.mrf.mxu1 }
 0x16a   :  { %v576_v53 = vadd.f32 %v575_v51, %v3910_v8  ;;  %v833_v54 = vadd.f32 %v832_v52, %v3912_v9  ;;  %1442 = vmatprep.mubr.f32.mxu0 %v968_v46  ;;  %2582 = vmatprep.mubr.msk.f32.mxu1 %vm1137_vm2, %v970_v47  ;;  %v973_v55 = vmax.f32 %v831_v48, 0.0  ;;  %v971_v60 = vmax.f32 %v574_v50, 0.0 }
 0x16b   :  { %v579_v56 = vpop.f32.mrf.mxu0  ;;  %v836_v57 = vpop.f32.mrf.mxu1  ;;  %1443 = vmatmul.mubr.f32.gmra.mxu0 %v967_v49  ;;  %1700 = vmatmul.mubr.f32.gmra.mxu1 %v969_v43 }
 0x16c   :  { %v972_v58 = vmax.f32 %v576_v53, 0.0  ;;  %v974_v62 = vmax.f32 %v833_v54, 0.0  ;;  %v837_v59 = vadd.f32 %v836_v57, %v3902_v6  ;;  %v580_v61 = vadd.f32 %v579_v56, %v3906_v7 }
 0x16d   :  { %v581_v63 = vpop.f32.mrf.mxu0  ;;  %v838_v1 = vpop.f32.mrf.mxu1 }
 0x16e   :  { %v582_v3 = vadd.f32 %v581_v63, %v3910_v8  ;;  %v839_v5 = vadd.f32 %v838_v1, %v3912_v9  ;;  %1448 = vmatprep.mubr.f32.mxu0 %v972_v58  ;;  %2583 = vmatprep.mubr.msk.f32.mxu1 %vm1137_vm2, %v974_v62  ;;  %v977_v10 = vmax.f32 %v837_v59, 0.0  ;;  %v975_v16 = vmax.f32 %v580_v61, 0.0 }
 0x16f   :  { %v585_v11 = vpop.f32.mrf.mxu0  ;;  %v842_v12 = vpop.f32.mrf.mxu1  ;;  %1449 = vmatmul.mubr.f32.gmra.mxu0 %v971_v60  ;;  %1706 = vmatmul.mubr.f32.gmra.mxu1 %v973_v55 }
 0x170   :  { %v976_v13 = vmax.f32 %v582_v3, 0.0  ;;  %v978_v14 = vmax.f32 %v839_v5, 0.0  ;;  %v843_v15 = vadd.f32 %v842_v12, %v3902_v6  ;;  %v586_v17 = vadd.f32 %v585_v11, %v3906_v7 }
 0x171   :  { %v587_v18 = vpop.f32.mrf.mxu0  ;;  %v844_v19 = vpop.f32.mrf.mxu1 }
 0x172   :  { %v588_v20 = vadd.f32 %v587_v18, %v3910_v8  ;;  %v845_v21 = vadd.f32 %v844_v19, %v3912_v9  ;;  %1454 = vmatprep.mubr.f32.mxu0 %v976_v13  ;;  %2584 = vmatprep.mubr.msk.f32.mxu1 %vm1137_vm2, %v978_v14  ;;  %v981_v22 = vmax.f32 %v843_v15, 0.0  ;;  %v979_v28 = vmax.f32 %v586_v17, 0.0 }
 0x173   :  { %v591_v23 = vpop.f32.mrf.mxu0  ;;  %v848_v24 = vpop.f32.mrf.mxu1  ;;  %1455 = vmatmul.mubr.f32.gmra.mxu0 %v975_v16  ;;  %1712 = vmatmul.mubr.f32.gmra.mxu1 %v977_v10 }
 0x174   :  { %v980_v25 = vmax.f32 %v588_v20, 0.0  ;;  %v982_v26 = vmax.f32 %v845_v21, 0.0  ;;  %v849_v27 = vadd.f32 %v848_v24, %v3902_v6  ;;  %v592_v29 = vadd.f32 %v591_v23, %v3906_v7 }
 0x175   :  { %v593_v30 = vpop.f32.mrf.mxu0  ;;  %v850_v31 = vpop.f32.mrf.mxu1 }
 0x176   :  { %v594_v32 = vadd.f32 %v593_v30, %v3910_v8  ;;  %v851_v33 = vadd.f32 %v850_v31, %v3912_v9  ;;  %1460 = vmatprep.mubr.f32.mxu0 %v980_v25  ;;  %2585 = vmatprep.mubr.msk.f32.mxu1 %vm1137_vm2, %v982_v26  ;;  %v985_v34 = vmax.f32 %v849_v27, 0.0  ;;  %v983_v40 = vmax.f32 %v592_v29, 0.0 }
 0x177   :  { %v597_v35 = vpop.f32.mrf.mxu0  ;;  %v854_v36 = vpop.f32.mrf.mxu1  ;;  %1461 = vmatmul.mubr.f32.gmra.mxu0 %v979_v28  ;;  %1718 = vmatmul.mubr.f32.gmra.mxu1 %v981_v22 }
 0x178   :  { %v984_v37 = vmax.f32 %v594_v32, 0.0  ;;  %v986_v38 = vmax.f32 %v851_v33, 0.0  ;;  %v855_v39 = vadd.f32 %v854_v36, %v3902_v6  ;;  %v598_v41 = vadd.f32 %v597_v35, %v3906_v7 }
 0x179   :  { %v599_v42 = vpop.f32.mrf.mxu0  ;;  %v856_v43 = vpop.f32.mrf.mxu1 }
 0x17a   :  { %v600_v44 = vadd.f32 %v599_v42, %v3910_v8  ;;  %v857_v45 = vadd.f32 %v856_v43, %v3912_v9  ;;  %1466 = vmatprep.mubr.f32.mxu0 %v984_v37  ;;  %2586 = vmatprep.mubr.msk.f32.mxu1 %vm1137_vm2, %v986_v38  ;;  %v989_v46 = vmax.f32 %v855_v39, 0.0  ;;  %v987_v52 = vmax.f32 %v598_v41, 0.0 }
 0x17b   :  { %v603_v47 = vpop.f32.mrf.mxu0  ;;  %v860_v48 = vpop.f32.mrf.mxu1  ;;  %1467 = vmatmul.mubr.f32.gmra.mxu0 %v983_v40  ;;  %1724 = vmatmul.mubr.f32.gmra.mxu1 %v985_v34 }
 0x17c   :  { %v988_v49 = vmax.f32 %v600_v44, 0.0  ;;  %v990_v50 = vmax.f32 %v857_v45, 0.0  ;;  %v861_v51 = vadd.f32 %v860_v48, %v3902_v6  ;;  %v604_v53 = vadd.f32 %v603_v47, %v3906_v7 }
 0x17d   :  { %v605_v54 = vpop.f32.mrf.mxu0  ;;  %v862_v55 = vpop.f32.mrf.mxu1 }
 0x17e   :  { %v606_v56 = vadd.f32 %v605_v54, %v3910_v8  ;;  %v863_v57 = vadd.f32 %v862_v55, %v3912_v9  ;;  %1472 = vmatprep.mubr.f32.mxu0 %v988_v49  ;;  %2587 = vmatprep.mubr.msk.f32.mxu1 %vm1137_vm2, %v990_v50  ;;  %v993_v58 = vmax.f32 %v861_v51, 0.0  ;;  %v991_v1 = vmax.f32 %v604_v53, 0.0 }
 0x17f   :  { %v609_v62 = vpop.f32.mrf.mxu0  ;;  %v866_v59 = vpop.f32.mrf.mxu1  ;;  %1473 = vmatmul.mubr.f32.gmra.mxu0 %v987_v52  ;;  %1730 = vmatmul.mubr.f32.gmra.mxu1 %v989_v46 }
 0x180   :  { %v992_v60 = vmax.f32 %v606_v56, 0.0  ;;  %v994_v61 = vmax.f32 %v863_v57, 0.0  ;;  %v867_v63 = vadd.f32 %v866_v59, %v3902_v6  ;;  %v610_v3 = vadd.f32 %v609_v62, %v3906_v7  ;;  %v1125_v6 = vld [vmem:[%s4404_s4] sm:$0x3] }
 0x181   :  { %v611_v5 = vpop.f32.mrf.mxu0  ;;  %v868_v10 = vpop.f32.mrf.mxu1  ;;  %v4169_v7 = vrot.slane %v1125_v6, %v229_v2 }
 0x182   :  { %v612_v11 = vadd.f32 %v611_v5, %v3910_v8  ;;  %v869_v12 = vadd.f32 %v868_v10, %v3912_v9  ;;  %1478 = vmatprep.mubr.f32.mxu0 %v992_v60  ;;  %2588 = vmatprep.mubr.msk.f32.mxu1 %vm1137_vm2, %v994_v61  ;;  %v997_v13 = vmax.f32 %v867_v63, 0.0  ;;  %v995_v16 = vmax.f32 %v610_v3, 0.0 }
 0x183   :  { %1479 = vmatmul.mubr.f32.gmra.mxu0 %v991_v1  ;;  %1736 = vmatmul.mubr.f32.gmra.mxu1 %v993_v58  ;;  %v4173_v8 = vrot.slane %v1125_v6, %v233_v4 }
 0x184   :  { %v996_v14 = vmax.f32 %v612_v11, 0.0  ;;  %v998_v15 = vmax.f32 %v869_v12, 0.0 }
 0x186   :  { %1484 = vmatprep.mubr.f32.mxu0 %v996_v14  ;;  %2589 = vmatprep.mubr.msk.f32.mxu1 %vm1137_vm2, %v998_v15 }
 0x187   :  { %1485 = vmatmul.mubr.f32.gmra.mxu0 %v995_v16  ;;  %1742 = vmatmul.mubr.f32.gmra.mxu1 %v997_v13 }
 0x1cb   :  { %v1300_v9 = vpop.f32.mrf.mxu0  ;;  %v1557_v17 = vpop.f32.mrf.mxu1 }
 0x1cc   :  { %v1301_v18 = vadd.f32 %v1300_v9, %v4169_v7 }
 0x1cd   :  { %v1302_v19 = vpop.f32.mrf.mxu0  ;;  %v1559_v20 = vpop.f32.mrf.mxu1 }
 0x1ce   :  { %v1303_v21 = vadd.f32 %v1302_v19, %v4173_v8  ;;  %v1558_v22 = vadd.f32 %v1557_v17, %v1301_v18 }
 0x1cf   :  { %v1306_v23 = vpop.f32.mrf.mxu0  ;;  %v1563_v24 = vpop.f32.mrf.mxu1 }
 0x1d0   :  { %v1560_v25 = vadd.f32 %v1559_v20, %v1303_v21  ;;  %v1307_v26 = vadd.f32 %v1306_v23, %v4169_v7  ;;  %v1748_v29 = vmax.f32 %v1558_v22, 0.0 }
 0x1d1   :  { %v1308_v2 = vpop.f32.mrf.mxu0  ;;  %v1565_v27 = vpop.f32.mrf.mxu1 }
 0x1d2   :  { %v1749_v4 = vmax.f32 %v1560_v25, 0.0  ;;  %v1309_v28 = vadd.f32 %v1308_v2, %v4173_v8  ;;  %v1564_v30 = vadd.f32 %v1563_v24, %v1307_v26 }
 0x1d3   :  { %v1312_v31 = vpop.f32.mrf.mxu0  ;;  %v1569_v32 = vpop.f32.mrf.mxu1 }
 0x1d4   :  { %v1566_v33 = vadd.f32 %v1565_v27, %v1309_v28  ;;  %v1313_v34 = vadd.f32 %v1312_v31, %v4169_v7  ;;  %2592 = vmatprep.mubr.msk.f32.mxu0 %vm1837_vm3, %v1749_v4  ;;  %v1750_v39 = vmax.f32 %v1564_v30, 0.0 }
 0x1d5   :  { %v1314_v35 = vpop.f32.mrf.mxu0  ;;  %v1571_v36 = vpop.f32.mrf.mxu1  ;;  %2002 = vmatmul.mubr.f32.vlgmr.msra.gmra.mxu0 %v1748_v29 }
 0x1d6   :  { %v1751_v37 = vmax.f32 %v1566_v33, 0.0  ;;  %v1315_v38 = vadd.f32 %v1314_v35, %v4173_v8  ;;  %v1570_v40 = vadd.f32 %v1569_v32, %v1313_v34 }
 0x1d7   :  { %v1318_v41 = vpop.f32.mrf.mxu0  ;;  %v1575_v42 = vpop.f32.mrf.mxu1 }
 0x1d8   :  { %v1572_v43 = vadd.f32 %v1571_v36, %v1315_v38  ;;  %v1319_v44 = vadd.f32 %v1318_v41, %v4169_v7  ;;  %2593 = vmatprep.mubr.msk.f32.mxu0 %vm1837_vm3, %v1751_v37  ;;  %v1752_v49 = vmax.f32 %v1570_v40, 0.0 }
 0x1d9   :  { %v1320_v45 = vpop.f32.mrf.mxu0  ;;  %v1577_v46 = vpop.f32.mrf.mxu1  ;;  %2007 = vmatmul.mubr.f32.gmra.mxu0 %v1750_v39 }
 0x1da   :  { %v1753_v47 = vmax.f32 %v1572_v43, 0.0  ;;  %v1321_v48 = vadd.f32 %v1320_v45, %v4173_v8  ;;  %v1576_v50 = vadd.f32 %v1575_v42, %v1319_v44 }
 0x1db   :  { %v1324_v51 = vpop.f32.mrf.mxu0  ;;  %v1581_v52 = vpop.f32.mrf.mxu1 }
 0x1dc   :  { %v1578_v53 = vadd.f32 %v1577_v46, %v1321_v48  ;;  %v1325_v54 = vadd.f32 %v1324_v51, %v4169_v7  ;;  %2594 = vmatprep.mubr.msk.f32.mxu0 %vm1837_vm3, %v1753_v47  ;;  %v1754_v62 = vmax.f32 %v1576_v50, 0.0 }
 0x1dd   :  { %v1326_v55 = vpop.f32.mrf.mxu0  ;;  %v1583_v56 = vpop.f32.mrf.mxu1  ;;  %2012 = vmatmul.mubr.f32.gmra.mxu0 %v1752_v49 }
 0x1de   :  { %v1755_v57 = vmax.f32 %v1578_v53, 0.0  ;;  %v1327_v58 = vadd.f32 %v1326_v55, %v4173_v8  ;;  %v1582_v59 = vadd.f32 %v1581_v52, %v1325_v54 }
 0x1df   :  { %v1330_v60 = vpop.f32.mrf.mxu0  ;;  %v1587_v61 = vpop.f32.mrf.mxu1 }
 0x1e0   :  { %v1584_v63 = vadd.f32 %v1583_v56, %v1327_v58  ;;  %v1331_v1 = vadd.f32 %v1330_v60, %v4169_v7  ;;  %2595 = vmatprep.mubr.msk.f32.mxu0 %vm1837_vm3, %v1755_v57  ;;  %v1756_v12 = vmax.f32 %v1582_v59, 0.0 }
 0x1e1   :  { %v1332_v3 = vpop.f32.mrf.mxu0  ;;  %v1589_v5 = vpop.f32.mrf.mxu1  ;;  %2017 = vmatmul.mubr.f32.gmra.mxu0 %v1754_v62 }
 0x1e2   :  { %v1757_v10 = vmax.f32 %v1584_v63, 0.0  ;;  %v1333_v11 = vadd.f32 %v1332_v3, %v4173_v8  ;;  %v1588_v13 = vadd.f32 %v1587_v61, %v1331_v1 }
 0x1e3   :  { %v1336_v14 = vpop.f32.mrf.mxu0  ;;  %v1593_v15 = vpop.f32.mrf.mxu1 }
 0x1e4   :  { %v1590_v16 = vadd.f32 %v1589_v5, %v1333_v11  ;;  %v1337_v6 = vadd.f32 %v1336_v14, %v4169_v7  ;;  %2596 = vmatprep.mubr.msk.f32.mxu0 %vm1837_vm3, %v1757_v10  ;;  %v1758_v20 = vmax.f32 %v1588_v13, 0.0 }
 0x1e5   :  { %v1338_v9 = vpop.f32.mrf.mxu0  ;;  %v1595_v17 = vpop.f32.mrf.mxu1  ;;  %2022 = vmatmul.mubr.f32.gmra.mxu0 %v1756_v12 }
 0x1e6   :  { %v1759_v18 = vmax.f32 %v1590_v16, 0.0  ;;  %v1339_v19 = vadd.f32 %v1338_v9, %v4173_v8  ;;  %v1594_v21 = vadd.f32 %v1593_v15, %v1337_v6 }
 0x1e7   :  { %v1342_v22 = vpop.f32.mrf.mxu0  ;;  %v1599_v23 = vpop.f32.mrf.mxu1 }
 0x1e8   :  { %v1596_v24 = vadd.f32 %v1595_v17, %v1339_v19  ;;  %v1343_v25 = vadd.f32 %v1342_v22, %v4169_v7  ;;  %2597 = vmatprep.mubr.msk.f32.mxu0 %vm1837_vm3, %v1759_v18  ;;  %v1760_v28 = vmax.f32 %v1594_v21, 0.0 }
 0x1e9   :  { %v1344_v26 = vpop.f32.mrf.mxu0  ;;  %v1601_v2 = vpop.f32.mrf.mxu1  ;;  %2027 = vmatmul.mubr.f32.gmra.mxu0 %v1758_v20 }
 0x1ea   :  { %v1761_v27 = vmax.f32 %v1596_v24, 0.0  ;;  %v1345_v4 = vadd.f32 %v1344_v26, %v4173_v8  ;;  %v1600_v29 = vadd.f32 %v1599_v23, %v1343_v25 }
 0x1eb   :  { %v1348_v30 = vpop.f32.mrf.mxu0  ;;  %v1605_v31 = vpop.f32.mrf.mxu1 }
 0x1ec   :  { %v1602_v32 = vadd.f32 %v1601_v2, %v1345_v4  ;;  %v1349_v33 = vadd.f32 %v1348_v30, %v4169_v7  ;;  %2598 = vmatprep.mubr.msk.f32.mxu0 %vm1837_vm3, %v1761_v27  ;;  %v1762_v38 = vmax.f32 %v1600_v29, 0.0 }
 0x1ed   :  { %v1350_v34 = vpop.f32.mrf.mxu0  ;;  %v1607_v35 = vpop.f32.mrf.mxu1  ;;  %2032 = vmatmul.mubr.f32.gmra.mxu0 %v1760_v28 }
 0x1ee   :  { %v1763_v36 = vmax.f32 %v1602_v32, 0.0  ;;  %v1351_v37 = vadd.f32 %v1350_v34, %v4173_v8  ;;  %v1606_v39 = vadd.f32 %v1605_v31, %v1349_v33 }
 0x1ef   :  { %v1354_v40 = vpop.f32.mrf.mxu0  ;;  %v1611_v41 = vpop.f32.mrf.mxu1 }
 0x1f0   :  { %v1608_v42 = vadd.f32 %v1607_v35, %v1351_v37  ;;  %v1355_v43 = vadd.f32 %v1354_v40, %v4169_v7  ;;  %2599 = vmatprep.mubr.msk.f32.mxu0 %vm1837_vm3, %v1763_v36  ;;  %v1764_v48 = vmax.f32 %v1606_v39, 0.0 }
 0x1f1   :  { %v1356_v44 = vpop.f32.mrf.mxu0  ;;  %v1613_v45 = vpop.f32.mrf.mxu1  ;;  %2037 = vmatmul.mubr.f32.gmra.mxu0 %v1762_v38 }
 0x1f2   :  { %v1765_v46 = vmax.f32 %v1608_v42, 0.0  ;;  %v1357_v47 = vadd.f32 %v1356_v44, %v4173_v8  ;;  %v1612_v49 = vadd.f32 %v1611_v41, %v1355_v43 }
 0x1f3   :  { %v1360_v50 = vpop.f32.mrf.mxu0  ;;  %v1617_v51 = vpop.f32.mrf.mxu1 }
 0x1f4   :  { %v1614_v52 = vadd.f32 %v1613_v45, %v1357_v47  ;;  %v1361_v53 = vadd.f32 %v1360_v50, %v4169_v7  ;;  %2600 = vmatprep.mubr.msk.f32.mxu0 %vm1837_vm3, %v1765_v46  ;;  %v1766_v58 = vmax.f32 %v1612_v49, 0.0 }
 0x1f5   :  { %v1362_v54 = vpop.f32.mrf.mxu0  ;;  %v1619_v55 = vpop.f32.mrf.mxu1  ;;  %2042 = vmatmul.mubr.f32.gmra.mxu0 %v1764_v48 }
 0x1f6   :  { %v1767_v56 = vmax.f32 %v1614_v52, 0.0  ;;  %v1363_v57 = vadd.f32 %v1362_v54, %v4173_v8  ;;  %v1618_v62 = vadd.f32 %v1617_v51, %v1361_v53 }
 0x1f7   :  { %v1366_v59 = vpop.f32.mrf.mxu0  ;;  %v1623_v60 = vpop.f32.mrf.mxu1 }
 0x1f8   :  { %v1620_v61 = vadd.f32 %v1619_v55, %v1363_v57  ;;  %v1367_v63 = vadd.f32 %v1366_v59, %v4169_v7  ;;  %2601 = vmatprep.mubr.msk.f32.mxu0 %vm1837_vm3, %v1767_v56  ;;  %v1768_v11 = vmax.f32 %v1618_v62, 0.0 }
 0x1f9   :  { %v1368_v1 = vpop.f32.mrf.mxu0  ;;  %v1625_v3 = vpop.f32.mrf.mxu1  ;;  %2047 = vmatmul.mubr.f32.gmra.mxu0 %v1766_v58 }
 0x1fa   :  { %v1769_v5 = vmax.f32 %v1620_v61, 0.0  ;;  %v1369_v10 = vadd.f32 %v1368_v1, %v4173_v8  ;;  %v1624_v12 = vadd.f32 %v1623_v60, %v1367_v63 }
 0x1fb   :  { %v1372_v13 = vpop.f32.mrf.mxu0  ;;  %v1629_v14 = vpop.f32.mrf.mxu1 }
 0x1fc   :  { %v1626_v15 = vadd.f32 %v1625_v3, %v1369_v10  ;;  %v1373_v16 = vadd.f32 %v1372_v13, %v4169_v7  ;;  %2602 = vmatprep.mubr.msk.f32.mxu0 %vm1837_vm3, %v1769_v5  ;;  %v1770_v19 = vmax.f32 %v1624_v12, 0.0 }
 0x1fd   :  { %v1374_v6 = vpop.f32.mrf.mxu0  ;;  %v1631_v9 = vpop.f32.mrf.mxu1  ;;  %2052 = vmatmul.mubr.f32.gmra.mxu0 %v1768_v11 }
 0x1fe   :  { %v1771_v17 = vmax.f32 %v1626_v15, 0.0  ;;  %v1375_v18 = vadd.f32 %v1374_v6, %v4173_v8  ;;  %v1630_v20 = vadd.f32 %v1629_v14, %v1373_v16 }
 0x1ff   :  { %v1378_v21 = vpop.f32.mrf.mxu0  ;;  %v1635_v22 = vpop.f32.mrf.mxu1 }
 0x200   :  { %v1632_v23 = vadd.f32 %v1631_v9, %v1375_v18  ;;  %v1379_v24 = vadd.f32 %v1378_v21, %v4169_v7  ;;  %2603 = vmatprep.mubr.msk.f32.mxu0 %vm1837_vm3, %v1771_v17  ;;  %v1772_v4 = vmax.f32 %v1630_v20, 0.0 }
 0x201   :  { %v1380_v25 = vpop.f32.mrf.mxu0  ;;  %v1637_v26 = vpop.f32.mrf.mxu1  ;;  %2057 = vmatmul.mubr.f32.gmra.mxu0 %v1770_v19 }
 0x202   :  { %v1773_v2 = vmax.f32 %v1632_v23, 0.0  ;;  %v1381_v27 = vadd.f32 %v1380_v25, %v4173_v8  ;;  %v1636_v28 = vadd.f32 %v1635_v22, %v1379_v24 }
 0x203   :  { %v1384_v29 = vpop.f32.mrf.mxu0  ;;  %v1641_v30 = vpop.f32.mrf.mxu1 }
 0x204   :  { %v1638_v31 = vadd.f32 %v1637_v26, %v1381_v27  ;;  %v1385_v32 = vadd.f32 %v1384_v29, %v4169_v7  ;;  %2604 = vmatprep.mubr.msk.f32.mxu0 %vm1837_vm3, %v1773_v2  ;;  %v1774_v37 = vmax.f32 %v1636_v28, 0.0 }
 0x205   :  { %v1386_v33 = vpop.f32.mrf.mxu0  ;;  %v1643_v34 = vpop.f32.mrf.mxu1  ;;  %2062 = vmatmul.mubr.f32.gmra.mxu0 %v1772_v4 }
 0x206   :  { %v1775_v35 = vmax.f32 %v1638_v31, 0.0  ;;  %v1387_v36 = vadd.f32 %v1386_v33, %v4173_v8  ;;  %v1642_v38 = vadd.f32 %v1641_v30, %v1385_v32 }
 0x207   :  { %v1390_v39 = vpop.f32.mrf.mxu0  ;;  %v1647_v40 = vpop.f32.mrf.mxu1 }
 0x208   :  { %v1644_v41 = vadd.f32 %v1643_v34, %v1387_v36  ;;  %v1391_v42 = vadd.f32 %v1390_v39, %v4169_v7  ;;  %2605 = vmatprep.mubr.msk.f32.mxu0 %vm1837_vm3, %v1775_v35  ;;  %v1776_v47 = vmax.f32 %v1642_v38, 0.0 }
 0x209   :  { %v1392_v43 = vpop.f32.mrf.mxu0  ;;  %v1649_v44 = vpop.f32.mrf.mxu1  ;;  %2067 = vmatmul.mubr.f32.gmra.mxu0 %v1774_v37 }
 0x20a   :  { %v1777_v45 = vmax.f32 %v1644_v41, 0.0  ;;  %v1393_v46 = vadd.f32 %v1392_v43, %v4173_v8  ;;  %v1648_v48 = vadd.f32 %v1647_v40, %v1391_v42 }
 0x20b   :  { %v1396_v49 = vpop.f32.mrf.mxu0  ;;  %v1653_v50 = vpop.f32.mrf.mxu1 }
 0x20c   :  { %v1650_v51 = vadd.f32 %v1649_v44, %v1393_v46  ;;  %v1397_v52 = vadd.f32 %v1396_v49, %v4169_v7  ;;  %2606 = vmatprep.mubr.msk.f32.mxu0 %vm1837_vm3, %v1777_v45  ;;  %v1778_v57 = vmax.f32 %v1648_v48, 0.0 }
 0x20d   :  { %v1398_v53 = vpop.f32.mrf.mxu0  ;;  %v1655_v54 = vpop.f32.mrf.mxu1  ;;  %2072 = vmatmul.mubr.f32.gmra.mxu0 %v1776_v47 }
 0x20e   :  { %v1779_v55 = vmax.f32 %v1650_v51, 0.0  ;;  %v1399_v56 = vadd.f32 %v1398_v53, %v4173_v8  ;;  %v1654_v58 = vadd.f32 %v1653_v50, %v1397_v52 }
 0x20f   :  { %v1402_v62 = vpop.f32.mrf.mxu0  ;;  %v1659_v59 = vpop.f32.mrf.mxu1 }
 0x210   :  { %v1656_v60 = vadd.f32 %v1655_v54, %v1399_v56  ;;  %v1403_v61 = vadd.f32 %v1402_v62, %v4169_v7  ;;  %2607 = vmatprep.mubr.msk.f32.mxu0 %vm1837_vm3, %v1779_v55  ;;  %v1780_v10 = vmax.f32 %v1654_v58, 0.0 }
 0x211   :  { %v1404_v63 = vpop.f32.mrf.mxu0  ;;  %v1661_v1 = vpop.f32.mrf.mxu1  ;;  %2077 = vmatmul.mubr.f32.gmra.mxu0 %v1778_v57 }
 0x212   :  { %v1781_v3 = vmax.f32 %v1656_v60, 0.0  ;;  %v1405_v5 = vadd.f32 %v1404_v63, %v4173_v8  ;;  %v1660_v11 = vadd.f32 %v1659_v59, %v1403_v61 }
 0x213   :  { %v1408_v12 = vpop.f32.mrf.mxu0  ;;  %v1665_v13 = vpop.f32.mrf.mxu1 }
 0x214   :  { %v1662_v14 = vadd.f32 %v1661_v1, %v1405_v5  ;;  %v1409_v15 = vadd.f32 %v1408_v12, %v4169_v7  ;;  %2608 = vmatprep.mubr.msk.f32.mxu0 %vm1837_vm3, %v1781_v3  ;;  %v1782_v18 = vmax.f32 %v1660_v11, 0.0 }
 0x215   :  { %v1410_v16 = vpop.f32.mrf.mxu0  ;;  %v1667_v6 = vpop.f32.mrf.mxu1  ;;  %2082 = vmatmul.mubr.f32.gmra.mxu0 %v1780_v10 }
 0x216   :  { %v1783_v9 = vmax.f32 %v1662_v14, 0.0  ;;  %v1411_v17 = vadd.f32 %v1410_v16, %v4173_v8  ;;  %v1666_v19 = vadd.f32 %v1665_v13, %v1409_v15 }
 0x217   :  { %v1414_v20 = vpop.f32.mrf.mxu0  ;;  %v1671_v21 = vpop.f32.mrf.mxu1 }
 0x218   :  { %v1668_v22 = vadd.f32 %v1667_v6, %v1411_v17  ;;  %v1415_v23 = vadd.f32 %v1414_v20, %v4169_v7  ;;  %2609 = vmatprep.mubr.msk.f32.mxu0 %vm1837_vm3, %v1783_v9  ;;  %v1784_v27 = vmax.f32 %v1666_v19, 0.0 }
 0x219   :  { %v1416_v24 = vpop.f32.mrf.mxu0  ;;  %v1673_v25 = vpop.f32.mrf.mxu1  ;;  %2087 = vmatmul.mubr.f32.gmra.mxu0 %v1782_v18 }
 0x21a   :  { %v1785_v26 = vmax.f32 %v1668_v22, 0.0  ;;  %v1417_v2 = vadd.f32 %v1416_v24, %v4173_v8  ;;  %v1672_v4 = vadd.f32 %v1671_v21, %v1415_v23 }
 0x21b   :  { %v1420_v28 = vpop.f32.mrf.mxu0  ;;  %v1677_v29 = vpop.f32.mrf.mxu1 }
 0x21c   :  { %v1674_v30 = vadd.f32 %v1673_v25, %v1417_v2  ;;  %v1421_v31 = vadd.f32 %v1420_v28, %v4169_v7  ;;  %2610 = vmatprep.mubr.msk.f32.mxu0 %vm1837_vm3, %v1785_v26  ;;  %v1786_v36 = vmax.f32 %v1672_v4, 0.0 }
 0x21d   :  { %v1422_v32 = vpop.f32.mrf.mxu0  ;;  %v1679_v33 = vpop.f32.mrf.mxu1  ;;  %2092 = vmatmul.mubr.f32.gmra.mxu0 %v1784_v27 }
 0x21e   :  { %v1787_v34 = vmax.f32 %v1674_v30, 0.0  ;;  %v1423_v35 = vadd.f32 %v1422_v32, %v4173_v8  ;;  %v1678_v37 = vadd.f32 %v1677_v29, %v1421_v31  ;;  %v2208_v31 = vld [vmem:[%s4407_s7 + $0x70] sm:$0xff] }
 0x21f   :  { %v1426_v38 = vpop.f32.mrf.mxu0  ;;  %v1683_v39 = vpop.f32.mrf.mxu1 }
 0x220   :  { %v1680_v40 = vadd.f32 %v1679_v33, %v1423_v35  ;;  %v1427_v41 = vadd.f32 %v1426_v38, %v4169_v7  ;;  %2611 = vmatprep.mubr.msk.f32.mxu0 %vm1837_vm3, %v1787_v34  ;;  %v1788_v46 = vmax.f32 %v1678_v37, 0.0 }
 0x221   :  { %v1428_v42 = vpop.f32.mrf.mxu0  ;;  %v1685_v43 = vpop.f32.mrf.mxu1  ;;  %2097 = vmatmul.mubr.f32.gmra.mxu0 %v1786_v36  ;;  %v2207_v36 = vld [vmem:[%s4407_s7 + $0x68] sm:$0xff] }
 0x222   :  { %v1789_v44 = vmax.f32 %v1680_v40, 0.0  ;;  %v1429_v45 = vadd.f32 %v1428_v42, %v4173_v8  ;;  %v1684_v47 = vadd.f32 %v1683_v39, %v1427_v41 }
 0x223   :  { %v1432_v48 = vpop.f32.mrf.mxu0  ;;  %v1689_v49 = vpop.f32.mrf.mxu1 }
 0x224   :  { %v1686_v50 = vadd.f32 %v1685_v43, %v1429_v45  ;;  %v1433_v51 = vadd.f32 %v1432_v48, %v4169_v7  ;;  %2612 = vmatprep.mubr.msk.f32.mxu0 %vm1837_vm3, %v1789_v44  ;;  %v1790_v56 = vmax.f32 %v1684_v47, 0.0  ;;  %v2206_v43 = vld [vmem:[%s4407_s7 + $0x60] sm:$0xff]  ;;  %v2205_v47 = vld [vmem:[%s4407_s7 + $0x58] sm:$0xff] }
 0x225   :  { %v1434_v52 = vpop.f32.mrf.mxu0  ;;  %v1691_v53 = vpop.f32.mrf.mxu1  ;;  %2102 = vmatmul.mubr.f32.gmra.mxu0 %v1788_v46 }
 0x226   :  { %v1791_v54 = vmax.f32 %v1686_v50, 0.0  ;;  %v1435_v55 = vadd.f32 %v1434_v52, %v4173_v8  ;;  %v1690_v57 = vadd.f32 %v1689_v49, %v1433_v51 }
 0x227   :  { %v1438_v58 = vpop.f32.mrf.mxu0  ;;  %v1695_v62 = vpop.f32.mrf.mxu1 }
 0x228   :  { %v1692_v59 = vadd.f32 %v1691_v53, %v1435_v55  ;;  %v1439_v60 = vadd.f32 %v1438_v58, %v4169_v7  ;;  %2613 = vmatprep.mubr.msk.f32.mxu0 %vm1837_vm3, %v1791_v54  ;;  %v1792_v5 = vmax.f32 %v1690_v57, 0.0  ;;  %v2204_v54 = vld [vmem:[%s4407_s7 + $0x50] sm:$0xff] }
 0x229   :  { %v1440_v61 = vpop.f32.mrf.mxu0  ;;  %v1697_v63 = vpop.f32.mrf.mxu1  ;;  %2107 = vmatmul.mubr.f32.gmra.mxu0 %v1790_v56 }
 0x22a   :  { %v1793_v1 = vmax.f32 %v1692_v59, 0.0  ;;  %v1441_v3 = vadd.f32 %v1440_v61, %v4173_v8  ;;  %v1696_v10 = vadd.f32 %v1695_v62, %v1439_v60  ;;  %v2203_v62 = vld [vmem:[%s4407_s7 + $0x48] sm:$0xff] }
 0x22b   :  { %v1444_v11 = vpop.f32.mrf.mxu0  ;;  %v1701_v12 = vpop.f32.mrf.mxu1 }
 0x22c   :  { %v1698_v13 = vadd.f32 %v1697_v63, %v1441_v3  ;;  %v1445_v14 = vadd.f32 %v1444_v11, %v4169_v7  ;;  %2614 = vmatprep.mubr.msk.f32.mxu0 %vm1837_vm3, %v1793_v1  ;;  %v1794_v17 = vmax.f32 %v1696_v10, 0.0 }
 0x22d   :  { %v1446_v15 = vpop.f32.mrf.mxu0  ;;  %v1703_v16 = vpop.f32.mrf.mxu1  ;;  %2112 = vmatmul.mubr.f32.gmra.mxu0 %v1792_v5  ;;  %v2202_v5 = vld [vmem:[%s4407_s7 + $0x40] sm:$0xff] }
 0x22e   :  { %v1795_v6 = vmax.f32 %v1698_v13, 0.0  ;;  %v1447_v9 = vadd.f32 %v1446_v15, %v4173_v8  ;;  %v1702_v18 = vadd.f32 %v1701_v12, %v1445_v14  ;;  %v2201_v14 = vld [vmem:[%s4407_s7 + $0x38] sm:$0xff] }
 0x22f   :  { %v1450_v19 = vpop.f32.mrf.mxu0  ;;  %v1707_v20 = vpop.f32.mrf.mxu1 }
 0x230   :  { %v1704_v21 = vadd.f32 %v1703_v16, %v1447_v9  ;;  %v1451_v22 = vadd.f32 %v1450_v19, %v4169_v7  ;;  %2615 = vmatprep.mubr.msk.f32.mxu0 %vm1837_vm3, %v1795_v6  ;;  %v1796_v2 = vmax.f32 %v1702_v18, 0.0  ;;  %v2200_v19 = vld [vmem:[%s4407_s7 + $0x30] sm:$0xff] }
 0x231   :  { %v1452_v23 = vpop.f32.mrf.mxu0  ;;  %v1709_v24 = vpop.f32.mrf.mxu1  ;;  %2117 = vmatmul.mubr.f32.gmra.mxu0 %v1794_v17 }
 0x232   :  { %v1797_v25 = vmax.f32 %v1704_v21, 0.0  ;;  %v1453_v26 = vadd.f32 %v1452_v23, %v4173_v8  ;;  %v1708_v27 = vadd.f32 %v1707_v20, %v1451_v22 }
 0x233   :  { %v1456_v4 = vpop.f32.mrf.mxu0  ;;  %v1713_v28 = vpop.f32.mrf.mxu1 }
 0x234   :  { %v1710_v29 = vadd.f32 %v1709_v24, %v1453_v26  ;;  %v1457_v30 = vadd.f32 %v1456_v4, %v4169_v7  ;;  %2616 = vmatprep.mubr.msk.f32.mxu1 %vm1837_vm3, %v1797_v25  ;;  %v1798_v37 = vmax.f32 %v1708_v27, 0.0  ;;  %v2199_v24 = vld [vmem:[%s4407_s7 + $0x28] sm:$0xff] }
 0x235   :  { %v1458_v32 = vpop.f32.mrf.mxu0  ;;  %v1715_v33 = vpop.f32.mrf.mxu1  ;;  %2122 = vmatmul.mubr.f32.vlgmr.msra.gmra.mxu1 %v1796_v2 }
 0x236   :  { %v1799_v34 = vmax.f32 %v1710_v29, 0.0  ;;  %v1459_v35 = vadd.f32 %v1458_v32, %v4173_v8  ;;  %2674 = vmatpush3.msra.mxu1 %v4181_v0  ;;  %v1714_v38 = vadd.f32 %v1713_v28, %v1457_v30  ;;  %v2198_v29 = vld [vmem:[%s4407_s7 + $0x20] sm:$0xff] }
 0x237   :  { %v1462_v39 = vpop.f32.mrf.mxu0  ;;  %v1719_v40 = vpop.f32.mrf.mxu1  ;;  %2675 = vmatprep.subr.mxu1 %v2208_v31 }
 0x238   :  { %v1716_v41 = vadd.f32 %v1715_v33, %v1459_v35  ;;  %v1463_v42 = vadd.f32 %v1462_v39, %v4169_v7  ;;  %2617 = vmatprep.mubr.msk.f32.mxu1 %vm1837_vm3, %v1799_v34  ;;  %2676 = vmatpush3.msra.mxu1 %v2208_v31  ;;  %v1800_v48 = vmax.f32 %v1714_v38, 0.0  ;;  %v2197_v33 = vld [vmem:[%s4407_s7 + $0x18] sm:$0xff]  ;;  %v2195_v38 = vld [vmem:[%s4407_s7 + $0x8] sm:$0xff] }
 0x239   :  { %v1464_v0 = vpop.f32.mrf.mxu0  ;;  %v1721_v44 = vpop.f32.mrf.mxu1  ;;  %2127 = vmatmul.mubr.f32.gmra.mxu1 %v1798_v37  ;;  %2677 = vmatprep.subr.mxu1 %v2207_v36  ;;  %v2196_v37 = vld [vmem:[%s4407_s7 + $0x10] sm:$0xff] }
 0x23a   :  { %v1801_v45 = vmax.f32 %v1716_v41, 0.0  ;;  %v1465_v46 = vadd.f32 %v1464_v0, %v4173_v8  ;;  %2678 = vmatpush3.msra.mxu1 %v2207_v36  ;;  %v1720_v49 = vadd.f32 %v1719_v40, %v1463_v42  ;;  %v2194_v40 = vld [vmem:[%s4407_s7] sm:$0xff] }
 0x23b   :  { %v1468_v50 = vpop.f32.mrf.mxu0  ;;  %v1725_v51 = vpop.f32.mrf.mxu1  ;;  %2679 = vmatprep.subr.mxu1 %v2206_v43  ;;  %v4326_v41 = vld [vmem:[%s4406_s6] ss:$0 sm:$0xff] }
 0x23c   :  { %v1722_v52 = vadd.f32 %v1721_v44, %v1465_v46  ;;  %v1469_v53 = vadd.f32 %v1468_v50, %v4169_v7  ;;  %2618 = vmatprep.mubr.msk.f32.mxu1 %vm1837_vm3, %v1801_v45  ;;  %2680 = vmatpush3.msra.mxu1 %v2206_v43  ;;  %v1802_v59 = vmax.f32 %v1720_v49, 0.0 }
 0x23d   :  { %v1470_v55 = vpop.f32.mrf.mxu0  ;;  %v1727_v56 = vpop.f32.mrf.mxu1  ;;  %2132 = vmatmul.mubr.f32.gmra.mxu1 %v1800_v48  ;;  %2681 = vmatprep.subr.mxu1 %v2205_v47 }
 0x23e   :  { %v1803_v57 = vmax.f32 %v1722_v52, 0.0  ;;  %v1471_v58 = vadd.f32 %v1470_v55, %v4173_v8  ;;  %2682 = vmatpush3.msra.mxu1 %v2205_v47  ;;  %v1726_v60 = vadd.f32 %v1725_v51, %v1469_v53 }
 0x23f   :  { %v1474_v61 = vpop.f32.mrf.mxu0  ;;  %v1731_v63 = vpop.f32.mrf.mxu1  ;;  %2683 = vmatprep.subr.mxu1 %v2204_v54 }
 0x240   :  { %v1728_v1 = vadd.f32 %v1727_v56, %v1471_v58  ;;  %v1475_v3 = vadd.f32 %v1474_v61, %v4169_v7  ;;  %2619 = vmatprep.mubr.msk.f32.mxu1 %vm1837_vm3, %v1803_v57  ;;  %2684 = vmatpush3.msra.mxu1 %v2204_v54  ;;  %v1804_v15 = vmax.f32 %v1726_v60, 0.0 }
 0x241   :  { %v1476_v10 = vpop.f32.mrf.mxu0  ;;  %v1733_v11 = vpop.f32.mrf.mxu1  ;;  %2137 = vmatmul.mubr.f32.gmra.mxu1 %v1802_v59  ;;  %2685 = vmatprep.subr.mxu1 %v2203_v62 }
 0x242   :  { %v1805_v12 = vmax.f32 %v1728_v1, 0.0  ;;  %v1477_v13 = vadd.f32 %v1476_v10, %v4173_v8  ;;  %2686 = vmatpush3.msra.mxu1 %v2203_v62  ;;  %v1732_v16 = vadd.f32 %v1731_v63, %v1475_v3 }
 0x243   :  { %v1480_v6 = vpop.f32.mrf.mxu0  ;;  %v1737_v9 = vpop.f32.mrf.mxu1  ;;  %2687 = vmatprep.subr.mxu1 %v2202_v5 }
 0x244   :  { %v1734_v17 = vadd.f32 %v1733_v11, %v1477_v13  ;;  %v1481_v18 = vadd.f32 %v1480_v6, %v4169_v7  ;;  %2620 = vmatprep.mubr.msk.f32.mxu1 %vm1837_vm3, %v1805_v12  ;;  %2688 = vmatpush3.msra.mxu1 %v2202_v5  ;;  %v1806_v25 = vmax.f32 %v1732_v16, 0.0 }
 0x245   :  { %v1482_v20 = vpop.f32.mrf.mxu0  ;;  %v1739_v21 = vpop.f32.mrf.mxu1  ;;  %2142 = vmatmul.mubr.f32.gmra.mxu1 %v1804_v15  ;;  %2689 = vmatprep.subr.mxu1 %v2201_v14 }
 0x246   :  { %v1807_v22 = vmax.f32 %v1734_v17, 0.0  ;;  %v1483_v23 = vadd.f32 %v1482_v20, %v4173_v8  ;;  %2690 = vmatpush3.msra.mxu1 %v2201_v14  ;;  %v1738_v26 = vadd.f32 %v1737_v9, %v1481_v18 }
 0x247   :  { %v1486_v2 = vpop.f32.mrf.mxu0  ;;  %v1743_v27 = vpop.f32.mrf.mxu1  ;;  %2691 = vmatprep.subr.mxu1 %v2200_v19 }
 0x248   :  { %v1740_v4 = vadd.f32 %v1739_v21, %v1483_v23  ;;  %v1487_v28 = vadd.f32 %v1486_v2, %v4169_v7  ;;  %2621 = vmatprep.mubr.msk.f32.mxu1 %vm1837_vm3, %v1807_v22  ;;  %2692 = vmatpush3.msra.mxu1 %v2200_v19  ;;  %v1808_v34 = vmax.f32 %v1738_v26, 0.0 }
 0x249   :  { %v1488_v30 = vpop.f32.mrf.mxu0  ;;  %2147 = vmatmul.mubr.f32.gmra.mxu1 %v1806_v25  ;;  %2693 = vmatprep.subr.mxu1 %v2199_v24  ;;  %v1745_v35 = vpop.f32.mrf.mxu1 }
 0x24a   :  { %v1809_v31 = vmax.f32 %v1740_v4, 0.0  ;;  %v1489_v32 = vadd.f32 %v1488_v30, %v4173_v8  ;;  %2694 = vmatpush3.msra.mxu1 %v2199_v24  ;;  %v1744_v7 = vadd.f32 %v1743_v27, %v1487_v28 }
 0x24b   :  { %2695 = vmatprep.subr.mxu1 %v2198_v29 }
 0x24c   :  { %v1746_v36 = vadd.f32 %v1745_v35, %v1489_v32  ;;  %2622 = vmatprep.mubr.msk.f32.mxu1 %vm1837_vm3, %v1809_v31  ;;  %2696 = vmatpush3.msra.mxu1 %v2198_v29  ;;  %v1810_v39 = vmax.f32 %v1744_v7, 0.0 }
 0x24d   :  { %2152 = vmatmul.mubr.f32.gmra.mxu1 %v1808_v34  ;;  %2697 = vmatprep.subr.mxu1 %v2197_v33 }
 0x24e   :  { %v1811_v8 = vmax.f32 %v1746_v36, 0.0  ;;  %2698 = vmatpush3.msra.mxu1 %v2197_v33 }
 0x24f   :  { %2699 = vmatprep.subr.mxu1 %v2196_v37 }
 0x250   :  { %2623 = vmatprep.mubr.msk.f32.mxu1 %vm1837_vm3, %v1811_v8  ;;  %2700 = vmatpush3.msra.mxu1 %v2196_v37 }
 0x251   :  { %2157 = vmatmul.mubr.f32.gmra.mxu1 %v1810_v39  ;;  %2701 = vmatprep.subr.mxu1 %v2195_v38 }
 0x252   :  { %2702 = vmatpush3.msra.mxu1 %v2195_v38 }
 0x253   :  { %2703 = vmatprep.subr.mxu1 %v2194_v40 }
 0x254   :  { %2704 = vmatpush3.msra.mxu1 %v2194_v40 }
 0x295   :  { %v2003_v42 = vpop.f32.mrf.mxu0 }
 0x296   :  { %v2004_v43 = vadd.f32 %v4326_v41, %v2003_v42 }
 0x297   :  { %v2005_v0 = vpop.f32.mrf.mxu0 }
 0x298   :  { %v2162_v44 = vmax.f32 %v2004_v43, 0.0 }
 0x299   :  { %v2008_v45 = vpop.f32.mrf.mxu0 }
 0x29a   :  { %v2009_v46 = vadd.f32 %v4326_v41, %v2008_v45  ;;  %2705 = vmatprep.mubr.f32.mxu1 %v2162_v44 }
 0x29b   :  { %v2010_v47 = vpop.f32.mrf.mxu0 }
 0x29c   :  { %v2163_v48 = vmax.f32 %v2009_v46, 0.0 }
 0x29d   :  { %v2013_v49 = vpop.f32.mrf.mxu0 }
 0x29e   :  { %v2014_v50 = vadd.f32 %v4326_v41, %v2013_v49  ;;  %2706 = vmatmul.mubr.f32.vlgmr.msra.gmra.mxu1 %v2163_v48 }
 0x29f   :  { %v2015_v51 = vpop.f32.mrf.mxu0 }
 0x2a0   :  { %v2164_v52 = vmax.f32 %v2014_v50, 0.0 }
 0x2a1   :  { %v2018_v53 = vpop.f32.mrf.mxu0 }
 0x2a2   :  { %v2019_v54 = vadd.f32 %v4326_v41, %v2018_v53  ;;  %2708 = vmatprep.mubr.f32.mxu1 %v2164_v52 }
 0x2a3   :  { %v2020_v55 = vpop.f32.mrf.mxu0 }
 0x2a4   :  { %v2165_v56 = vmax.f32 %v2019_v54, 0.0 }
 0x2a5   :  { %v2023_v57 = vpop.f32.mrf.mxu0 }
 0x2a6   :  { %v2024_v58 = vadd.f32 %v4326_v41, %v2023_v57  ;;  %2709 = vmatmul.mubr.f32.gmra.mxu1 %v2165_v56 }
 0x2a7   :  { %v2025_v62 = vpop.f32.mrf.mxu0 }
 0x2a8   :  { %v2166_v59 = vmax.f32 %v2024_v58, 0.0 }
 0x2a9   :  { %v2028_v60 = vpop.f32.mrf.mxu0 }
 0x2aa   :  { %v2029_v61 = vadd.f32 %v4326_v41, %v2028_v60  ;;  %2711 = vmatprep.mubr.f32.mxu1 %v2166_v59 }
 0x2ab   :  { %v2030_v63 = vpop.f32.mrf.mxu0 }
 0x2ac   :  { %v2167_v1 = vmax.f32 %v2029_v61, 0.0 }
 0x2ad   :  { %v2033_v3 = vpop.f32.mrf.mxu0 }
 0x2ae   :  { %v2034_v5 = vadd.f32 %v4326_v41, %v2033_v3  ;;  %2712 = vmatmul.mubr.f32.gmra.mxu1 %v2167_v1 }
 0x2af   :  { %v2035_v10 = vpop.f32.mrf.mxu0 }
 0x2b0   :  { %v2168_v11 = vmax.f32 %v2034_v5, 0.0 }
 0x2b1   :  { %v2038_v12 = vpop.f32.mrf.mxu0 }
 0x2b2   :  { %v2039_v13 = vadd.f32 %v4326_v41, %v2038_v12  ;;  %2714 = vmatprep.mubr.f32.mxu1 %v2168_v11 }
 0x2b3   :  { %v2040_v14 = vpop.f32.mrf.mxu0 }
 0x2b4   :  { %v2169_v15 = vmax.f32 %v2039_v13, 0.0 }
 0x2b5   :  { %v2043_v16 = vpop.f32.mrf.mxu0 }
 0x2b6   :  { %v2044_v6 = vadd.f32 %v4326_v41, %v2043_v16  ;;  %2715 = vmatmul.mubr.f32.gmra.mxu1 %v2169_v15 }
 0x2b7   :  { %v2045_v9 = vpop.f32.mrf.mxu0 }
 0x2b8   :  { %v2170_v17 = vmax.f32 %v2044_v6, 0.0 }
 0x2b9   :  { %v2048_v18 = vpop.f32.mrf.mxu0 }
 0x2ba   :  { %v2049_v19 = vadd.f32 %v4326_v41, %v2048_v18  ;;  %2717 = vmatprep.mubr.f32.mxu1 %v2170_v17 }
 0x2bb   :  { %v2050_v20 = vpop.f32.mrf.mxu0 }
 0x2bc   :  { %v2171_v21 = vmax.f32 %v2049_v19, 0.0 }
 0x2bd   :  { %v2053_v22 = vpop.f32.mrf.mxu0 }
 0x2be   :  { %v2054_v23 = vadd.f32 %v4326_v41, %v2053_v22  ;;  %2718 = vmatmul.mubr.f32.gmra.mxu1 %v2171_v21 }
 0x2bf   :  { %v2055_v24 = vpop.f32.mrf.mxu0 }
 0x2c0   :  { %v2172_v25 = vmax.f32 %v2054_v23, 0.0 }
 0x2c1   :  { %v2058_v26 = vpop.f32.mrf.mxu0 }
 0x2c2   :  { %v2059_v2 = vadd.f32 %v4326_v41, %v2058_v26  ;;  %2720 = vmatprep.mubr.f32.mxu1 %v2172_v25 }
 0x2c3   :  { %v2060_v27 = vpop.f32.mrf.mxu0 }
 0x2c4   :  { %v2173_v4 = vmax.f32 %v2059_v2, 0.0 }
 0x2c5   :  { %v2063_v28 = vpop.f32.mrf.mxu0 }
 0x2c6   :  { %v2064_v29 = vadd.f32 %v4326_v41, %v2063_v28  ;;  %2721 = vmatmul.mubr.f32.gmra.mxu1 %v2173_v4 }
 0x2c7   :  { %v2065_v30 = vpop.f32.mrf.mxu0 }
 0x2c8   :  { %v2174_v31 = vmax.f32 %v2064_v29, 0.0 }
 0x2c9   :  { %v2068_v32 = vpop.f32.mrf.mxu0 }
 0x2ca   :  { %v2069_v33 = vadd.f32 %v4326_v41, %v2068_v32  ;;  %2723 = vmatprep.mubr.f32.mxu1 %v2174_v31 }
 0x2cb   :  { %v2070_v34 = vpop.f32.mrf.mxu0 }
 0x2cc   :  { %v2175_v7 = vmax.f32 %v2069_v33, 0.0 }
 0x2cd   :  { %v2073_v35 = vpop.f32.mrf.mxu0 }
 0x2ce   :  { %v2074_v36 = vadd.f32 %v4326_v41, %v2073_v35  ;;  %2724 = vmatmul.mubr.f32.gmra.mxu1 %v2175_v7 }
 0x2cf   :  { %v2075_v37 = vpop.f32.mrf.mxu0 }
 0x2d0   :  { %v2176_v8 = vmax.f32 %v2074_v36, 0.0 }
 0x2d1   :  { %v2078_v38 = vpop.f32.mrf.mxu0 }
 0x2d2   :  { %v2079_v39 = vadd.f32 %v4326_v41, %v2078_v38  ;;  %2726 = vmatprep.mubr.f32.mxu1 %v2176_v8 }
 0x2d3   :  { %v2080_v40 = vpop.f32.mrf.mxu0 }
 0x2d4   :  { %v2177_v42 = vmax.f32 %v2079_v39, 0.0 }
 0x2d5   :  { %v2083_v43 = vpop.f32.mrf.mxu0 }
 0x2d6   :  { %v2084_v0 = vadd.f32 %v4326_v41, %v2083_v43  ;;  %2727 = vmatmul.mubr.f32.gmra.mxu1 %v2177_v42 }
 0x2d7   :  { %v2085_v44 = vpop.f32.mrf.mxu0 }
 0x2d8   :  { %v2178_v45 = vmax.f32 %v2084_v0, 0.0  ;;  %v4363_v0 = vld [vmem:[%s4408_s8] ss:$0 sm:$0xff]  ;;  %s2816_s8 = smov [#allocation2]  }
 0x2d9   :  { %v2088_v46 = vpop.f32.mrf.mxu0  ;;  %s2479_s14 = sshll.u32 %s2816_s8, 4  ;;  %s2480_s14 = int_to_ptr.vmem [resolvable:$true] %s2479_s14 }
 0x2da   :  { %v2089_v47 = vadd.f32 %v4326_v41, %v2088_v46  ;;  %2729 = vmatprep.mubr.f32.mxu1 %v2178_v45  ;;  %s2793_s15 = scalar_lea.vmem %s2480_s14, 4096  ;;  %p2798_p1 = scmp.lt.s32.totalorder %s2480_s14, %s2480_s14 }
 0x2db   :  { %v2090_v48 = vpop.f32.mrf.mxu0  ;;  %p2794_p0 = scmp.ne.s32.totalorder %s2480_s14, %s2793_s15  ;;  %p2799_p2 = scmp.lt.s32.totalorder %s2793_s15, %s2793_s15 }
 0x2dc   :  { %v2179_v49 = vmax.f32 %v2089_v47, 0.0 }
 0x2dd   :  { %v2093_v50 = vpop.f32.mrf.mxu0  ;;  %p2800_p3 = por %p2799_p2, %p2798_p1 }
 0x2de   :  { %v2094_v51 = vadd.f32 %v4326_v41, %v2093_v50  ;;  %2730 = vmatmul.mubr.f32.gmra.mxu1 %v2179_v49 }
 0x2df   :  { %v2095_v52 = vpop.f32.mrf.mxu0  ;;  %p2801_p4 = pnand %p2800_p3, %p2794_p0 }
 0x2e0   :  { %v2180_v53 = vmax.f32 %v2094_v51, 0.0 }
 0x2e1   :  { %v2098_v54 = vpop.f32.mrf.mxu0 }
 0x2e2   :  { %v2099_v55 = vadd.f32 %v4326_v41, %v2098_v54  ;;  %2732 = vmatprep.mubr.f32.mxu1 %v2180_v53 }
 0x2e3   :  { %v2100_v56 = vpop.f32.mrf.mxu0 }
 0x2e4   :  { %v2181_v57 = vmax.f32 %v2099_v55, 0.0 }
 0x2e5   :  { %v2103_v58 = vpop.f32.mrf.mxu0 }
 0x2e6   :  { %v2104_v62 = vadd.f32 %v4326_v41, %v2103_v58  ;;  %2733 = vmatmul.mubr.f32.gmra.mxu1 %v2181_v57 }
 0x2e7   :  { %v2105_v59 = vpop.f32.mrf.mxu0 }
 0x2e8   :  { %v2182_v60 = vmax.f32 %v2104_v62, 0.0 }
 0x2e9   :  { %v2108_v61 = vpop.f32.mrf.mxu0 }
 0x2ea   :  { %v2109_v63 = vadd.f32 %v4326_v41, %v2108_v61  ;;  %2735 = vmatprep.mubr.f32.mxu1 %v2182_v60 }
 0x2eb   :  { %v2110_v1 = vpop.f32.mrf.mxu0 }
 0x2ec   :  { %v2183_v3 = vmax.f32 %v2109_v63, 0.0 }
 0x2ed   :  { %v2113_v5 = vpop.f32.mrf.mxu0 }
 0x2ee   :  { %v2114_v10 = vadd.f32 %v4326_v41, %v2113_v5  ;;  %2736 = vmatmul.mubr.f32.gmra.mxu1 %v2183_v3 }
 0x2ef   :  { %v2115_v11 = vpop.f32.mrf.mxu0 }
 0x2f0   :  { %v2184_v12 = vmax.f32 %v2114_v10, 0.0 }
 0x2f1   :  { %v2118_v13 = vpop.f32.mrf.mxu0 }
 0x2f2   :  { %v2119_v14 = vadd.f32 %v4326_v41, %v2118_v13  ;;  %2738 = vmatprep.mubr.f32.mxu1 %v2184_v12 }
 0x2f3   :  { %v2120_v15 = vpop.f32.mrf.mxu0 }
 0x2f4   :  { %v2185_v16 = vmax.f32 %v2119_v14, 0.0 }
 0x2f5   :  { %v2123_v6 = vpop.f32.mrf.mxu1 }
 0x2f6   :  { %v2124_v9 = vadd.f32 %v4326_v41, %v2123_v6  ;;  %2739 = vmatmul.mubr.f32.gmra.mxu1 %v2185_v16 }
 0x2f7   :  { %v2125_v17 = vpop.f32.mrf.mxu1 }
 0x2f8   :  { %v2186_v18 = vmax.f32 %v2124_v9, 0.0 }
 0x2f9   :  { %v2128_v19 = vpop.f32.mrf.mxu1 }
 0x2fa   :  { %v2129_v20 = vadd.f32 %v4326_v41, %v2128_v19  ;;  %2741 = vmatprep.mubr.f32.mxu1 %v2186_v18 }
 0x2fb   :  { %v2130_v21 = vpop.f32.mrf.mxu1 }
 0x2fc   :  { %v2187_v22 = vmax.f32 %v2129_v20, 0.0 }
 0x2fd   :  { %v2133_v23 = vpop.f32.mrf.mxu1 }
 0x2fe   :  { %v2134_v24 = vadd.f32 %v4326_v41, %v2133_v23  ;;  %2742 = vmatmul.mubr.f32.gmra.mxu1 %v2187_v22 }
 0x2ff   :  { %v2135_v25 = vpop.f32.mrf.mxu1 }
 0x300   :  { %v2188_v26 = vmax.f32 %v2134_v24, 0.0 }
 0x301   :  { %v2138_v2 = vpop.f32.mrf.mxu1 }
 0x302   :  { %v2139_v27 = vadd.f32 %v4326_v41, %v2138_v2  ;;  %2744 = vmatprep.mubr.f32.mxu1 %v2188_v26 }
 0x303   :  { %v2140_v4 = vpop.f32.mrf.mxu1 }
 0x304   :  { %v2189_v28 = vmax.f32 %v2139_v27, 0.0 }
 0x305   :  { %v2143_v29 = vpop.f32.mrf.mxu1 }
 0x306   :  { %v2144_v30 = vadd.f32 %v4326_v41, %v2143_v29  ;;  %2745 = vmatmul.mubr.f32.gmra.mxu1 %v2189_v28 }
 0x307   :  { %v2145_v31 = vpop.f32.mrf.mxu1 }
 0x308   :  { %v2190_v32 = vmax.f32 %v2144_v30, 0.0 }
 0x309   :  { %v2148_v33 = vpop.f32.mrf.mxu1 }
 0x30a   :  { %v2149_v34 = vadd.f32 %v4326_v41, %v2148_v33  ;;  %2747 = vmatprep.mubr.f32.mxu1 %v2190_v32 }
 0x30b   :  { %v2150_v7 = vpop.f32.mrf.mxu1 }
 0x30c   :  { %v2191_v35 = vmax.f32 %v2149_v34, 0.0 }
 0x30d   :  { %v2153_v36 = vpop.f32.mrf.mxu1 }
 0x30e   :  { %v2154_v37 = vadd.f32 %v4326_v41, %v2153_v36  ;;  %2748 = vmatmul.mubr.f32.gmra.mxu1 %v2191_v35 }
 0x30f   :  { %v2155_v8 = vpop.f32.mrf.mxu1 }
 0x310   :  { %v2192_v38 = vmax.f32 %v2154_v37, 0.0 }
 0x311   :  { %v2158_v39 = vpop.f32.mrf.mxu1 }
 0x312   :  { %v2159_v40 = vadd.f32 %v4326_v41, %v2158_v39  ;;  %2750 = vmatprep.mubr.f32.mxu1 %v2192_v38 }
 0x313   :  { %v2160_v42 = vpop.f32.mrf.mxu1 }
 0x314   :  { %v2193_v43 = vmax.f32 %v2159_v40, 0.0 }
 0x316   :  { %2751 = vmatmul.mubr.f32.gmra.mxu1 %v2193_v43 }
 0x35e   :  { %v2707_v44 = vpop.f32.mrf.mxu1 }
 0x35f   :  { %v2289_v45 = vadd.f32 %v2707_v44, %v4363_v0 }
 0x360   :  { %v2283_v46 = vpop.f32.mrf.mxu1 }
 0x361   :  { %2443 = vst [vmem:[#allocation2 + $0x8] sm:$0xff] %v2289_v45  ;;  %v2284_v47 = vadd.f32 %v4363_v0, %v2283_v46 }
 0x363   :  { %2442 = vst [vmem:[#allocation2] sm:$0xff] %v2284_v47 }
 0x366   :  { %v2710_v48 = vpop.f32.mrf.mxu1 }
 0x367   :  { %v2299_v41 = vadd.f32 %v2710_v48, %v4363_v0 }
 0x368   :  { %v2293_v49 = vpop.f32.mrf.mxu1 }
 0x369   :  { %2445 = vst [vmem:[#allocation2 + $0x18] sm:$0xff] %v2299_v41  ;;  %v2294_v50 = vadd.f32 %v4363_v0, %v2293_v49 }
 0x36b   :  { %2444 = vst [vmem:[#allocation2 + $0x10] sm:$0xff] %v2294_v50 }
 0x36e   :  { %v2713_v51 = vpop.f32.mrf.mxu1 }
 0x36f   :  { %v2309_v52 = vadd.f32 %v2713_v51, %v4363_v0 }
 0x370   :  { %v2303_v53 = vpop.f32.mrf.mxu1 }
 0x371   :  { %2447 = vst [vmem:[#allocation2 + $0x28] sm:$0xff] %v2309_v52  ;;  %v2304_v54 = vadd.f32 %v4363_v0, %v2303_v53 }
 0x373   :  { %2446 = vst [vmem:[#allocation2 + $0x20] sm:$0xff] %v2304_v54 }
 0x376   :  { %v2716_v55 = vpop.f32.mrf.mxu1 }
 0x377   :  { %v2319_v56 = vadd.f32 %v2716_v55, %v4363_v0 }
 0x378   :  { %v2313_v57 = vpop.f32.mrf.mxu1 }
 0x379   :  { %2449 = vst [vmem:[#allocation2 + $0x38] sm:$0xff] %v2319_v56  ;;  %v2314_v58 = vadd.f32 %v4363_v0, %v2313_v57 }
 0x37b   :  { %2448 = vst [vmem:[#allocation2 + $0x30] sm:$0xff] %v2314_v58 }
 0x37e   :  { %v2719_v62 = vpop.f32.mrf.mxu1 }
 0x37f   :  { %v2329_v59 = vadd.f32 %v2719_v62, %v4363_v0 }
 0x380   :  { %v2323_v60 = vpop.f32.mrf.mxu1 }
 0x381   :  { %2451 = vst [vmem:[#allocation2 + $0x48] sm:$0xff] %v2329_v59  ;;  %v2324_v61 = vadd.f32 %v4363_v0, %v2323_v60 }
 0x383   :  { %2450 = vst [vmem:[#allocation2 + $0x40] sm:$0xff] %v2324_v61 }
 0x386   :  { %v2722_v63 = vpop.f32.mrf.mxu1 }
 0x387   :  { %v2339_v1 = vadd.f32 %v2722_v63, %v4363_v0 }
 0x388   :  { %v2333_v3 = vpop.f32.mrf.mxu1 }
 0x389   :  { %2453 = vst [vmem:[#allocation2 + $0x58] sm:$0xff] %v2339_v1  ;;  %v2334_v5 = vadd.f32 %v4363_v0, %v2333_v3 }
 0x38b   :  { %2452 = vst [vmem:[#allocation2 + $0x50] sm:$0xff] %v2334_v5 }
 0x38e   :  { %v2725_v10 = vpop.f32.mrf.mxu1 }
 0x38f   :  { %v2349_v11 = vadd.f32 %v2725_v10, %v4363_v0 }
 0x390   :  { %v2343_v12 = vpop.f32.mrf.mxu1 }
 0x391   :  { %2455 = vst [vmem:[#allocation2 + $0x68] sm:$0xff] %v2349_v11  ;;  %v2344_v13 = vadd.f32 %v4363_v0, %v2343_v12 }
 0x393   :  { %2454 = vst [vmem:[#allocation2 + $0x60] sm:$0xff] %v2344_v13 }
 0x396   :  { %v2728_v14 = vpop.f32.mrf.mxu1 }
 0x397   :  { %v2359_v15 = vadd.f32 %v2728_v14, %v4363_v0 }
 0x398   :  { %v2353_v16 = vpop.f32.mrf.mxu1 }
 0x399   :  { %2457 = vst [vmem:[#allocation2 + $0x78] sm:$0xff] %v2359_v15  ;;  %v2354_v6 = vadd.f32 %v4363_v0, %v2353_v16 }
 0x39b   :  { %2456 = vst [vmem:[#allocation2 + $0x70] sm:$0xff] %v2354_v6 }
 0x39e   :  { %v2731_v9 = vpop.f32.mrf.mxu1 }
 0x39f   :  { %v2369_v17 = vadd.f32 %v2731_v9, %v4363_v0 }
 0x3a0   :  { %v2363_v18 = vpop.f32.mrf.mxu1 }
 0x3a1   :  { %2459 = vst [vmem:[#allocation2 + $0x88] sm:$0xff] %v2369_v17  ;;  %v2364_v19 = vadd.f32 %v4363_v0, %v2363_v18 }
 0x3a3   :  { %2458 = vst [vmem:[#allocation2 + $0x80] sm:$0xff] %v2364_v19 }
 0x3a6   :  { %v2734_v20 = vpop.f32.mrf.mxu1 }
 0x3a7   :  { %v2379_v21 = vadd.f32 %v2734_v20, %v4363_v0 }
 0x3a8   :  { %v2373_v22 = vpop.f32.mrf.mxu1 }
 0x3a9   :  { %2461 = vst [vmem:[#allocation2 + $0x98] sm:$0xff] %v2379_v21  ;;  %v2374_v23 = vadd.f32 %v4363_v0, %v2373_v22 }
 0x3ab   :  { %2460 = vst [vmem:[#allocation2 + $0x90] sm:$0xff] %v2374_v23 }
 0x3ae   :  { %v2737_v24 = vpop.f32.mrf.mxu1 }
 0x3af   :  { %v2389_v25 = vadd.f32 %v2737_v24, %v4363_v0 }
 0x3b0   :  { %v2383_v26 = vpop.f32.mrf.mxu1 }
 0x3b1   :  { %2463 = vst [vmem:[#allocation2 + $0xa8] sm:$0xff] %v2389_v25  ;;  %v2384_v2 = vadd.f32 %v4363_v0, %v2383_v26 }
 0x3b3   :  { %2462 = vst [vmem:[#allocation2 + $0xa0] sm:$0xff] %v2384_v2 }
 0x3b6   :  { %v2740_v27 = vpop.f32.mrf.mxu1 }
 0x3b7   :  { %v2399_v4 = vadd.f32 %v2740_v27, %v4363_v0 }
 0x3b8   :  { %v2393_v28 = vpop.f32.mrf.mxu1 }
 0x3b9   :  { %2465 = vst [vmem:[#allocation2 + $0xb8] sm:$0xff] %v2399_v4  ;;  %v2394_v29 = vadd.f32 %v4363_v0, %v2393_v28 }
 0x3bb   :  { %2464 = vst [vmem:[#allocation2 + $0xb0] sm:$0xff] %v2394_v29 }
 0x3be   :  { %v2743_v30 = vpop.f32.mrf.mxu1 }
 0x3bf   :  { %v2409_v31 = vadd.f32 %v2743_v30, %v4363_v0 }
 0x3c0   :  { %v2403_v32 = vpop.f32.mrf.mxu1 }
 0x3c1   :  { %2467 = vst [vmem:[#allocation2 + $0xc8] sm:$0xff] %v2409_v31  ;;  %v2404_v33 = vadd.f32 %v4363_v0, %v2403_v32 }
 0x3c3   :  { %2466 = vst [vmem:[#allocation2 + $0xc0] sm:$0xff] %v2404_v33 }
 0x3c6   :  { %v2746_v34 = vpop.f32.mrf.mxu1 }
 0x3c7   :  { %v2419_v7 = vadd.f32 %v2746_v34, %v4363_v0 }
 0x3c8   :  { %v2413_v35 = vpop.f32.mrf.mxu1 }
 0x3c9   :  { %2469 = vst [vmem:[#allocation2 + $0xd8] sm:$0xff] %v2419_v7  ;;  %v2414_v36 = vadd.f32 %v4363_v0, %v2413_v35 }
 0x3cb   :  { %2468 = vst [vmem:[#allocation2 + $0xd0] sm:$0xff] %v2414_v36 }
 0x3ce   :  { %v2749_v37 = vpop.f32.mrf.mxu1 }
 0x3cf   :  { %v2429_v8 = vadd.f32 %v2749_v37, %v4363_v0 }
 0x3d0   :  { %v2423_v38 = vpop.f32.mrf.mxu1 }
 0x3d1   :  { %2471 = vst [vmem:[#allocation2 + $0xe8] sm:$0xff] %v2429_v8  ;;  %v2424_v39 = vadd.f32 %v4363_v0, %v2423_v38 }
 0x3d3   :  { %2470 = vst [vmem:[#allocation2 + $0xe0] sm:$0xff] %v2424_v39 }
 0x3d6   :  { %v2752_v40 = vpop.f32.mrf.mxu1 }
 0x3d7   :  { %v2439_v42 = vadd.f32 %v2752_v40, %v4363_v0 }
 0x3d8   :  { %v2433_v43 = vpop.f32.mrf.mxu1 }
 0x3d9   :  { %2473 = vst [vmem:[#allocation2 + $0xf8] sm:$0xff] %v2439_v42  ;;  %v2434_v44 = vadd.f32 %v4363_v0, %v2433_v43 }
 0x3db   :  { %2472 = vst [vmem:[#allocation2 + $0xf0] sm:$0xff] %v2434_v44 }
 0x3dc   :  { %2804 = shalt.err (!%p2801_p4)
}
 0x3dd   :  { %s2817_s16 = smov 128   ;;  %s2818_s17 = smov 8  }
 0x3de   :  { %2485 = dma.vmem_to_hbm [thread:$0]  %s2480_s14, 4096, %s4409_s9, [#allocation3], %s2817_s16, %s2817_s16, %s2818_s17  }
 0x3df   :  { %2813 = dma.done.wait [#allocation3], 4096  }
 0x3e0   :  { %2814 = vsyncadd [#allocation3], 4294963200 }
 0x3e1   :  { %2489 = vsyncpa [#allocation3], 1 }

</bundles_post_ra>
